<compile_context>
chip_gen: v7x
topology: tpu7x:2x2x1
jax: 0.10.0
libtpu: 0.0.40
codegen_flags: <defaults>
</compile_context>

<pallas_src>
import functools

import jax
import jax.numpy as jnp
from jax import lax
from jax.experimental import pallas as pl
from jax.experimental.pallas import tpu as pltpu

CP = 128  # padded channel width -> lane-dense layout everywhere


# ---------------------------------------------------------------------------
# Fused bottleneck kernel (one image per grid step)
# ---------------------------------------------------------------------------
def _bottleneck_kernel(x_ref, w1_ref, b1_ref, w2_ref, b2_ref, w3_ref, b3_ref,
                       mask_ref, o_ref, pad_ref, *, W, M, halo):
    cp = o_ref.shape[-1]

    x = x_ref[...]                                              # (M, CP) bf16

    # ---- conv1 (1x1, BN1 scale folded into w1) + bias + ReLU ---------------
    y1 = jnp.maximum(
        jnp.dot(x, w1_ref[...], preferred_element_type=jnp.float32)
        + b1_ref[...], 0.0)                                     # (M, CP) f32

    # ---- stage y1 (bf16) into a halo-padded VMEM scratch --------------------
    # halo is a multiple of 16 >= W+1, so these three stores are sublane-
    # aligned for packed bf16 rows.
    pad_ref[pl.ds(0, halo), :] = jnp.zeros((halo, cp), pad_ref.dtype)
    pad_ref[pl.ds(halo + M, halo), :] = jnp.zeros((halo, cp), pad_ref.dtype)
    pad_ref[pl.ds(halo, M), :] = y1.astype(pad_ref.dtype)

    # ---- conv2 (3x3, pad=1): 9 shifted taps -> ONE K = 9*CP matmul ---------
    m = mask_ref[...]                                           # (M, 2) f32
    valid_l = m[:, 0:1] > 0.5      # output col > 0      (needed for dx = -1)
    valid_r = m[:, 1:2] > 0.5      # output col < W - 1  (needed for dx = +1)
    taps = []
    for dy in (-1, 0, 1):
        for dx in (-1, 0, 1):
            t = pad_ref[pl.ds(halo + dy * W + dx, M), :]        # (M, CP) bf16
            if dx == -1:
                t = jnp.where(valid_l, t, jnp.zeros_like(t))
            elif dx == 1:
                t = jnp.where(valid_r, t, jnp.zeros_like(t))
            taps.append(t)
    t_cat = jnp.concatenate(taps, axis=-1)                      # (M, 9*CP) bf16
    y2 = jnp.maximum(
        jnp.dot(t_cat, w2_ref[...], preferred_element_type=jnp.float32)
        + b2_ref[...], 0.0).astype(x.dtype)                     # (M, CP) bf16

    # ---- conv3 (1x1 expand, BN3 folded) + identity + ReLU ------------------
    y3 = (jnp.dot(y2, w3_ref[...], preferred_element_type=jnp.float32)
          + b3_ref[...] + x.astype(jnp.float32))
    o_ref[...] = jnp.maximum(y3, 0.0).astype(o_ref.dtype)


def _fused_block(x2d, mask, kp, *, W):
    N, M, cp = x2d.shape
    halo = ((W + 1 + 15) // 16) * 16          # zero rows above/below, aligned
    kernel = functools.partial(_bottleneck_kernel, W=W, M=M, halo=halo)
    return pl.pallas_call(
        kernel,
        out_shape=jax.ShapeDtypeStruct((N, M, cp), jnp.float32),
        grid=(N,),
        in_specs=[
            pl.BlockSpec((None, M, cp), lambda n: (n, 0, 0)),   # x (one image)
            pl.BlockSpec((cp, cp), lambda n: (0, 0)),           # w1 (folded)
            pl.BlockSpec((1, cp), lambda n: (0, 0)),            # b1
            pl.BlockSpec((9 * cp, cp), lambda n: (0, 0)),       # w2 (tap-major)
            pl.BlockSpec((1, cp), lambda n: (0, 0)),            # b2
            pl.BlockSpec((cp, cp), lambda n: (0, 0)),           # w3 (folded)
            pl.BlockSpec((1, cp), lambda n: (0, 0)),            # b3
            pl.BlockSpec((M, 2), lambda n: (0, 0)),             # W-edge masks
        ],
        out_specs=pl.BlockSpec((None, M, cp), lambda n: (n, 0, 0)),
        scratch_shapes=[pltpu.VMEM((M + 2 * halo, cp), jnp.bfloat16)],
        compiler_params=pltpu.CompilerParams(
            dimension_semantics=("parallel",)),
    )(x2d, kp["w1"], kp["b1"], kp["w2"], kp["b2"], kp["w3"], kp["b3"], mask)


# ---------------------------------------------------------------------------
# Wrapper: NCHW in / NCHW out, layout glue outside the kernel
# ---------------------------------------------------------------------------
@functools.partial(jax.jit, static_argnames=("cout",))
def bottleneck_forward(x_nchw, kp, *, cout):
    N, cin, H, W = x_nchw.shape
    cp = kp["w1"].shape[0]
    M = H * W
    # NCHW -> (N, H*W, C) channels-last, zero-pad channels to CP lanes, bf16.
    x = jnp.transpose(x_nchw, (0, 2, 3, 1)).reshape(N, M, cin)
    x = jnp.pad(x, ((0, 0), (0, 0), (0, cp - cin))).astype(jnp.bfloat16)
    # Per-pixel W-edge validity (only depends on the column coordinate).
    col = jnp.arange(M, dtype=jnp.int32) % W
    mask = jnp.stack([col > 0, col < W - 1], axis=1).astype(jnp.float32)
    y = _fused_block(x, mask, kp, W=W)                          # (N, M, CP) f32
    y = y[:, :, :cout].reshape(N, H, W, cout)
    return jnp.transpose(y, (0, 3, 1, 2))


# ---------------------------------------------------------------------------
# Parameter construction: raw conv weights + BN stats -> folded / padded /
# bf16 kernel operands, plus matching (unpadded) reference params.
# ---------------------------------------------------------------------------
def bn_fold(gamma, beta, mean, var, eps=1e-5):
    scale = gamma * lax.rsqrt(var + eps)
    return scale, beta - mean * scale


def make_raw_params(key, cin, cmid, cout):
    ks = jax.random.split(key, 15)
    p = {
        "w1": 0.1 * jax.random.normal(ks[0], (cin, cmid), jnp.float32),
        "w2": 0.1 * jax.random.normal(ks[1], (3, 3, cmid, cmid), jnp.float32),
        "w3": 0.1 * jax.random.normal(ks[2], (cmid, cout), jnp.float32),
    }
    for i, (n, c) in enumerate([("1", cmid), ("2", cmid), ("3", cout)]):
        k = ks[3 + 4 * i: 7 + 4 * i]
        p["g" + n] = 1.0 + 0.1 * jax.random.normal(k[0], (c,), jnp.float32)
        p["be" + n] = 0.1 * jax.random.normal(k[1], (c,), jnp.float32)
        p["mu" + n] = 0.1 * jax.random.normal(k[2], (c,), jnp.float32)
        p["va" + n] = jax.random.uniform(k[3], (c,), jnp.float32, 0.5, 1.5)
    return p


def prepare_params(raw, cin, cmid, cout, cp=CP):
    s1, b1 = bn_fold(raw["g1"], raw["be1"], raw["mu1"], raw["va1"])
    s2, b2 = bn_fold(raw["g2"], raw["be2"], raw["mu2"], raw["va2"])
    s3, b3 = bn_fold(raw["g3"], raw["be3"], raw["mu3"], raw["va3"])
    # Fold BN scale into the conv weights; biases are applied in-kernel (f32).
    w1q = (raw["w1"] * s1[None, :]).astype(jnp.bfloat16)
    w2q = (raw["w2"] * s2[None, None, None, :]).astype(jnp.bfloat16)
    w3q = (raw["w3"] * s3[None, :]).astype(jnp.bfloat16)
    # Kernel operands: channel dims zero-padded to cp; w2 laid out tap-major
    # (k = ky*3 + kx) as (9*cp, cp) so the 3x3 conv is one K = 9*cp matmul.
    w1k = jnp.zeros((cp, cp), jnp.bfloat16).at[:cin, :cmid].set(w1q)
    w2k = (jnp.zeros((9, cp, cp), jnp.bfloat16)
           .at[:, :cmid, :cmid].set(w2q.reshape(9, cmid, cmid))
           .reshape(9 * cp, cp))
    w3k = jnp.zeros((cp, cp), jnp.bfloat16).at[:cmid, :cout].set(w3q)
    b1k = jnp.zeros((1, cp), jnp.float32).at[0, :cmid].set(b1)
    b2k = jnp.zeros((1, cp), jnp.float32).at[0, :cmid].set(b2)
    b3k = jnp.zeros((1, cp), jnp.float32).at[0, :cout].set(b3)
    kernel_p = {"w1": w1k, "b1": b1k, "w2": w2k, "b2": b2k, "w3": w3k, "b3": b3k}
    ref_p = {"w1f": w1q.astype(jnp.float32), "w2f": w2q.astype(jnp.float32),
             "w3f": w3q.astype(jnp.float32), "b1": b1, "b2": b2, "b3": b3}
    return kernel_p, ref_p


# ---------------------------------------------------------------------------
# Pure-JAX reference (same folded weights / bf16 quantization points, f32 math)
# ---------------------------------------------------------------------------
def reference_forward(x_nchw, rp):
    dn = ("NHWC", "HWIO", "NHWC")
    hi = lax.Precision.HIGHEST
    q = lambda a: a.astype(jnp.bfloat16).astype(jnp.float32)
    x = q(jnp.transpose(x_nchw, (0, 2, 3, 1)))
    identity = x
    y = lax.conv_general_dilated(x, rp["w1f"][None, None], (1, 1), "VALID",
                                 dimension_numbers=dn, precision=hi)
    y = q(jnp.maximum(y + rp["b1"], 0.0))
    y = lax.conv_general_dilated(y, rp["w2f"], (1, 1), "SAME",
                                 dimension_numbers=dn, precision=hi)
    y = q(jnp.maximum(y + rp["b2"], 0.0))
    y = lax.conv_general_dilated(y, rp["w3f"][None, None], (1, 1), "VALID",
                                 dimension_numbers=dn, precision=hi)
    y = jnp.maximum(y + rp["b3"] + identity, 0.0)
    return jnp.transpose(y, (0, 3, 1, 2))


if __name__ == "__main__":
    # batch=2, in_channel=16, out_channel(mid)=4, expansion 4 -> 16 (== Cin so
    # the residual add is valid with downsample=None), spatial 16x16, stride=1.
    N, Cin, H, W = 2, 16, 16, 16
    Cmid = 4
    Cout = Cmid * 4

    key = jax.random.PRNGKey(0)
    kx, kparam = jax.random.split(key)
    x = jax.random.normal(kx, (N, Cin, H, W), jnp.float32)
    raw = make_raw_params(kparam, Cin, Cmid, Cout)
    kernel_p, ref_p = prepare_params(raw, Cin, Cmid, Cout)

    out = bottleneck_forward(x, kernel_p, cout=Cout)
    out = jax.block_until_ready(out)

    ref = reference_forward(x, ref_p)
    assert out.shape == (N, Cout, H, W), out.shape
    err = float(jnp.max(jnp.abs(out - ref)))
    assert jnp.allclose(out, ref, atol=1e-3, rtol=1e-3), err

    print("KERNEL_OK")
</pallas_src>

<mosaic_0001>
module attributes {stable_mosaic.version = 11 : i64} {
  func.func @_bottleneck_kernel(%arg0: i32, %arg1: memref<1x256x128xbf16, #tpu.memory_space<vmem>>, %arg2: memref<128x128xbf16, #tpu.memory_space<vmem>>, %arg3: memref<1x128xf32, #tpu.memory_space<vmem>>, %arg4: memref<1152x128xbf16, #tpu.memory_space<vmem>>, %arg5: memref<1x128xf32, #tpu.memory_space<vmem>>, %arg6: memref<128x128xbf16, #tpu.memory_space<vmem>>, %arg7: memref<1x128xf32, #tpu.memory_space<vmem>>, %arg8: memref<256x2xf32, #tpu.memory_space<vmem>>, %arg9: memref<1x256x128xf32, #tpu.memory_space<vmem>>, %arg10: memref<320x128xbf16, #tpu.memory_space<vmem>>) attributes {dimension_semantics = [#tpu.dimension_semantics<parallel>], iteration_bounds = array<i64: 2>, scalar_prefetch = 0 : i64, scratch_operands = 1 : i64, tpu.core_type = #tpu.core_type<tc>, window_params = [{transform_indices = @transform_0, window_bounds = array<i64: 1, 256, 128>}, {pipeline_mode = #tpu.pipeline_mode<synchronous>, transform_indices = @transform_1, window_bounds = array<i64: 128, 128>}, {pipeline_mode = #tpu.pipeline_mode<synchronous>, transform_indices = @transform_2, window_bounds = array<i64: 1, 128>}, {pipeline_mode = #tpu.pipeline_mode<synchronous>, transform_indices = @transform_3, window_bounds = array<i64: 1152, 128>}, {pipeline_mode = #tpu.pipeline_mode<synchronous>, transform_indices = @transform_4, window_bounds = array<i64: 1, 128>}, {pipeline_mode = #tpu.pipeline_mode<synchronous>, transform_indices = @transform_5, window_bounds = array<i64: 128, 128>}, {pipeline_mode = #tpu.pipeline_mode<synchronous>, transform_indices = @transform_6, window_bounds = array<i64: 1, 128>}, {pipeline_mode = #tpu.pipeline_mode<synchronous>, transform_indices = @transform_7, window_bounds = array<i64: 256, 2>}, {transform_indices = @transform_8, window_bounds = array<i64: 1, 256, 128>}]} {
    %c0 = arith.constant 0 : index
    %c0_0 = arith.constant 0 : index
    %c0_1 = arith.constant 0 : index
    %0 = vector.load %arg1[%c0, %c0_0, %c0_1] : memref<1x256x128xbf16, #tpu.memory_space<vmem>>, vector<1x256x128xbf16>
    %1 = vector.shape_cast %0 : vector<1x256x128xbf16> to vector<256x128xbf16>
    %c0_2 = arith.constant 0 : index
    %c0_3 = arith.constant 0 : index
    %2 = vector.load %arg2[%c0_2, %c0_3] : memref<128x128xbf16, #tpu.memory_space<vmem>>, vector<128x128xbf16>
    %cst = arith.constant dense<0.000000e+00> : vector<256x128xf32>
    %3 = tpu.matmul %1, %2, %cst {dimension_numbers = #tpu.dot_dimension_numbers<[1], [0], [0], [1], [0, 0, 1, 1], [], []>} : vector<256x128xbf16>, vector<128x128xbf16>, vector<256x128xf32> -> vector<256x128xf32>
    %c0_4 = arith.constant 0 : index
    %c0_5 = arith.constant 0 : index
    %4 = vector.load %arg3[%c0_4, %c0_5] : memref<1x128xf32, #tpu.memory_space<vmem>>, vector<1x128xf32>
    %5 = vector.broadcast %4 : vector<1x128xf32> to vector<256x128xf32>
    %6 = arith.addf %3, %5 : vector<256x128xf32>
    %cst_6 = arith.constant 0.000000e+00 : f32
    %7 = vector.broadcast %cst_6 : f32 to vector<256x128xf32>
    %8 = arith.maximumf %6, %7 : vector<256x128xf32>
    %cst_7 = arith.constant 0.000000e+00 : bf16
    %9 = vector.broadcast %cst_7 : bf16 to vector<32x128xbf16>
    %c0_8 = arith.constant 0 : index
    %c0_9 = arith.constant 0 : index
    %10 = vector.load %arg10[%c0_8, %c0_9] : memref<320x128xbf16, #tpu.memory_space<vmem>>, vector<32x128xbf16>
    tpu.vector_store %arg10[%c0_8, %c0_9], %9 {strides = array<i32>} : memref<320x128xbf16, #tpu.memory_space<vmem>>, vector<32x128xbf16>,
    %cst_10 = arith.constant 0.000000e+00 : bf16
    %11 = vector.broadcast %cst_10 : bf16 to vector<32x128xbf16>
    %c288 = arith.constant 288 : index
    %c0_11 = arith.constant 0 : index
    %12 = vector.load %arg10[%c288, %c0_11] : memref<320x128xbf16, #tpu.memory_space<vmem>>, vector<32x128xbf16>
    tpu.vector_store %arg10[%c288, %c0_11], %11 {strides = array<i32>} : memref<320x128xbf16, #tpu.memory_space<vmem>>, vector<32x128xbf16>,
    %13 = arith.truncf %8 : vector<256x128xf32> to vector<256x128xbf16>
    %c32 = arith.constant 32 : index
    %c0_12 = arith.constant 0 : index
    %14 = vector.load %arg10[%c32, %c0_12] : memref<320x128xbf16, #tpu.memory_space<vmem>>, vector<256x128xbf16>
    tpu.vector_store %arg10[%c32, %c0_12], %13 {strides = array<i32>} : memref<320x128xbf16, #tpu.memory_space<vmem>>, vector<256x128xbf16>,
    %c0_13 = arith.constant 0 : index
    %c0_14 = arith.constant 0 : index
    %15 = vector.load %arg8[%c0_13, %c0_14] : memref<256x2xf32, #tpu.memory_space<vmem>>, vector<256x2xf32>
    %16 = vector.extract_strided_slice %15 {offsets = [0, 0], sizes = [256, 1], strides = [1, 1]} : vector<256x2xf32> to vector<256x1xf32>
    %cst_15 = arith.constant 5.000000e-01 : f32
    %17 = vector.broadcast %cst_15 : f32 to vector<256x1xf32>
    %18 = arith.cmpf ogt, %16, %17 : vector<256x1xf32>
    %19 = vector.extract_strided_slice %15 {offsets = [0, 1], sizes = [256, 1], strides = [1, 1]} : vector<256x2xf32> to vector<256x1xf32>
    %cst_16 = arith.constant 5.000000e-01 : f32
    %20 = vector.broadcast %cst_16 : f32 to vector<256x1xf32>
    %21 = arith.cmpf ogt, %19, %20 : vector<256x1xf32>
    %c15 = arith.constant 15 : index
    %c0_17 = arith.constant 0 : index
    %22 = vector.load %arg10[%c15, %c0_17] : memref<320x128xbf16, #tpu.memory_space<vmem>>, vector<256x128xbf16>
    %cst_18 = arith.constant 0.000000e+00 : bf16
    %23 = vector.broadcast %cst_18 : bf16 to vector<256x128xbf16>
    %24 = vector.shape_cast %18 : vector<256x1xi1> to vector<256x1xi1>
    %25 = vector.broadcast %24 : vector<256x1xi1> to vector<256x128xi1>
    %26 = arith.select %25, %22, %23 : vector<256x128xi1>, vector<256x128xbf16>
    %c16 = arith.constant 16 : index
    %c0_19 = arith.constant 0 : index
    %27 = vector.load %arg10[%c16, %c0_19] : memref<320x128xbf16, #tpu.memory_space<vmem>>, vector<256x128xbf16>
    %c17 = arith.constant 17 : index
    %c0_20 = arith.constant 0 : index
    %28 = vector.load %arg10[%c17, %c0_20] : memref<320x128xbf16, #tpu.memory_space<vmem>>, vector<256x128xbf16>
    %cst_21 = arith.constant 0.000000e+00 : bf16
    %29 = vector.broadcast %cst_21 : bf16 to vector<256x128xbf16>
    %30 = vector.shape_cast %21 : vector<256x1xi1> to vector<256x1xi1>
    %31 = vector.broadcast %30 : vector<256x1xi1> to vector<256x128xi1>
    %32 = arith.select %31, %28, %29 : vector<256x128xi1>, vector<256x128xbf16>
    %c31 = arith.constant 31 : index
    %c0_22 = arith.constant 0 : index
    %33 = vector.load %arg10[%c31, %c0_22] : memref<320x128xbf16, #tpu.memory_space<vmem>>, vector<256x128xbf16>
    %cst_23 = arith.constant 0.000000e+00 : bf16
    %34 = vector.broadcast %cst_23 : bf16 to vector<256x128xbf16>
    %35 = vector.shape_cast %18 : vector<256x1xi1> to vector<256x1xi1>
    %36 = vector.broadcast %35 : vector<256x1xi1> to vector<256x128xi1>
    %37 = arith.select %36, %33, %34 : vector<256x128xi1>, vector<256x128xbf16>
    %c32_24 = arith.constant 32 : index
    %c0_25 = arith.constant 0 : index
    %38 = vector.load %arg10[%c32_24, %c0_25] : memref<320x128xbf16, #tpu.memory_space<vmem>>, vector<256x128xbf16>
    %c33 = arith.constant 33 : index
    %c0_26 = arith.constant 0 : index
    %39 = vector.load %arg10[%c33, %c0_26] : memref<320x128xbf16, #tpu.memory_space<vmem>>, vector<256x128xbf16>
    %cst_27 = arith.constant 0.000000e+00 : bf16
    %40 = vector.broadcast %cst_27 : bf16 to vector<256x128xbf16>
    %41 = vector.shape_cast %21 : vector<256x1xi1> to vector<256x1xi1>
    %42 = vector.broadcast %41 : vector<256x1xi1> to vector<256x128xi1>
    %43 = arith.select %42, %39, %40 : vector<256x128xi1>, vector<256x128xbf16>
    %c47 = arith.constant 47 : index
    %c0_28 = arith.constant 0 : index
    %44 = vector.load %arg10[%c47, %c0_28] : memref<320x128xbf16, #tpu.memory_space<vmem>>, vector<256x128xbf16>
    %cst_29 = arith.constant 0.000000e+00 : bf16
    %45 = vector.broadcast %cst_29 : bf16 to vector<256x128xbf16>
    %46 = vector.shape_cast %18 : vector<256x1xi1> to vector<256x1xi1>
    %47 = vector.broadcast %46 : vector<256x1xi1> to vector<256x128xi1>
    %48 = arith.select %47, %44, %45 : vector<256x128xi1>, vector<256x128xbf16>
    %c48 = arith.constant 48 : index
    %c0_30 = arith.constant 0 : index
    %49 = vector.load %arg10[%c48, %c0_30] : memref<320x128xbf16, #tpu.memory_space<vmem>>, vector<256x128xbf16>
    %c49 = arith.constant 49 : index
    %c0_31 = arith.constant 0 : index
    %50 = vector.load %arg10[%c49, %c0_31] : memref<320x128xbf16, #tpu.memory_space<vmem>>, vector<256x128xbf16>
    %cst_32 = arith.constant 0.000000e+00 : bf16
    %51 = vector.broadcast %cst_32 : bf16 to vector<256x128xbf16>
    %52 = vector.shape_cast %21 : vector<256x1xi1> to vector<256x1xi1>
    %53 = vector.broadcast %52 : vector<256x1xi1> to vector<256x128xi1>
    %54 = arith.select %53, %50, %51 : vector<256x128xi1>, vector<256x128xbf16>
    %55 = tpu.concatenate %26, %27, %32, %37, %38, %43, %48, %49, %54 in 1 : vector<256x128xbf16>, vector<256x128xbf16>, vector<256x128xbf16>, vector<256x128xbf16>, vector<256x128xbf16>, vector<256x128xbf16>, vector<256x128xbf16>, vector<256x128xbf16>, vector<256x128xbf16> -> vector<256x1152xbf16>
    %c0_33 = arith.constant 0 : index
    %c0_34 = arith.constant 0 : index
    %56 = vector.load %arg4[%c0_33, %c0_34] : memref<1152x128xbf16, #tpu.memory_space<vmem>>, vector<1152x128xbf16>
    %cst_35 = arith.constant dense<0.000000e+00> : vector<256x128xf32>
    %57 = tpu.matmul %55, %56, %cst_35 {dimension_numbers = #tpu.dot_dimension_numbers<[1], [0], [0], [1], [0, 0, 1, 1], [], []>} : vector<256x1152xbf16>, vector<1152x128xbf16>, vector<256x128xf32> -> vector<256x128xf32>
    %c0_36 = arith.constant 0 : index
    %c0_37 = arith.constant 0 : index
    %58 = vector.load %arg5[%c0_36, %c0_37] : memref<1x128xf32, #tpu.memory_space<vmem>>, vector<1x128xf32>
    %59 = vector.broadcast %58 : vector<1x128xf32> to vector<256x128xf32>
    %60 = arith.addf %57, %59 : vector<256x128xf32>
    %cst_38 = arith.constant 0.000000e+00 : f32
    %61 = vector.broadcast %cst_38 : f32 to vector<256x128xf32>
    %62 = arith.maximumf %60, %61 : vector<256x128xf32>
    %63 = arith.truncf %62 : vector<256x128xf32> to vector<256x128xbf16>
    %c0_39 = arith.constant 0 : index
    %c0_40 = arith.constant 0 : index
    %64 = vector.load %arg6[%c0_39, %c0_40] : memref<128x128xbf16, #tpu.memory_space<vmem>>, vector<128x128xbf16>
    %cst_41 = arith.constant dense<0.000000e+00> : vector<256x128xf32>
    %65 = tpu.matmul %63, %64, %cst_41 {dimension_numbers = #tpu.dot_dimension_numbers<[1], [0], [0], [1], [0, 0, 1, 1], [], []>} : vector<256x128xbf16>, vector<128x128xbf16>, vector<256x128xf32> -> vector<256x128xf32>
    %c0_42 = arith.constant 0 : index
    %c0_43 = arith.constant 0 : index
    %66 = vector.load %arg7[%c0_42, %c0_43] : memref<1x128xf32, #tpu.memory_space<vmem>>, vector<1x128xf32>
    %67 = vector.broadcast %66 : vector<1x128xf32> to vector<256x128xf32>
    %68 = arith.addf %65, %67 : vector<256x128xf32>
    %69 = arith.extf %1 : vector<256x128xbf16> to vector<256x128xf32>
    %70 = arith.addf %68, %69 : vector<256x128xf32>
    %cst_44 = arith.constant 0.000000e+00 : f32
    %71 = vector.broadcast %cst_44 : f32 to vector<256x128xf32>
    %72 = arith.maximumf %70, %71 : vector<256x128xf32>
    %c0_45 = arith.constant 0 : index
    %c0_46 = arith.constant 0 : index
    %c0_47 = arith.constant 0 : index
    %73 = vector.load %arg9[%c0_45, %c0_46, %c0_47] : memref<1x256x128xf32, #tpu.memory_space<vmem>>, vector<1x256x128xf32>
    %74 = vector.shape_cast %73 : vector<1x256x128xf32> to vector<256x128xf32>
    %75 = vector.shape_cast %72 : vector<256x128xf32> to vector<1x256x128xf32>
    tpu.vector_store %arg9[%c0_45, %c0_46, %c0_47], %75 {strides = array<i32>} : memref<1x256x128xf32, #tpu.memory_space<vmem>>, vector<1x256x128xf32>,
    return
  }
  func.func @transform_0(%arg0: i32) -> (i32, i32, i32) {
    %c0_i32 = arith.constant 0 : i32
    %c0_i32_0 = arith.constant 0 : i32
    %c0_i32_1 = arith.constant 0 : i32
    return %arg0, %c0_i32, %c0_i32_0 : i32, i32, i32
  }
  func.func @transform_1(%arg0: i32) -> (i32, i32) {
    %c0_i32 = arith.constant 0 : i32
    %c0_i32_0 = arith.constant 0 : i32
    %c0_i32_1 = arith.constant 0 : i32
    return %c0_i32, %c0_i32_0 : i32, i32
  }
  func.func @transform_2(%arg0: i32) -> (i32, i32) {
    %c0_i32 = arith.constant 0 : i32
    %c0_i32_0 = arith.constant 0 : i32
    %c0_i32_1 = arith.constant 0 : i32
    return %c0_i32, %c0_i32_0 : i32, i32
  }
  func.func @transform_3(%arg0: i32) -> (i32, i32) {
    %c0_i32 = arith.constant 0 : i32
    %c0_i32_0 = arith.constant 0 : i32
    %c0_i32_1 = arith.constant 0 : i32
    return %c0_i32, %c0_i32_0 : i32, i32
  }
  func.func @transform_4(%arg0: i32) -> (i32, i32) {
    %c0_i32 = arith.constant 0 : i32
    %c0_i32_0 = arith.constant 0 : i32
    %c0_i32_1 = arith.constant 0 : i32
    return %c0_i32, %c0_i32_0 : i32, i32
  }
  func.func @transform_5(%arg0: i32) -> (i32, i32) {
    %c0_i32 = arith.constant 0 : i32
    %c0_i32_0 = arith.constant 0 : i32
    %c0_i32_1 = arith.constant 0 : i32
    return %c0_i32, %c0_i32_0 : i32, i32
  }
  func.func @transform_6(%arg0: i32) -> (i32, i32) {
    %c0_i32 = arith.constant 0 : i32
    %c0_i32_0 = arith.constant 0 : i32
    %c0_i32_1 = arith.constant 0 : i32
    return %c0_i32, %c0_i32_0 : i32, i32
  }
  func.func @transform_7(%arg0: i32) -> (i32, i32) {
    %c0_i32 = arith.constant 0 : i32
    %c0_i32_0 = arith.constant 0 : i32
    %c0_i32_1 = arith.constant 0 : i32
    return %c0_i32, %c0_i32_0 : i32, i32
  }
  func.func @transform_8(%arg0: i32) -> (i32, i32, i32) {
    %c0_i32 = arith.constant 0 : i32
    %c0_i32_0 = arith.constant 0 : i32
    %c0_i32_1 = arith.constant 0 : i32
    return %arg0, %c0_i32, %c0_i32_0 : i32, i32, i32
  }
}

</mosaic_0001>

<bundles_post_ra>
// kernel: bottleneck_forward.1
= control target key start
LH: loop header
LB: loop body
LE: loop exit
PB: predicated region body
PF: predicated region fallthrough
CT: control target
= control target key end

     0   :  { %s6569_s27 = smov 0   ;;  %s9678_s0 = inlined_call_operand.vmem [shape: bf16[2,256,128], index: 0, kind: input, shape index: {}]   ;;  %s9679_s1 = inlined_call_operand.vmem [shape: bf16[128,128], index: 1, kind: input, shape index: {}]   ;;  %s9680_s2 = inlined_call_operand.vmem [shape: f32[1,128], index: 2, kind: input, shape index: {}]   ;;  %s9681_s3 = inlined_call_operand.vmem [shape: bf16[1152,128], index: 3, kind: input, shape index: {}]   ;;  %s9682_s4 = inlined_call_operand.vmem [shape: f32[1,128], index: 4, kind: input, shape index: {}]   ;;  %s9683_s5 = inlined_call_operand.vmem [shape: bf16[128,128], index: 5, kind: input, shape index: {}]   ;;  %s9684_s6 = inlined_call_operand.vmem [shape: f32[1,128], index: 6, kind: input, shape index: {}]   ;;  %s9685_s7 = inlined_call_operand.vmem [shape: f32[256,2], index: 7, kind: input, shape index: {}]   ;;  %s9686_s8 = inlined_call_operand.vmem [shape: f32[2,256,128], index: 8, kind: output, shape index: {}]  }
   0x1 LB: > { %s5484_s28 = sadd.s32 4294967295, %s6520_s27   ;;  %p5488_p0 = scmp.ge.s32.totalorder %s6520_s27, 1  ;;  %s6520_s27 = sphi %s6569_s27, %s18_s27  }
   0x2   : > { %p262_p1 = scmp.lt.s32.totalorder %s6520_s27, 3 }
   0x4   : > { %p263_p2 = pnand %p5488_p0, %p262_p1 }
   0x6   : > { %266 = sbr.rel (%p263_p2) target bundleno = 1097 (0x449), region = 52 }
   0xd   : > { %v6350_v0 = vld [vmem:[%s9679_s1] sm:$0xff]   ;;  %v6351_v1 = vld [vmem:[%s9679_s1 + $0x8] sm:$0xff]   ;;  %v6522_v2 = vmov 0   ;;  %p296_p3 = scmp.lt.s32.totalorder %s5484_s28, 1  ;;  %v6352_v3 = vld [vmem:[%s9679_s1 + $0x10] sm:$0xff]  }
   0xe   : > { %6327 = vset.pattern.permute.xlu1 %v6522_v2  ;;  %701 = vst [vmem:[#allocation2] sm:$0xff] %v6522_v2  ;;  %702 = vst [vmem:[#allocation2 + $0x8] sm:$0xff] %v6522_v2  ;;  %6326 = vset.pattern.permute.xlu0 %v6522_v2  ;;  %v739_v4 = vld [vmem:[%s9685_s7 + $0x10] sm:$0xff]  ;;  %v740_v5 = vld [vmem:[%s9685_s7 + $0x18] sm:$0xff] }
   0xf   : > { %703 = vst [vmem:[#allocation2 + $0x90] sm:$0xff] %v6522_v2  ;;  %704 = vst [vmem:[#allocation2 + $0x98] sm:$0xff] %v6522_v2  ;;  %6156 = vmatprep.subr.bf16.mxu0 %v6350_v0  ;;  %6300 = vmatprep.subr.bf16.mxu1 %v6350_v0  ;;  %s9937_s28 = smov (!%p296_p3, %s5484_s28), 1  ;;  %vm771_vm0 = vcmp.gt.f32.partialorder %v739_v4, 0.5  ;;  %v6353_v6 = vld [vmem:[%s9679_s1 + $0x18] sm:$0xff]   ;;  %vm772_vm1 = vcmp.gt.f32.partialorder %v740_v5, 0.5 }
  0x10   : > { %6157 = vmatpush3.bf16.msra.mxu0 %v6350_v0  ;;  %6308 = vmatpush3.bf16.msra.mxu1 %v6350_v0  ;;  %s5634_s15 = sshll.u32 %s9937_s28, 7  ;;  %v6610_v7 = vsel %vm771_vm0, 1, %v6522_v2  ;;  %v742_v8 = vld [vmem:[%s9685_s7 + $0x28] sm:$0xff]  ;;  %v6619_v11 = vsel %vm772_vm1, 1, %v6522_v2  ;;  %v6354_v12 = vld [vmem:[%s9679_s1 + $0x20] sm:$0xff]   ;;  %v744_v13 = vld [vmem:[%s9685_s7 + $0x38] sm:$0xff] }
  0x11   : > { %6158 = vmatprep.subr.bf16.mxu0 %v6351_v1  ;;  %6301 = vmatprep.subr.bf16.mxu1 %v6351_v1  ;;  %s6604_s20 = scalar_lea.vmem %s9678_s0, %s5634_s15  ;;  %vm774_vm2 = vcmp.gt.f32.partialorder %v742_v8, 0.5  ;;  %vm776_vm3 = vcmp.gt.f32.partialorder %v744_v13, 0.5  ;;  %v737_v15 = vld [vmem:[%s9685_s7] sm:$0xff]  ;;  %v6355_v16 = vld [vmem:[%s9679_s1 + $0x28] sm:$0xff]   ;;  %v748_v19 = vld [vmem:[%s9685_s7 + $0x58] sm:$0xff]  ;;  %s5635_s15 = sshll.u32 %s9937_s28, 8 }
  0x12   : > { %857 = vperm.xlu1 %6327, %v6610_v7   ;;  %v309_v9 = vld [vmem:[%s6604_s20] sm:$0xff]   ;;  %v6629_v14 = vsel %vm774_vm2, 1, %v6522_v2  ;;  %v746_v17 = vld [vmem:[%s9685_s7 + $0x48] sm:$0xff]  ;;  %vm769_vm4 = vcmp.gt.f32.partialorder %v737_v15, 0.5  ;;  %v6648_v20 = vsel %vm776_vm3, 1, %v6522_v2  ;;  %v6356_v23 = vld [vmem:[%s9679_s1 + $0x30] sm:$0xff]   ;;  %s9598_s18 = scalar_lea.vmem %s9686_s8, %s5635_s15 }
  0x13   : > { %v325_v10 = vld [vmem:[%s6604_s20 + $0x40] sm:$0xff]   ;;  %6172 = vmatprep.mubr.bf16.mxu0 %v309_v9  ;;  %v738_v18 = vld [vmem:[%s9685_s7 + $0x8] sm:$0xff]  ;;  %v6654_v22 = vsel %vm769_vm4, 1, %v6522_v2  ;;  %vm778_vm5 = vcmp.gt.f32.partialorder %v746_v17, 0.5  ;;  %v752_v24 = vld [vmem:[%s9685_s7 + $0x78] sm:$0xff]  ;;  %vm780_vm7 = vcmp.gt.f32.partialorder %v748_v19, 0.5 }
  0x14   : > { %6159 = vmatpush3.bf16.msra.mxu0 %v6351_v1  ;;  %6309 = vmatpush3.bf16.msra.mxu1 %v6351_v1  ;;  %v750_v21 = vld [vmem:[%s9685_s7 + $0x68] sm:$0xff]  ;;  %vm770_vm6 = vcmp.gt.f32.partialorder %v738_v18, 0.5  ;;  %v755_v26 = vld [vmem:[%s9685_s7 + $0x90] sm:$0xff]  ;;  %v741_v27 = vld [vmem:[%s9685_s7 + $0x20] sm:$0xff]  ;;  %v6687_v32 = vsel %vm778_vm5, 1, %v6522_v2  ;;  %vm784_vm9 = vcmp.gt.f32.partialorder %v752_v24, 0.5 }
  0x15   : > { %6160 = vmatprep.subr.bf16.mxu0 %v6352_v3  ;;  %6302 = vmatprep.subr.bf16.mxu1 %v6352_v3  ;;  %v754_v25 = vld [vmem:[%s9685_s7 + $0x88] sm:$0xff]  ;;  %v743_v28 = vld [vmem:[%s9685_s7 + $0x30] sm:$0xff]  ;;  %vm782_vm8 = vcmp.gt.f32.partialorder %v750_v21, 0.5  ;;  %v745_v29 = vld [vmem:[%s9685_s7 + $0x40] sm:$0xff]  ;;  %v6691_v33 = vsel %vm770_vm6, 1, %v6522_v2  ;;  %v6701_v36 = vsel %vm780_vm7, 1, %v6522_v2 }
  0x16   : > { %860 = vperm.xlu1 %6327, %v6619_v11   ;;  %6188 = vmatprep.mubr.bf16.mxu1 %v325_v10  ;;  %v758_v30 = vld [vmem:[%s9685_s7 + $0xa8] sm:$0xff]  ;;  %v747_v31 = vld [vmem:[%s9685_s7 + $0x50] sm:$0xff]  ;;  %vm786_vm10 = vcmp.gt.f32.partialorder %v754_v25, 0.5  ;;  %v749_v34 = vld [vmem:[%s9685_s7 + $0x60] sm:$0xff]  ;;  %vm787_vm11 = vcmp.gt.f32.partialorder %v755_v26, 0.5  ;;  %vm773_vm12 = vcmp.gt.f32.partialorder %v741_v27, 0.5 }
  0x17   : > { %851 = vperm.xlu0 %6326, %v6654_v22   ;;  %v759_v35 = vld [vmem:[%s9685_s7 + $0xb0] sm:$0xff]  ;;  %vm775_vm13 = vcmp.gt.f32.partialorder %v743_v28, 0.5  ;;  %v6357_v38 = vld [vmem:[%s9679_s1 + $0x38] sm:$0xff]   ;;  %v6711_v39 = vsel %vm782_vm8, 1, %v6522_v2  ;;  %vm777_vm14 = vcmp.gt.f32.partialorder %v745_v29, 0.5  ;;  %vm790_vm15 = vcmp.gt.f32.partialorder %v758_v30, 0.5 }
  0x18   : > { %6161 = vmatpush3.bf16.msra.mxu0 %v6352_v3  ;;  %6310 = vmatpush3.bf16.msra.mxu1 %v6352_v3  ;;  %v751_v37 = vld [vmem:[%s9685_s7 + $0x70] sm:$0xff]  ;;  %vm779_vm0 = vcmp.gt.f32.partialorder %v747_v31, 0.5  ;;  %v311_v40 = vld [vmem:[%s6604_s20 + $0x8] sm:$0xff]   ;;  %v6718_v42 = vsel %vm784_vm9, 1, %v6522_v2  ;;  %v6722_v43 = vsel %vm786_vm10, 1, %v6522_v2  ;;  %vm781_vm1 = vcmp.gt.f32.partialorder %v749_v34, 0.5 }
  0x19   : > { %6162 = vmatprep.subr.bf16.mxu0 %v6353_v6  ;;  %6303 = vmatprep.subr.bf16.mxu1 %v6353_v6  ;;  %v327_v41 = vld [vmem:[%s6604_s20 + $0x48] sm:$0xff]   ;;  %vm791_vm2 = vcmp.gt.f32.partialorder %v759_v35, 0.5  ;;  %v313_v44 = vld [vmem:[%s6604_s20 + $0x10] sm:$0xff]   ;;  %v6729_v46 = vsel %vm787_vm11, 1, %v6522_v2  ;;  %v6733_v47 = vsel %vm773_vm12, 1, %v6522_v2  ;;  %v6737_v48 = vsel %vm775_vm13, 1, %v6522_v2 }
  0x1a   : > { %866 = vperm.xlu1 %6327, %v6629_v14   ;;  %v329_v45 = vld [vmem:[%s6604_s20 + $0x50] sm:$0xff]   ;;  %vm783_vm3 = vcmp.gt.f32.partialorder %v751_v37, 0.5  ;;  %v6741_v49 = vsel %vm777_vm14, 1, %v6522_v2  ;;  %v6745_v50 = vsel %vm790_vm15, 1, %v6522_v2  ;;  %v6749_v51 = vsel %vm779_vm0, 1, %v6522_v2  ;;  %v753_v52 = vld [vmem:[%s9685_s7 + $0x80] sm:$0xff] }
  0x1b   : > { %854 = vperm.xlu0 %6326, %v6691_v33   ;;  %v6756_v53 = vsel %vm781_vm1, 1, %v6522_v2  ;;  %v6760_v54 = vsel %vm791_vm2, 1, %v6522_v2  ;;  %v756_v55 = vld [vmem:[%s9685_s7 + $0x98] sm:$0xff]  ;;  %v757_v56 = vld [vmem:[%s9685_s7 + $0xa0] sm:$0xff]  ;;  %v6771_v57 = vsel %vm783_vm3, 1, %v6522_v2  ;;  %vm785_vm4 = vcmp.gt.f32.partialorder %v753_v52, 0.5 }
  0x1c   : > { %6163 = vmatpush3.bf16.msra.mxu0 %v6353_v6  ;;  %6311 = vmatpush3.bf16.msra.mxu1 %v6353_v6  ;;  %v760_v58 = vld [vmem:[%s9685_s7 + $0xb8] sm:$0xff]  ;;  %vm788_vm5 = vcmp.gt.f32.partialorder %v756_v55, 0.5  ;;  %vm789_vm6 = vcmp.gt.f32.partialorder %v757_v56, 0.5  ;;  %v317_v61 = vld [vmem:[%s6604_s20 + $0x20] sm:$0xff]   ;;  %v319_v63 = vld [vmem:[%s6604_s20 + $0x28] sm:$0xff]   ;;  %v6791_v3 = vsel %vm785_vm4, 1, %v6522_v2 }
  0x1d   : > { %6164 = vmatprep.subr.bf16.mxu0 %v6354_v12  ;;  %6304 = vmatprep.subr.bf16.mxu1 %v6354_v12  ;;  %vm792_vm7 = vcmp.gt.f32.partialorder %v760_v58, 0.5  ;;  %v315_v59 = vld [vmem:[%s6604_s20 + $0x18] sm:$0xff]   ;;  %v333_v62 = vld [vmem:[%s6604_s20 + $0x60] sm:$0xff]   ;;  %v321_v0 = vld [vmem:[%s6604_s20 + $0x30] sm:$0xff]   ;;  %v6796_v5 = vsel %vm788_vm5, 1, %v6522_v2  ;;  %v6800_v6 = vsel %vm789_vm6, 1, %v6522_v2 }
  0x1e   : > { %872 = vperm.xlu1 %6327, %v6648_v20   ;;  %v331_v60 = vld [vmem:[%s6604_s20 + $0x58] sm:$0xff]   ;;  %v335_v1 = vld [vmem:[%s6604_s20 + $0x68] sm:$0xff]   ;;  %v337_v4 = vld [vmem:[%s6604_s20 + $0x70] sm:$0xff]   ;;  %v6804_v8 = vsel %vm792_vm7, 1, %v6522_v2  ;;  %v6523_v9 = vmov 1  }
  0x1f   : > { %863 = vperm.xlu0 %6326, %v6733_v47   ;;  %v323_v10 = vld [vmem:[%s6604_s20 + $0x38] sm:$0xff]   ;;  %v765_v15 = vld [vmem:[%s9685_s7 + $0xe0] sm:$0xff]  ;;  %v763_v18 = vld [vmem:[%s9685_s7 + $0xd0] sm:$0xff] }
  0x20   : > { %6165 = vmatpush3.bf16.msra.mxu0 %v6354_v12  ;;  %6312 = vmatpush3.bf16.msra.mxu1 %v6354_v12  ;;  %v339_v12 = vld [vmem:[%s6604_s20 + $0x78] sm:$0xff]   ;;  %vm797_vm11 = vcmp.gt.f32.partialorder %v765_v15, 0.5  ;;  %vm795_vm12 = vcmp.gt.f32.partialorder %v763_v18, 0.5  ;;  %v6376_v24 = vld [vmem:[%s9681_s3 + $0x80] sm:$0xff]   ;;  %v766_v27 = vld [vmem:[%s9685_s7 + $0xe8] sm:$0xff] }
  0x21   : > { %6166 = vmatprep.subr.bf16.mxu0 %v6355_v16  ;;  %6305 = vmatprep.subr.bf16.mxu1 %v6355_v16  ;;  %v764_v13 = vld [vmem:[%s9685_s7 + $0xd8] sm:$0xff]  ;;  %v6868_v19 = vsel %vm797_vm11, 1, %v6522_v2  ;;  %v6877_v21 = vsel %vm795_vm12, 1, %v6522_v2  ;;  %v6377_v25 = vld [vmem:[%s9681_s3] sm:$0xff]   ;;  %v6378_v28 = vld [vmem:[%s9681_s3 + $0xc8] sm:$0xff]   ;;  %vm798_vm14 = vcmp.gt.f32.partialorder %v766_v27, 0.5 }
  0x22   : > { %878 = vperm.xlu1 %6327, %v6687_v32   ;;  %vm796_vm10 = vcmp.gt.f32.partialorder %v764_v13, 0.5  ;;  %v6380_v29 = vld [vmem:[%s9681_s3 + $0x88] sm:$0xff]   ;;  %v847_v34 = vsel %vm798_vm14, 1, %v6522_v2  ;;  %v6383_v35 = vld [vmem:[%s9681_s3 + $0x50] sm:$0xff]   ;;  %v6386_v37 = vld [vmem:[%s9681_s3 + $0xd8] sm:$0xff]  }
  0x23   : > { %869 = vperm.xlu0 %6326, %v6737_v48   ;;  %v6859_v17 = vsel %vm796_vm10, 1, %v6522_v2  ;;  %v6379_v30 = vld [vmem:[%s9681_s3 + $0x48] sm:$0xff]   ;;  %v6398_v52 = vld [vmem:[%s9681_s3 + $0xf0] sm:$0xff]   ;;  %v6402_v56 = vld [vmem:[%s9681_s3 + $0xf8] sm:$0xff]  }
  0x24   : > { %6167 = vmatpush3.bf16.msra.mxu0 %v6355_v16  ;;  %6313 = vmatpush3.bf16.msra.mxu1 %v6355_v16  ;;  %v6381_v31 = vld [vmem:[%s9681_s3 + $0x8] sm:$0xff]   ;;  %v6401_v55 = vld [vmem:[%s9681_s3 + $0x30] sm:$0xff]   ;;  %v6403_v58 = vld [vmem:[%s9681_s3 + $0x78] sm:$0xff]  }
  0x25   : > { %6168 = vmatprep.subr.bf16.mxu0 %v6356_v23  ;;  %6306 = vmatprep.subr.bf16.mxu1 %v6356_v23 }
  0x26   : > { %884 = vperm.xlu1 %6327, %v6701_v36  }
  0x27   : > { %875 = vperm.xlu0 %6326, %v6741_v49  }
  0x28   : > { %6169 = vmatpush3.bf16.msra.mxu0 %v6356_v23  ;;  %6314 = vmatpush3.bf16.msra.mxu1 %v6356_v23  ;;  %v6375_v23 = vld [vmem:[%s9681_s3 + $0x40] sm:$0xff]  }
  0x29   : > { %6170 = vmatprep.subr.bf16.mxu0 %v6357_v38  ;;  %6307 = vmatprep.subr.bf16.mxu1 %v6357_v38 }
  0x2a   : > { %890 = vperm.xlu1 %6327, %v6711_v39  }
  0x2b   : > { %881 = vperm.xlu0 %6326, %v6749_v51  }
  0x2c   : > { %6171 = vmatpush3.bf16.msra.mxu0 %v6357_v38  ;;  %6315 = vmatpush3.bf16.msra.mxu1 %v6357_v38  ;;  %v6388_v38 = vld [vmem:[%s9681_s3 + $0x98] sm:$0xff]  }
  0x2d   : > { %5660 = vmatprep.subr.bf16.mxu1 %v6375_v23 }
  0x2e   : > { %896 = vperm.xlu1 %6327, %v6718_v42  }
  0x2f   : > { %6173 = vmatmul.mubr.bf16.vlgmr.msra.gmra.mrb[0].mxu0 %v311_v40  ;;  %6189 = vmatmul.mubr.bf16.vlgmr.msra.gmra.mrb[0].mxu1 %v327_v41  ;;  %v6387_v40 = vld [vmem:[%s9681_s3 + $0x58] sm:$0xff]  }
  0x30   : > { %6176 = vmatprep.mubr.bf16.mxu0 %v313_v44  ;;  %6192 = vmatprep.mubr.bf16.mxu1 %v329_v45  ;;  %v6389_v41 = vld [vmem:[%s9681_s3 + $0x18] sm:$0xff]   ;;  %v6390_v44 = vld [vmem:[%s9681_s3 + $0xe0] sm:$0xff]  }
  0x31   : > { %887 = vperm.xlu0 %6326, %v6756_v53   ;;  %5661 = vmatpush3.bf16.msra.mxu1 %v6377_v25  ;;  %v6392_v45 = vld [vmem:[%s9681_s3 + $0xa0] sm:$0xff]  }
  0x32   : > { %902 = vperm.xlu1 %6327, %v6722_v43   ;;  %5662 = vmatprep.subr.bf16.mxu1 %v6379_v30 }
  0x35   : > { %893 = vperm.xlu0 %6326, %v6771_v57   ;;  %5663 = vmatpush3.bf16.msra.mxu1 %v6381_v31 }
  0x36   : > { %6329 = vset.pattern.permute.xlu1 %v6523_v9  ;;  %5664 = vmatprep.subr.bf16.mxu1 %v6383_v35 }
  0x37   : > { %6177 = vmatmul.mubr.bf16.gmra.mrb[4].mxu0 %v315_v59  ;;  %6193 = vmatmul.mubr.bf16.gmra.mrb[4].mxu1 %v331_v60  ;;  %v6405_v60 = vld [vmem:[%s9681_s3 + $0x38] sm:$0xff]  }
  0x38   : > { %6180 = vmatprep.mubr.bf16.mxu0 %v317_v61  ;;  %6196 = vmatprep.mubr.bf16.mxu1 %v333_v62 }
  0x39   : > { %1279 = vperm.xlu1 %6329, %v6619_v11   ;;  %899 = vperm.xlu0 %6326, %v6791_v3   ;;  %v762_v11 = vld [vmem:[%s9685_s7 + $0xc8] sm:$0xff] }
  0x3a   : > { %vm794_vm9 = vcmp.gt.f32.partialorder %v762_v11, 0.5 }
  0x3b   : > { %v6856_v16 = vsel %vm794_vm9, 1, %v6522_v2 }
  0x3d   : > { %1270 = vperm.xlu1 %6329, %v6654_v22   ;;  %6328 = vset.pattern.permute.xlu0 %v6523_v9  ;;  %v6374_v22 = vld [vmem:[%s9681_s3 + $0xc0] sm:$0xff]  }
  0x3e   : > { %1276 = vperm.xlu0 %6328, %v6610_v7   ;;  %v761_v7 = vld [vmem:[%s9685_s7 + $0xc0] sm:$0xff]  ;;  %5772 = vmatprep.subr.bf16.mxu0 %v6374_v22 }
  0x3f   : > { %6181 = vmatmul.mubr.bf16.gmra.mrb[8].mxu0 %v319_v63  ;;  %6197 = vmatmul.mubr.bf16.gmra.mrb[8].mxu1 %v335_v1  ;;  %vm793_vm8 = vcmp.gt.f32.partialorder %v761_v7, 0.5  ;;  %v7038_v7 = vld [vmem:[#allocation2] sm:$0xff] }
  0x40   : > { %6184 = vmatprep.mubr.bf16.mxu0 %v321_v0  ;;  %6200 = vmatprep.mubr.bf16.mxu1 %v337_v4  ;;  %v6406_v0 = vld [vmem:[%s9681_s3 + $0x140] sm:$0xff]  }
  0x41   : > { %6330 = vset.pattern.permute.xlu1 %v6522_v2  ;;  %5773 = vmatpush3.bf16.msra.mxu0 %v6376_v24 }
  0x42   : > { %905 = vperm.xlu1 %6330, %v6729_v46   ;;  %1273 = vperm.xlu0 %6328, %v6691_v33   ;;  %v6384_v33 = vld [vmem:[%s9681_s3 + $0x90] sm:$0xff]  }
  0x43   : > { %5774 = vmatprep.subr.bf16.mxu0 %v6378_v28 }
  0x45   : > { %5775 = vmatpush3.bf16.msra.mxu0 %v6380_v29 }
  0x46   : > { %6331 = vset.pattern.permute.xlu1 %v6523_v9  ;;  %1288 = vperm.xlu0 %6328, %v6737_v48  }
  0x47   : > { %6185 = vmatmul.mubr.bf16.gmra.mrb[12].mxu0 %v323_v10  ;;  %6201 = vmatmul.mubr.bf16.gmra.mrb[12].mxu1 %v339_v12 }
  0x48   : > { %1282 = vperm.xlu1 %6331, %v6733_v47   ;;  %v6393_v47 = vld [vmem:[%s9681_s3 + $0x20] sm:$0xff]  }
  0x4a   : > { %6333 = vset.pattern.permute.xlu0 %v6522_v2 }
  0x4b   : > { %908 = vperm.xlu0 %6333, %v6796_v5  }
  0x4c   : > { %1285 = vperm.xlu1 %6331, %v6629_v14   ;;  %v6847_v14 = vsel %vm793_vm8, 1, %v6522_v2 }
  0x4f   : > { %911 = vperm.xlu0 %6333, %v6800_v6  }
  0x50   : > { %6332 = vset.pattern.permute.xlu1 %v6522_v2 }
  0x51   : > { %914 = vperm.xlu1 %6332, %v6745_v50  }
  0x53   : > { %920 = vperm.xlu0 %6333, %v6804_v8  }
  0x55   : > { %6334 = vset.pattern.permute.xlu1 %v6523_v9 }
  0x56   : > { %1291 = vperm.xlu1 %6334, %v6648_v20   ;;  %v768_v20 = vld [vmem:[%s9685_s7 + $0xf8] sm:$0xff] }
  0x57   : > { %6338 = vset.pattern.permute.xlu0 %v6523_v9  ;;  %vm800_vm13 = vcmp.gt.f32.partialorder %v768_v20, 0.5 }
  0x58   : > { %1300 = vperm.xlu0 %6338, %v6749_v51   ;;  %v6896_v26 = vsel %vm800_vm13, 1, %v6522_v2  ;;  %v6397_v51 = vld [vmem:[%s9681_s3 + $0x28] sm:$0xff]  }
  0x5a   : > { %6335 = vset.pattern.permute.xlu1 %v6522_v2 }
  0x5b   : > { %917 = vperm.xlu1 %6335, %v6760_v54  }
  0x5c   : > { %6339 = vset.pattern.permute.xlu0 %v6522_v2 }
  0x5d   : > { %923 = vperm.xlu0 %6339, %v6847_v14  }
  0x5f   : > { %6336 = vset.pattern.permute.xlu1 %v6523_v9 }
  0x60   : > { %1294 = vperm.xlu1 %6336, %v6741_v49   ;;  %v6394_v49 = vld [vmem:[%s9681_s3 + $0xe8] sm:$0xff]  }
  0x61   : > { %932 = vperm.xlu0 %6339, %v6859_v17  }
  0x64   : > { %1297 = vperm.xlu1 %6336, %v6687_v32   ;;  %v6382_v32 = vld [vmem:[%s9681_s3 + $0xd0] sm:$0xff]  }
  0x65   : > { %935 = vperm.xlu0 %6339, %v6868_v19   ;;  %5776 = vmatprep.subr.bf16.mxu0 %v6382_v32 }
  0x66   : > { %5777 = vmatpush3.bf16.msra.mxu0 %v6384_v33 }
  0x67   : > { %5778 = vmatprep.subr.bf16.mxu0 %v6386_v37 }
  0x68   : > { %6337 = vset.pattern.permute.xlu1 %v6522_v2 }
  0x69   : > { %926 = vperm.xlu1 %6337, %v6856_v16   ;;  %6344 = vset.pattern.permute.xlu0 %v6523_v9 }
  0x6a   : > { %1312 = vperm.xlu0 %6344, %v6771_v57   ;;  %5779 = vmatpush3.bf16.msra.mxu0 %v6388_v38  ;;  %v6404_v57 = vld [vmem:[%s9681_s3 + $0xb8] sm:$0xff]  }
  0x6b   : > { %5780 = vmatprep.subr.bf16.mxu0 %v6390_v44 }
  0x6d   : > { %6340 = vset.pattern.permute.xlu1 %v6523_v9 }
  0x6e   : > { %1303 = vperm.xlu1 %6340, %v6701_v36   ;;  %6347 = vset.pattern.permute.xlu0 %v6522_v2  ;;  %v6385_v36 = vld [vmem:[%s9681_s3 + $0x10] sm:$0xff]  }
  0x6f   : > { %944 = vperm.xlu0 %6347, %v6896_v26   ;;  %5665 = vmatpush3.bf16.msra.mxu1 %v6385_v36 }
  0x70   : > { %5666 = vmatprep.subr.bf16.mxu1 %v6387_v40  ;;  %5781 = vmatpush3.bf16.msra.mxu0 %v6392_v45 }
  0x71   : > { %5782 = vmatprep.subr.bf16.mxu0 %v6394_v49 }
  0x72   : > { %6341 = vset.pattern.permute.xlu1 %v6522_v2 }
  0x73   : > { %929 = vperm.xlu1 %6341, %v6877_v21   ;;  %6349 = vset.pattern.permute.xlu0 %v6523_v9 }
  0x74   : > { %1324 = vperm.xlu0 %6349, %v6729_v46   ;;  %5667 = vmatpush3.bf16.msra.mxu1 %v6389_v41  ;;  %v6391_v46 = vld [vmem:[%s9681_s3 + $0x60] sm:$0xff]  }
  0x75   : > { %5668 = vmatprep.subr.bf16.mxu1 %v6391_v46 }
  0x77   : > { %6342 = vset.pattern.permute.xlu1 %v6523_v9 }
  0x78   : > { %1306 = vperm.xlu1 %6342, %v6756_v53   ;;  %1333 = vperm.xlu0 %6349, %v6745_v50   ;;  %v6395_v50 = vld [vmem:[%s9681_s3 + $0x68] sm:$0xff]   ;;  %v6399_v53 = vld [vmem:[%s9681_s3 + $0x70] sm:$0xff]  }
  0x79   : > { %5669 = vmatpush3.bf16.msra.mxu1 %v6393_v47 }
  0x7a   : > { %5670 = vmatprep.subr.bf16.mxu1 %v6395_v50 }
  0x7c   : > { %1309 = vperm.xlu1 %6342, %v6711_v39   ;;  %v767_v39 = vld [vmem:[%s9685_s7 + $0xf0] sm:$0xff]  ;;  %1339 = vperm.xlu0 %6349, %v6804_v8  }
  0x7d   : > { %vm799_vm15 = vcmp.gt.f32.partialorder %v767_v39, 0.5  ;;  %5671 = vmatpush3.bf16.msra.mxu1 %v6397_v51 }
  0x7e   : > { %v848_v48 = vsel %vm799_vm15, 1, %v6522_v2  ;;  %5672 = vmatprep.subr.bf16.mxu1 %v6399_v53  ;;  %vm1090_vm15 = vsmask.f32 7424 }
  0x80   : > { %6343 = vset.pattern.permute.xlu1 %v6522_v2  ;;  %1345 = vperm.xlu0 %6349, %v6856_v16  }
  0x81   : > { %938 = vperm.xlu1 %6343, %v847_v34   ;;  %5673 = vmatpush3.bf16.msra.mxu1 %v6401_v55 }
  0x82   : > { %5674 = vmatprep.subr.bf16.mxu1 %v6403_v58  ;;  %v1777_v58 = vshll.u32 %v7038_v7, 16 }
  0x84   : > { %1351 = vperm.xlu0 %6349, %v6859_v17  }
  0x85   : > { %6345 = vset.pattern.permute.xlu1 %v6523_v9  ;;  %5675 = vmatpush3.bf16.msra.mxu1 %v6405_v60 }
  0x86   : > { %1315 = vperm.xlu1 %6345, %v6718_v42   ;;  %v6396_v42 = vld [vmem:[%s9681_s3 + $0xa8] sm:$0xff]   ;;  %5884 = vmatprep.subr.bf16.mxu1 %v6406_v0 }
  0x87   : > { %5783 = vmatpush3.bf16.msra.mxu0 %v6396_v42 }
  0x88   : > { %5784 = vmatprep.subr.bf16.mxu0 %v6398_v52  ;;  %1357 = vperm.xlu0 %6349, %v847_v34  }
  0x8a   : > { %6346 = vset.pattern.permute.xlu1 %v6522_v2  ;;  %v6400_v2 = vld [vmem:[%s9681_s3 + $0xb0] sm:$0xff]  }
  0x8b   : > { %941 = vperm.xlu1 %6346, %v848_v48   ;;  %5785 = vmatpush3.bf16.msra.mxu0 %v6400_v2 }
  0x8c   : > { %5786 = vmatprep.subr.bf16.mxu0 %v6402_v56  ;;  %1363 = vperm.xlu0 %6349, %v6896_v26  }
  0x8f   : > { %6348 = vset.pattern.permute.xlu1 %v6523_v9  ;;  %5787 = vmatpush3.bf16.msra.mxu0 %v6404_v57 }
  0x90   : > { %1318 = vperm.xlu1 %6348, %v6791_v3  }
  0x91   : > { %v7005_v59 = vpop.permute.xlu1 %857 }
  0x94   : > { %1321 = vperm.xlu1 %6348, %v6722_v43  }
  0x95   : > { %v7012_v61 = vpop.permute.xlu1 %860 }
  0x96   : > { %v7020_v63 = vpop.permute.xlu0 %851 }
  0x98   : > { %1327 = vperm.xlu1 %6348, %v6796_v5  }
  0x99   : > { %v7015_v62 = vpop.permute.xlu1 %866 }
  0x9a   : > { %v7028_v3 = vpop.permute.xlu0 %854 }
  0x9c   : > { %1330 = vperm.xlu1 %6348, %v6800_v6  }
  0x9d   : > { %v7017_v43 = vpop.permute.xlu1 %872 }
  0x9e   : > { %v7031_v5 = vpop.permute.xlu0 %863 }
  0xa0   : > { %1336 = vperm.xlu1 %6348, %v6760_v54  }
  0xa1   : > { %v7025_v1 = vpop.permute.xlu1 %878 }
  0xa2   : > { %v7034_v54 = vpop.permute.xlu0 %869 }
  0xa4   : > { %1342 = vperm.xlu1 %6348, %v6847_v14  }
  0xa5   : > { %v885_v4 = vpop.permute.xlu1 %884 }
  0xa6   : > { %vm957_vm0 = vcmp.eq.s32.totalorder %v885_v4, 1  ;;  %v7036_v9 = vpop.permute.xlu0 %875 }
  0xa7   : > { %vm989_vm1 = vmpackc.low %vm957_vm0, %vm957_vm0 }
  0xa8   : > { %1348 = vperm.xlu1 %6348, %v6877_v21   ;;  %v1021_v11 = vsel %vm989_vm1, 65537, %v7038_v7  ;;  %vm946_vm1 = vcmp.eq.s32.totalorder %v7020_v63, 1 }
  0xa9   : > { %v891_v6 = vpop.permute.xlu1 %890 }
  0xaa   : > { %vm959_vm2 = vcmp.eq.s32.totalorder %v891_v6, 1  ;;  %v882_v12 = vpop.permute.xlu0 %881 }
  0xab   : > { %vm956_vm3 = vcmp.eq.s32.totalorder %v882_v12, 1  ;;  %vm7041_vm4 = vmpackc.low %vm959_vm2, %vm959_vm2  ;;  %vm947_vm2 = vcmp.eq.s32.totalorder %v7028_v3, 1 }
  0xac   : > { %1354 = vperm.xlu1 %6348, %v6868_v19   ;;  %vm988_vm5 = vmpackc.low %vm956_vm3, %vm956_vm3  ;;  %v1023_v18 = vsel %vm7041_vm4, 65537, %v7038_v7  ;;  %vm948_vm3 = vcmp.eq.s32.totalorder %v7005_v59, 1  ;;  %vm949_vm4 = vcmp.eq.s32.totalorder %v7012_v61, 1 }
  0xad   : > { %v897_v8 = vpop.permute.xlu1 %896  ;;  %v1020_v14 = vsel %vm988_vm5, 65537, %v7038_v7  ;;  %vm7089_vm5 = vmpackc.low %vm946_vm1, %vm946_vm1 }
  0xae   : > { %vm961_vm6 = vcmp.eq.s32.totalorder %v897_v8, 1  ;;  %v5523_v17 = vcombine.low %v1020_v14, %v1021_v11  ;;  %v1010_v59 = vsel %vm7089_vm5, 65537, %v7038_v7  ;;  %v7117_v8 = vrot.slane %v1777_v58, 1 }
  0xaf   : > { %vm7051_vm9 = vmpackc.low %vm961_vm6, %vm961_vm6 }
  0xb0   : > { %1360 = vperm.xlu1 %6348, %v848_v48   ;;  %v888_v15 = vpop.permute.xlu0 %887  ;;  %v1131_v20 = vshll.u32 %v5523_v17, 16  ;;  %v1135_v21 = vshrl.u32 %v5523_v17, 16  ;;  %v1025_v27 = vsel %vm7051_vm9, 65537, %v7038_v7  ;;  %vm979_vm6 = vmpackc.low %vm947_vm2, %vm947_vm2 }
  0xb1   : > { %v903_v10 = vpop.permute.xlu1 %902  ;;  %vm958_vm7 = vcmp.eq.s32.totalorder %v888_v15, 1  ;;  %v1011_v60 = vsel %vm979_vm6, 65537, %v7038_v7 }
  0xb2   : > { %vm990_vm8 = vmpackc.low %vm958_vm7, %vm958_vm7  ;;  %vm963_vm10 = vcmp.eq.s32.totalorder %v903_v10, 1  ;;  %v7058_v25 = vrot.slane %v1131_v20, 1  ;;  %v5518_v4 = vcombine.low %v1010_v59, %v1011_v60  ;;  %v1780_v10 = vshrl.u32 %v7038_v7, 16 }
  0xb3   : > { %v1022_v22 = vsel %vm990_vm8, 65537, %v7038_v7  ;;  %vm7063_vm13 = vmpackc.low %vm963_vm10, %vm963_vm10 }
  0xb4   : > { %v894_v23 = vpop.permute.xlu0 %893  ;;  %v5524_v26 = vcombine.low %v1022_v22, %v1023_v18  ;;  %v1137_v29 = vor.u32 %v1135_v21, %v7058_v25  ;;  %v1027_v36 = vsel %vm7063_vm13, 65537, %v7038_v7  ;;  %vm7098_vm7 = vmpackc.low %vm948_vm3, %vm948_vm3  ;;  %vm950_vm13 = vcmp.eq.s32.totalorder %v7031_v5, 1 }
  0xb5   : > { %vm960_vm11 = vcmp.eq.s32.totalorder %v894_v23, 1  ;;  %vm981_vm8 = vmpackc.low %vm949_vm4, %vm949_vm4  ;;  %v1012_v63 = vsel %vm7098_vm7, 65537, %v7038_v7  ;;  %vm953_vm3 = vcmp.eq.s32.totalorder %v7017_v43, 1  ;;  %v7140_v19 = vor.u32 %v1780_v10, %v7117_v8 }
  0xb6   : > { %vm992_vm12 = vmpackc.low %vm960_vm11, %vm960_vm11  ;;  %v1139_v30 = vshll.u32 %v5524_v26, 16  ;;  %v1143_v31 = vshrl.u32 %v5524_v26, 16  ;;  %v1013_v0 = vsel %vm981_vm8, 65537, %v7038_v7  ;;  %v2465_v26 = vshrl.u32 %v7117_v8, 16  ;;  %v801_v8 = vld [vmem:[#allocation2] sm:$0x80] }
  0xb7   : > { %v1024_v32 = vsel %vm992_vm12, 65537, %v7038_v7  ;;  %vm951_vm12 = vcmp.eq.s32.totalorder %v7015_v62, 1  ;;  %v7121_v12 = vcombine.low %v1012_v63, %v1013_v0  ;;  %v1092_v62 = vshll.u32 %v5518_v4, 16  ;;  %vm7142_vm4 = vmpackc.low %vm950_vm13, %vm950_vm13 }
  0xb8   : > { %v7046_v16 = vpop.permute.xlu1 %1279  ;;  %v900_v33 = vpop.permute.xlu0 %899  ;;  %v1141_v34 = vrot.slane %v1139_v30, 1  ;;  %v5525_v35 = vcombine.low %v1024_v32, %v1025_v27  ;;  %vm7133_vm2 = vmpackc.low %vm951_vm12, %vm951_vm12 }
  0xb9   : > { %vm962_vm14 = vcmp.eq.s32.totalorder %v900_v33, 1  ;;  %v1099_v43 = vshll.u32 %v7121_v12, 16  ;;  %v1103_v23 = vshrl.u32 %v7121_v12, 16  ;;  %v1015_v32 = vsel %vm7133_vm2, 65537, %v7038_v7 }
  0xba   : > { %vm994_vm0 = vmpackc.low %vm962_vm14, %vm962_vm14  ;;  %v7073_v38 = vsel %vm1090_vm15, %v1137_v29, %v1141_v34  ;;  %v1145_v39 = vor.u32 %v1143_v31, %v1141_v34  ;;  %v1147_v40 = vshll.u32 %v5525_v35, 16  ;;  %v1151_v41 = vshrl.u32 %v5525_v35, 16 }
  0xbb   : > { %v1026_v44 = vsel %vm994_vm0, 65537, %v7038_v7  ;;  %v1095_v33 = vshrl.u32 %v5518_v4, 16 }
  0xbc   : > { %v7056_v24 = vpop.permute.xlu1 %1270  ;;  %v1149_v45 = vrot.slane %v1147_v40, 1  ;;  %v5526_v46 = vcombine.low %v1026_v44, %v1027_v36  ;;  %v1014_v40 = vsel %vm7142_vm4, 65537, %v7038_v7 }
  0xbd   : > { %v7076_v47 = vpop.permute.xlu0 %1276  ;;  %vm1365_vm5 = vcmp.eq.s32.totalorder %v7056_v24, 1  ;;  %v7204_v60 = vcombine.low %v1014_v40, %v1015_v32 }
  0xbe   : > { %v7081_v49 = vsel %vm1090_vm15, %v1145_v39, %v1149_v45  ;;  %v1153_v42 = vor.u32 %v1151_v41, %v1149_v45  ;;  %v1155_v50 = vshll.u32 %v5526_v46, 16  ;;  %v1159_v15 = vshrl.u32 %v5526_v46, 16 }
  0xbf   : > { %9738 = vst [vmem:[#allocation3_spill] sm:$0xff] %v7081_v49  ;;  %v7170_v39 = vrot.slane %v1092_v62, 1  ;;  %v1111_v32 = vshrl.u32 %v7204_v60, 16 }
  0xc0   : > { %v1157_v51 = vrot.slane %v1155_v50, 1 }
  0xc1   : > { %v906_v37 = vpop.permute.xlu1 %905  ;;  %v7085_v52 = vpop.permute.xlu0 %1273  ;;  %9756 = vst [vmem:[#allocation5_spill] sm:$0xff] %v7170_v39  ;;  %v1097_v59 = vor.u32 %v1095_v33, %v7170_v39 }
  0xc2   : > { %v7096_v55 = vsel %vm1090_vm15, %v1153_v42, %v1157_v51  ;;  %vm964_vm9 = vcmp.eq.s32.totalorder %v906_v37, 1  ;;  %vm1366_vm7 = vcmp.eq.s32.totalorder %v7085_v52, 1  ;;  %v1161_v28 = vor.u32 %v1159_v15, %v1157_v51 }
  0xc3   : > { %9741 = vst [vmem:[#allocation4_spill] sm:$0xff] %v7096_v55  ;;  %vm7113_vm10 = vmpackc.low %vm964_vm9, %vm964_vm9  ;;  %v1101_v52 = vrot.slane %v1099_v43, 1  ;;  %v7258_v15 = vrot.slane %v2465_v26, 7 }
  0xc4   : > { %v1028_v11 = vsel %vm7113_vm10, 65537, %v7038_v7  ;;  %vm7154_vm9 = vmpackc.low %vm953_vm3, %vm953_vm3  ;;  %vm955_vm10 = vcmp.eq.s32.totalorder %v7025_v1, 1 }
  0xc5   : > { %v7102_v57 = vpop.permute.xlu0 %1288  ;;  %vm7178_vm13 = vmpackc.low %vm1366_vm7, %vm1366_vm7  ;;  %vm1367_vm7 = vcmp.eq.s32.totalorder %v7076_v47, 1  ;;  %v1017_v13 = vsel %vm7154_vm9, 65537, %v7038_v7  ;;  %v7261_v17 = vsel %vm1090_vm15, %v1097_v59, %v1101_v52 }
  0xc6   : > { %vm7197_vm4 = vmpackc.low %vm955_vm10, %vm955_vm10  ;;  %v1430_v4 = vsel %vm7178_vm13, 65537, %v7038_v7  ;;  %9773 = vst [vmem:[#allocation8_spill] sm:$0xff] %v7261_v17 }
  0xc7   : > { %v7078_v48 = vpop.permute.xlu1 %1282  ;;  %vm7253_vm13 = vmpackc.low %vm1367_vm7, %vm1367_vm7 }
  0xc8   : > { %vm1369_vm10 = vcmp.eq.s32.totalorder %v7078_v48, 1  ;;  %v1107_v48 = vshll.u32 %v7204_v60, 16  ;;  %v1431_v27 = vsel %vm7253_vm13, 65537, %v7038_v7 }
  0xc9   : > { %vm7269_vm9 = vmpackc.low %vm1369_vm10, %vm1369_vm10 }
  0xca   : > { %v909_v6 = vpop.permute.xlu0 %908 }
  0xcb   : > { %v7093_v53 = vpop.permute.xlu1 %1285  ;;  %vm965_vm0 = vcmp.eq.s32.totalorder %v909_v6, 1 }
  0xcc   : > { %vm997_vm1 = vmpackc.low %vm965_vm0, %vm965_vm0  ;;  %vm954_vm0 = vcmp.eq.s32.totalorder %v7036_v9, 1 }
  0xcd   : > { %v1029_v5 = vsel %vm997_vm1, 65537, %v7038_v7 }
  0xce   : > { %v912_v18 = vpop.permute.xlu0 %911  ;;  %v5527_v22 = vcombine.low %v1028_v11, %v1029_v5  ;;  %v7245_v11 = vor.u32 %v1103_v23, %v1101_v52  ;;  %v1433_v52 = vsel %vm7269_vm9, 65537, %v7038_v7  ;;  %v6414_v23 = vld [vmem:[%s9681_s3 + $0x1c0] sm:$0xff]  }
  0xcf   : > { %vm966_vm6 = vcmp.eq.s32.totalorder %v912_v18, 1  ;;  %5996 = vmatprep.subr.bf16.mxu0 %v6414_v23 }
  0xd0   : > { %v915_v61 = vpop.permute.xlu1 %914  ;;  %vm998_vm8 = vmpackc.low %vm966_vm6, %vm966_vm6  ;;  %v1163_v29 = vshll.u32 %v5527_v22, 16  ;;  %v1167_v30 = vshrl.u32 %v5527_v22, 16 }
  0xd1   : > { %vm967_vm11 = vcmp.eq.s32.totalorder %v915_v61, 1  ;;  %v1030_v31 = vsel %vm998_vm8, 65537, %v7038_v7  ;;  %vm7224_vm8 = vmpackc.low %vm954_vm0, %vm954_vm0  ;;  %vm1371_vm0 = vcmp.eq.s32.totalorder %v7102_v57, 1 }
  0xd2   : > { %vm7127_vm14 = vmpackc.low %vm967_vm11, %vm967_vm11  ;;  %v921_v37 = vpop.permute.xlu0 %920  ;;  %v1165_v41 = vrot.slane %v1163_v29, 1 }
  0xd3   : > { %v1031_v21 = vsel %vm7127_vm14, 65537, %v7038_v7  ;;  %vm7166_vm11 = vmpackc.low %vm1365_vm5, %vm1365_vm5  ;;  %vm952_vm14 = vcmp.eq.s32.totalorder %v7034_v54, 1  ;;  %vm969_vm2 = vcmp.eq.s32.totalorder %v921_v37, 1  ;;  %vm1368_vm5 = vcmp.eq.s32.totalorder %v7046_v16, 1 }
  0xd4   : > { %v5528_v36 = vcombine.low %v1030_v31, %v1031_v21  ;;  %v7192_v42 = vsel %vm1090_vm15, %v1161_v28, %v1165_v41  ;;  %v1169_v50 = vor.u32 %v1167_v30, %v1165_v41  ;;  %vm1001_vm3 = vmpackc.low %vm969_vm2, %vm969_vm2  ;;  %v1429_v3 = vsel %vm7166_vm11, 65537, %v7038_v7  ;;  %v1671_v21 = vld [vmem:[#allocation2 + $0x8] sm:$0x80] }
  0xd5   : > { %v7131_v14 = vpop.permute.xlu1 %1291  ;;  %9761 = vst [vmem:[#allocation6_spill] sm:$0xff] %v7192_v42  ;;  %v1033_v58 = vsel %vm1001_vm3, 65537, %v7038_v7  ;;  %vm7209_vm6 = vmpackc.low %vm952_vm14, %vm952_vm14  ;;  %vm1370_vm14 = vcmp.eq.s32.totalorder %v7093_v53, 1  ;;  %v7273_v5 = vcombine.low %v1429_v3, %v1430_v4  ;;  %v1019_v30 = vsel %vm7197_vm4, 65537, %v7038_v7 }
  0xd6   : > { %v1171_v45 = vshll.u32 %v5528_v36, 16  ;;  %v1175_v51 = vshrl.u32 %v5528_v36, 16  ;;  %vm7239_vm11 = vmpackc.low %vm1368_vm5, %vm1368_vm5  ;;  %v1016_v62 = vsel %vm7209_vm6, 65537, %v7038_v7  ;;  %vm1372_vm2 = vcmp.eq.s32.totalorder %v7131_v14, 1 }
  0xd7   : > { %v7216_v0 = vpop.permute.xlu0 %1300  ;;  %v1432_v43 = vsel %vm7239_vm11, 65537, %v7038_v7  ;;  %vm7297_vm5 = vmpackc.low %vm1371_vm0, %vm1371_vm0  ;;  %v7304_v29 = vcombine.low %v1016_v62, %v1017_v13  ;;  %vm9718_vm11 = vcmp.ne.s16.totalorder %v7261_v17, 0  ;;  %v1511_v34 = vshrl.u32 %v7273_v5, 16 }
  0xd8   : > { %v1173_v56 = vrot.slane %v1171_v45, 1  ;;  %v1018_v36 = vsel %vm7224_vm8, 65537, %v7038_v7  ;;  %v7330_v37 = vcombine.low %v1431_v27, %v1432_v43  ;;  %vm1375_vm13 = vcmp.eq.s32.totalorder %v7216_v0, 1 }
  0xd9   : > { %v7364_v59 = vrot.slane %v1511_v34, 7  ;;  %v1514_v60 = vshll.u32 %v7273_v5, 16  ;;  %v1435_v54 = vsel %vm7297_vm5, 65537, %v7038_v7  ;;  %v1119_v5 = vshrl.u32 %v7304_v29, 16 }
  0xda   : > { %v918_v35 = vpop.permute.xlu1 %917  ;;  %v7233_v6 = vsel %vm1090_vm15, %v1169_v50, %v1173_v56  ;;  %v1177_v10 = vor.u32 %v1175_v51, %v1173_v56  ;;  %v7352_v50 = vsel %vm9718_vm11, %v7038_v7, 0  ;;  %v1115_v51 = vshll.u32 %v7304_v29, 16 }
  0xdb   : > { %vm968_vm12 = vcmp.eq.s32.totalorder %v918_v35, 1  ;;  %9768 = vst [vmem:[#allocation7_spill] sm:$0xff] %v7233_v6  ;;  %v7325_v35 = vrot.slane %v1107_v48, 1  ;;  %v2457_v29 = vshrl.u32 %v7352_v50, 16 }
  0xdc   : > { %vm7184_vm1 = vmpackc.low %vm968_vm12, %vm968_vm12  ;;  %vm9723_vm12 = vcmp.ne.s16.totalorder %v7170_v39, 0  ;;  %v924_v26 = vpop.permute.xlu0 %923 }
  0xdd   : > { %v1032_v46 = vsel %vm7184_vm1, 65537, %v7038_v7  ;;  %v7277_v22 = vsel %vm9723_vm12, %v801_v8, 0  ;;  %vm7286_vm1 = vmpackc.low %vm1370_vm14, %vm1370_vm14  ;;  %vm970_vm6 = vcmp.eq.s32.totalorder %v924_v26, 1  ;;  %v7313_v57 = vsel %vm9723_vm12, %v1671_v21, 0 }
  0xde   : > { %v7214_v63 = vcombine.low %v1032_v46, %v1033_v58  ;;  %vm7306_vm10 = vmpackc.low %vm970_vm6, %vm970_vm6  ;;  %v2453_v31 = vshrl.u32 %v7277_v22, 16  ;;  %v2489_v46 = vshrl.u32 %v7313_v57, 16  ;;  %v1434_v2 = vsel %vm7286_vm1, 65537, %v7038_v7  ;;  %v7516_v57 = vld [vmem:[%s9680_s2] ss:$0 sm:$0xff] }
  0xdf   : > { %v1295_v1 = vpop.permute.xlu1 %1294  ;;  %vm7320_vm14 = vmpackc.low %vm1372_vm2, %vm1372_vm2  ;;  %v1034_v45 = vsel %vm7306_vm10, 65537, %v7038_v7  ;;  %v7362_v58 = vcombine.low %v1018_v36, %v1019_v30  ;;  %v7384_v9 = vcombine.low %v1433_v52, %v1434_v2  ;;  %v7396_v47 = vor.u32 %v1111_v32, %v7325_v35 }
  0xe0   : > { %v1179_v12 = vshll.u32 %v7214_v63, 16  ;;  %vm1373_vm3 = vcmp.eq.s32.totalorder %v1295_v1, 1  ;;  %v933_v41 = vpop.permute.xlu0 %932  ;;  %v1183_v56 = vshrl.u32 %v7214_v63, 16  ;;  %v1436_v3 = vsel %vm7320_vm14, 65537, %v7038_v7 }
  0xe1   : > { %vm7334_vm4 = vmpackc.low %vm1373_vm3, %vm1373_vm3  ;;  %v1518_v63 = vshrl.u32 %v7330_v37, 16  ;;  %vm973_vm9 = vcmp.eq.s32.totalorder %v933_v41, 1  ;;  %v5537_v21 = vcombine.low %v1435_v54, %v1436_v3  ;;  %v7402_v22 = vrot.slane %v1115_v51, 1 }
  0xe2   : > { %v1181_v20 = vrot.slane %v1179_v12, 1  ;;  %vm7371_vm3 = vmpackc.low %vm1375_vm13, %vm1375_vm13  ;;  %v1437_v0 = vsel %vm7334_vm4, 65537, %v7038_v7  ;;  %v1123_v26 = vshll.u32 %v7362_v58, 16  ;;  %v7412_v28 = vrot.slane %v2453_v31, 7 }
  0xe3   : > { %v1298_v18 = vpop.permute.xlu1 %1297  ;;  %v1439_v16 = vsel %vm7371_vm3, 65537, %v7038_v7  ;;  %vm7405_vm6 = vmpackc.low %vm973_vm9, %vm973_vm9  ;;  %v1526_v14 = vshrl.u32 %v7384_v9, 16  ;;  %v7416_v30 = vrot.slane %v1518_v63, 7  ;;  %v1521_v32 = vshll.u32 %v7330_v37, 16 }
  0xe4   : > { %v7302_v53 = vsel %vm1090_vm15, %v1177_v10, %v1181_v20  ;;  %vm1374_vm7 = vcmp.eq.s32.totalorder %v1298_v18, 1  ;;  %v7382_v8 = vpop.permute.xlu0 %935  ;;  %v1185_v13 = vor.u32 %v1183_v56, %v1181_v20  ;;  %v7400_v18 = vor.u32 %v1514_v60, %v7364_v59 }
  0xe5   : > { %9780 = vst [vmem:[#allocation9_spill] sm:$0xff] %v7302_v53  ;;  %vm7341_vm0 = vmpackc.low %vm1374_vm7, %vm1374_vm7  ;;  %v1534_v40 = vshrl.u32 %v5537_v21, 16  ;;  %v1037_v31 = vsel %vm7405_vm6, 65537, %v7038_v7  ;;  %vm1509_vm14 = vsmask.f32 256  ;;  %v2460_v37 = vshll.u32 %v7352_v50, 16 }
  0xe6   : > { %v1438_v10 = vsel %vm7341_vm0, 65537, %v7038_v7  ;;  %9791 = vst [vmem:[#allocation10_spill] sm:$0xff] %v7400_v18  ;;  %vm1637_vm7 = vcmp.ne.s16.totalorder %v7400_v18, 0  ;;  %v7430_v2 = vrot.slane %v2457_v29, 7  ;;  %v1529_v56 = vshll.u32 %v7384_v9, 16 }
  0xe7   : > { %v5538_v43 = vcombine.low %v1437_v0, %v1438_v10  ;;  %v1523_v60 = vor.u32 %v1521_v32, %v7416_v30  ;;  %v1528_v50 = vrot.slane %v1526_v14, 7  ;;  %v1536_v63 = vrot.slane %v1534_v40, 7 }
  0xe8   : > { %v927_v24 = vpop.permute.xlu1 %926  ;;  %v1537_v54 = vshll.u32 %v5537_v21, 16  ;;  %v1121_v21 = vor.u32 %v1119_v5, %v7402_v22 }
  0xe9   : > { %vm971_vm2 = vcmp.eq.s32.totalorder %v927_v24, 1  ;;  %v1313_v36 = vpop.permute.xlu0 %1312  ;;  %v1127_v24 = vshrl.u32 %v7362_v58, 16  ;;  %v1542_v41 = vshrl.u32 %v5538_v43, 16  ;;  %v7437_v58 = vsel %vm1637_vm7, %v7038_v7, 0 }
  0xea   : > { %vm1003_vm8 = vmpackc.low %vm971_vm2, %vm971_vm2  ;;  %v1545_v3 = vshll.u32 %v5538_v43, 16  ;;  %vm974_vm2 = vcmp.eq.s32.totalorder %v7382_v8, 1  ;;  %v1539_v29 = vor.u32 %v1537_v54, %v1536_v63  ;;  %v7489_v8 = vsel %vm1090_vm15, %v7396_v47, %v7402_v22 }
  0xeb   : > { %v1035_v61 = vsel %vm1003_vm8, 65537, %v7038_v7  ;;  %v1544_v0 = vrot.slane %v1542_v41, 7  ;;  %vm1379_vm8 = vcmp.eq.s32.totalorder %v1313_v36, 1  ;;  %vm7472_vm9 = vmpackc.low %vm974_vm2, %vm974_vm2  ;;  %v7483_v41 = vsel %vm1509_vm14, %v7364_v59, %v1523_v60 }
  0xec   : > { %v5530_v4 = vcombine.low %v1034_v45, %v1035_v61  ;;  %v1125_v45 = vrot.slane %v1123_v26, 1  ;;  %v1531_v26 = vor.u32 %v1529_v56, %v1528_v50  ;;  %9800 = vst [vmem:[#allocation13_spill] sm:$0xff] %v7483_v41  ;;  %vm7501_vm6 = vmpackc.low %vm1379_vm8, %vm1379_vm8 }
  0xed   : > { %v1304_v12 = vpop.permute.xlu1 %1303 }
  0xee   : > { %vm1376_vm1 = vcmp.eq.s32.totalorder %v1304_v12, 1  ;;  %v1187_v62 = vshll.u32 %v5530_v4, 16  ;;  %v1191_v44 = vshrl.u32 %v5530_v4, 16  ;;  %v945_v1 = vpop.permute.xlu0 %944  ;;  %v9687_v12 = vrot.slane %v7437_v58, 1 }
  0xef   : > { %vm1408_vm5 = vmpackc.low %vm1376_vm1, %vm1376_vm1  ;;  %v1129_v43 = vor.u32 %v1127_v24, %v1125_v45  ;;  %v7479_v24 = vsel %vm1090_vm15, %v7245_v11, %v7325_v35  ;;  %v7497_v11 = vrot.slane %v2489_v46, 7  ;;  %v7511_v47 = vsel %vm1509_vm14, %v7416_v30, %v1531_v26 }
  0xf0   : > { %v1440_v20 = vsel %vm1408_vm5, 65537, %v7038_v7  ;;  %v1189_v48 = vrot.slane %v1187_v62, 1  ;;  %v7460_v32 = vshrl.u32 %v9687_v12, 16  ;;  %vm977_vm5 = vcmp.eq.s32.totalorder %v945_v1, 1 }
  0xf1   : > { %v7410_v27 = vcombine.low %v1439_v16, %v1440_v20  ;;  %v7507_v59 = vsel %vm1090_vm15, %v1129_v43, %v7058_v25  ;;  %v7526_v25 = vsel %vm1509_vm14, %v1528_v50, %v1539_v29 }
  0xf2   : > { %v930_v33 = vpop.permute.xlu1 %929  ;;  %v7420_v34 = vsel %vm1090_vm15, %v1185_v13, %v1189_v48  ;;  %v1193_v10 = vor.u32 %v1191_v44, %v1189_v48  ;;  %v2462_v48 = vor.u32 %v2460_v37, %v7430_v2  ;;  %v7492_v37 = vsel %vm1090_vm15, %v1121_v21, %v1125_v45 }
  0xf3   : > { %9794 = vst [vmem:[#allocation11_spill] sm:$0xff] %v7420_v34  ;;  %vm972_vm10 = vcmp.eq.s32.totalorder %v930_v33, 1  ;;  %v1550_v52 = vshrl.u32 %v7410_v27, 16  ;;  %v1553_v62 = vshll.u32 %v7410_v27, 16  ;;  %v1325_v27 = vpop.permute.xlu0 %1324  ;;  %v1547_v33 = vor.u32 %v1545_v3, %v1544_v0 }
  0xf4   : > { %vm1004_vm4 = vmpackc.low %vm972_vm10, %vm972_vm10  ;;  %v7522_v22 = vsel %vm1509_vm14, %v7412_v28, %v2462_v48  ;;  %vm1638_vm10 = vcmp.ne.s16.totalorder %v7483_v41, 0  ;;  %v1038_v45 = vsel %vm7472_vm9, 65537, %v7038_v7  ;;  %vm1383_vm2 = vcmp.eq.s32.totalorder %v1325_v27, 1  ;;  %v6411_v28 = vld [vmem:[%s9681_s3 + $0x110] sm:$0xff]  }
  0xf5   : > { %v1036_v51 = vsel %vm1004_vm4, 65537, %v7038_v7  ;;  %v7447_v16 = vrot.slane %v1550_v52, 7  ;;  %v7529_v36 = vsel %vm1509_vm14, %v1536_v63, %v1547_v33  ;;  %vm7537_vm4 = vmpackc.low %vm977_vm5, %vm977_vm5  ;;  %vm1920_vm9 = vcmask 1046528  }
  0xf6   : > { %v7439_v61 = vcombine.low %v1036_v51, %v1037_v31 }
  0xf7   : > { %v1307_v4 = vpop.permute.xlu1 %1306  ;;  %v1555_v44 = vor.u32 %v1553_v62, %v7447_v16  ;;  %v1334_v56 = vpop.permute.xlu0 %1333 }
  0xf8   : > { %vm1377_vm13 = vcmp.eq.s32.totalorder %v1307_v4, 1  ;;  %v1195_v9 = vshll.u32 %v7439_v61, 16  ;;  %v1199_v63 = vshrl.u32 %v7439_v61, 16  ;;  %vm1386_vm8 = vcmp.eq.s32.totalorder %v1334_v56, 1 }
  0xf9   : > { %vm7443_vm0 = vmpackc.low %vm1377_vm13, %vm1377_vm13  ;;  %v7542_v3 = vsel %vm1509_vm14, %v1544_v0, %v1555_v44 }
  0xfa   : > { %v7452_v20 = vrot.slane %v1195_v9, 1  ;;  %v1441_v5 = vsel %vm7443_vm0, 65537, %v7038_v7 }
  0xfb   : > { %v1310_v14 = vpop.permute.xlu1 %1309 }
  0xfc   : > { %vm1378_vm3 = vcmp.eq.s32.totalorder %v1310_v14, 1  ;;  %v7467_v40 = vsel %vm1090_vm15, %v1193_v10, %v7452_v20 }
  0xfd   : > { %9797 = vst [vmem:[#allocation12_spill] sm:$0xff] %v7467_v40  ;;  %vm1410_vm1 = vmpackc.low %vm1378_vm3, %vm1378_vm3 }
  0xfe   : > { %v1442_v51 = vsel %vm1410_vm1, 65537, %v7038_v7  ;;  %vm7570_vm3 = vmpackc.low %vm1383_vm2, %vm1383_vm2 }
  0xff   : > { %v7518_v46 = vcombine.low %v1441_v5, %v1442_v51  ;;  %vm7578_vm1 = vmpackc.low %vm1386_vm8, %vm1386_vm8 }
 0x100   : > { %v939_v30 = vpop.permute.xlu1 %938 }
 0x101   : > { %vm975_vm13 = vcmp.eq.s32.totalorder %v939_v30, 1  ;;  %v1558_v13 = vshrl.u32 %v7518_v46, 16  ;;  %v1561_v30 = vshll.u32 %v7518_v46, 16 }
 0x102   : > { %v6174_v60 = vpop.f32.mrb[0].mxu0  ;;  %v6190_v50 = vpop.f32.mrb[0].mxu1  ;;  %vm7551_vm0 = vmpackc.low %vm975_vm13, %vm975_vm13  ;;  %vm9708_vm13 = vcmp.ne.s16.totalorder %v7479_v24, 0 }
 0x103   : > { %v551_v1 = vadd.f32 %v6174_v60, %v7516_v57  ;;  %v615_v4 = vadd.f32 %v6190_v50, %v7516_v57  ;;  %v542_v10 = vpop.f32.mrb[1].mxu0  ;;  %v606_v9 = vpop.f32.mrb[1].mxu1  ;;  %v1039_v5 = vsel %vm7551_vm0, 65537, %v7038_v7  ;;  %v6428_v60 = vld [vmem:[%s9681_s3 + $0x1e0] sm:$0xff]  }
 0x104   : > { %v543_v0 = vadd.f32 %v7516_v57, %v542_v10  ;;  %v607_v61 = vadd.f32 %v7516_v57, %v606_v9  ;;  %v6175_v21 = vpop.f32.mrb[2].mxu0  ;;  %v6191_v43 = vpop.f32.mrb[2].mxu1  ;;  %v7574_v9 = vrot.slane %v1558_v13, 7  ;;  %v1201_v13 = vor.u32 %v1199_v63, %v7452_v20 }
 0x105   : > { %v687_v23 = vmax.f32 %v615_v4, 0.0  ;;  %v554_v26 = vadd.f32 %v6175_v21, %v7516_v57  ;;  %v618_v29 = vadd.f32 %v6191_v43, %v7516_v57  ;;  %v545_v14 = vpop.f32.mrb[3].mxu0  ;;  %v609_v33 = vpop.f32.mrb[3].mxu1  ;;  %v671_v50 = vmax.f32 %v551_v1, 0.0 }
 0x106   : > { %v685_v31 = vmax.f32 %v607_v61, 0.0  ;;  %v546_v44 = vadd.f32 %v7516_v57, %v545_v14  ;;  %v610_v51 = vadd.f32 %v7516_v57, %v609_v33  ;;  %v669_v61 = vmax.f32 %v543_v0, 0.0  ;;  %v1316_v21 = vpop.permute.xlu1 %1315 }
 0x107   : > { %v672_v4 = vmax.f32 %v554_v26, 0.0  ;;  %v688_v10 = vmax.f32 %v618_v29, 0.0  ;;  %v7582_v43 = vcombine.low %v1038_v45, %v1039_v5  ;;  %vm1380_vm5 = vcmp.eq.s32.totalorder %v1316_v21, 1 }
 0x108   : > { %v670_v46 = vmax.f32 %v546_v44, 0.0  ;;  %v686_v27 = vmax.f32 %v610_v51, 0.0  ;;  %vm7622_vm0 = vmpackc.low %vm1380_vm5, %vm1380_vm5 }
 0x109   : > { %v7584_v14 = vpack.c.bf16 %v672_v4, %v671_v50  ;;  %v7586_v1 = vpack.c.bf16 %v688_v10, %v687_v23  ;;  %v1203_v44 = vshll.u32 %v7582_v43, 16 }
 0x10a   : > { %v7592_v26 = vpack.c.bf16 %v670_v46, %v669_v61  ;;  %v7594_v29 = vpack.c.bf16 %v686_v27, %v685_v31  ;;  %v6178_v0 = vpop.f32.mrb[4].mxu0  ;;  %v6194_v33 = vpop.f32.mrb[4].mxu1  ;;  %v1563_v31 = vor.u32 %v1561_v30, %v7574_v9 }
 0x10b   : > { %722 = vst [vmem:[#allocation2 + $0x18] sm:$0xff] %v7584_v14  ;;  %730 = vst [vmem:[#allocation2 + $0x58] sm:$0xff] %v7586_v1  ;;  %v567_v20 = vadd.f32 %v6178_v0, %v7516_v57  ;;  %v631_v63 = vadd.f32 %v6194_v33, %v7516_v57  ;;  %v558_v23 = vpop.f32.mrb[5].mxu0  ;;  %v622_v5 = vpop.f32.mrb[5].mxu1 }
 0x10c   : > { %721 = vst [vmem:[#allocation2 + $0x10] sm:$0xff] %v7592_v26  ;;  %729 = vst [vmem:[#allocation2 + $0x50] sm:$0xff] %v7594_v29  ;;  %v559_v51 = vadd.f32 %v7516_v57, %v558_v23  ;;  %v623_v50 = vadd.f32 %v7516_v57, %v622_v5  ;;  %v6179_v4 = vpop.f32.mrb[6].mxu0  ;;  %v6195_v10 = vpop.f32.mrb[6].mxu1  ;;  %v7613_v61 = vsel %vm1638_vm10, %v7592_v26, 0  ;;  %v1674_v30 = vsel %vm9718_vm11, %v7592_v26, 0 }
 0x10d   : > { %v675_v46 = vmax.f32 %v567_v20, 0.0  ;;  %v691_v27 = vmax.f32 %v631_v63, 0.0  ;;  %v570_v0 = vadd.f32 %v6179_v4, %v7516_v57  ;;  %v634_v33 = vadd.f32 %v6195_v10, %v7516_v57  ;;  %v561_v23 = vpop.f32.mrb[7].mxu0  ;;  %v625_v45 = vpop.f32.mrb[7].mxu1 }
 0x10e   : > { %v673_v56 = vmax.f32 %v559_v51, 0.0  ;;  %v689_v48 = vmax.f32 %v623_v50, 0.0  ;;  %v562_v52 = vadd.f32 %v7516_v57, %v561_v23  ;;  %v626_v54 = vadd.f32 %v7516_v57, %v625_v45  ;;  %v7628_v20 = vpop.permute.xlu1 %941 }
 0x10f   : > { %v676_v63 = vmax.f32 %v570_v0, 0.0  ;;  %v692_v4 = vmax.f32 %v634_v33, 0.0  ;;  %v7632_v10 = vsel %vm1509_vm14, %v7447_v16, %v1563_v31  ;;  %v1444_v51 = vsel %vm7622_vm0, 65537, %v7038_v7 }
 0x110   : > { %9813 = vst [vmem:[#allocation14_spill] sm:$0xff] %v7632_v10  ;;  %v674_v12 = vmax.f32 %v562_v52, 0.0  ;;  %v690_v17 = vmax.f32 %v626_v54, 0.0  ;;  %v2493_v50 = vshrl.u32 %v1674_v30, 16  ;;  %v2496_v39 = vshll.u32 %v1674_v30, 16 }
 0x111   : > { %v7638_v23 = vpack.c.bf16 %v676_v63, %v675_v46  ;;  %v7640_v45 = vpack.c.bf16 %v692_v4, %v691_v27  ;;  %v7642_v0 = vrot.slane %v1203_v44, 1  ;;  %v9815_v54 = vrot.slane %v7613_v61, 1 }
 0x112   : > { %v7644_v33 = vpack.c.bf16 %v674_v12, %v673_v56  ;;  %v7646_v16 = vpack.c.bf16 %v690_v17, %v689_v48  ;;  %v6182_v31 = vpop.f32.mrb[8].mxu0  ;;  %v7648_v21 = vrot.slane %v2493_v50, 7  ;;  %v1319_v52 = vpop.permute.xlu1 %1318  ;;  %v9816_v5 = vrot.slane %v7437_v58, 1 }
 0x113   : > { %9814 = vst [vmem:[#allocation15_spill] sm:$0xff] %v7640_v45  ;;  %724 = vst [vmem:[#allocation2 + $0x28] sm:$0xff] %v7638_v23  ;;  %v583_v44 = vadd.f32 %v6182_v31, %v7516_v57  ;;  %v574_v12 = vpop.f32.mrb[9].mxu0  ;;  %vm1381_vm2 = vcmp.eq.s32.totalorder %v1319_v52, 1  ;;  %v7660_v17 = vsel %vm1090_vm15, %v1201_v13, %v7642_v0  ;;  %v7663_v56 = vpop.f32.mrb[8].mxu1  ;;  %v1675_v13 = vsel %vm9708_vm13, %v7584_v14, 0 }
 0x114   : > { %v1923_v46 = vsel %vm1920_vm9, %v9816_v5, %v9815_v54  ;;  %732 = vst [vmem:[#allocation2 + $0x68] sm:$0xff] %v7640_v45  ;;  %9817 = vst [vmem:[#allocation16_spill] sm:$0xff] %v7660_v17  ;;  %v575_v58 = vadd.f32 %v7516_v57, %v574_v12  ;;  %v6183_v30 = vpop.f32.mrb[10].mxu0  ;;  %v2498_v27 = vor.u32 %v2496_v39, %v7648_v21  ;;  %v7676_v50 = vpop.f32.mrb[9].mxu1  ;;  %vm976_vm5 = vcmp.eq.s32.totalorder %v7628_v20, 1 }
 0x115   : > { %723 = vst [vmem:[#allocation2 + $0x20] sm:$0xff] %v7644_v33  ;;  %731 = vst [vmem:[#allocation2 + $0x60] sm:$0xff] %v7646_v16  ;;  %v2481_v4 = vshrl.u32 %v1923_v46, 16  ;;  %v679_v31 = vmax.f32 %v583_v44, 0.0  ;;  %v586_v52 = vadd.f32 %v6183_v30, %v7516_v57  ;;  %v577_v54 = vpop.f32.mrb[11].mxu0  ;;  %v2484_v5 = vshll.u32 %v1923_v46, 16 }
 0x116   : > { %vm7669_vm8 = vmpackc.low %vm1381_vm2, %vm1381_vm2  ;;  %v7683_v12 = vpop.f32.mrb[10].mxu1  ;;  %vm9715_vm0 = vcmp.ne.s16.totalorder %v7511_v47, 0  ;;  %v677_v48 = vmax.f32 %v575_v58, 0.0  ;;  %v578_v41 = vadd.f32 %v7516_v57, %v577_v54  ;;  %v2499_v44 = vsel %vm1509_vm14, %v7497_v11, %v2498_v27  ;;  %v1322_v30 = vpop.permute.xlu1 %1321  ;;  %v6415_v11 = vld [vmem:[%s9681_s3 + $0x180] sm:$0xff]  }
 0x117   : > { %v1445_v39 = vsel %vm7669_vm8, 65537, %v7038_v7  ;;  %v7689_v18 = vrot.slane %v2481_v4, 7  ;;  %v7691_v17 = vpop.f32.mrb[11].mxu1  ;;  %v680_v40 = vmax.f32 %v586_v52, 0.0  ;;  %4409 = vmatprep.mubr.bf16.mxu0 %v2499_v44  ;;  %v1784_v63 = vshll.u32 %v7592_v26, 16 }
 0x118   : > { %v1962_v46 = vshll.u32 %v7584_v14, 16  ;;  %v2585_v34 = vshrl.u32 %v1675_v13, 16  ;;  %v678_v53 = vmax.f32 %v578_v41, 0.0  ;;  %v2588_v6 = vshll.u32 %v1675_v13, 16  ;;  %v6418_v41 = vld [vmem:[%s9681_s3 + $0x1c8] sm:$0xff]  }
 0x119   : > { %v2486_v58 = vor.u32 %v2484_v5, %v7689_v18  ;;  %vm1382_vm2 = vcmp.eq.s32.totalorder %v1322_v30, 1  ;;  %v7699_v27 = vpack.c.bf16 %v680_v40, %v679_v31  ;;  %v1786_v4 = vrot.slane %v1784_v63, 1 }
 0x11a   : > { %v7701_v54 = vrot.slane %v2585_v34, 7  ;;  %vm1414_vm8 = vmpackc.low %vm1382_vm2, %vm1382_vm2  ;;  %v9821_v52 = vsel %vm7501_vm6, 65537, %v7038_v7  ;;  %v7710_v13 = vpack.c.bf16 %v678_v53, %v677_v48  ;;  %v6186_v5 = vpop.f32.mrb[12].mxu0  ;;  %v9822_v30 = vrot.slane %v7460_v32, 7  ;;  %v7723_v63 = vpop.f32.mrb[12].mxu1 }
 0x11b   : > { %9820 = vst [vmem:[#allocation17_spill] sm:$0xff] %v7699_v27  ;;  %v5541_v44 = vcombine.low %v9821_v52, %v1444_v51  ;;  %v1446_v34 = vsel %vm1414_vm8, 65537, %v7038_v7  ;;  %v1788_v31 = vshrl.u32 %v7592_v26, 16  ;;  %vm9714_vm2 = vcmp.ne.s16.totalorder %v7489_v8, 0  ;;  %726 = vst [vmem:[#allocation2 + $0x38] sm:$0xff] %v7699_v27  ;;  %v590_v51 = vpop.f32.mrb[13].mxu0 }
 0x11c   : > { %v2487_v40 = vsel %vm1509_vm14, %v9822_v30, %v2486_v58  ;;  %v599_v35 = vadd.f32 %v6186_v5, %v7516_v57  ;;  %v1787_v53 = vsel %vm1090_vm15, %v7140_v19, %v1786_v4  ;;  %v2590_v48 = vor.u32 %v2588_v6, %v7701_v54  ;;  %9823 = vst [vmem:[#allocation18_spill] sm:$0xff] %v7723_v63  ;;  %v6187_v52 = vpop.f32.mrb[14].mxu0  ;;  %v7727_v49 = vpop.f32.mrb[13].mxu1  ;;  %v6419_v19 = vld [vmem:[%s9681_s3 + $0x188] sm:$0xff]   ;;  %vm7750_vm6 = vmpackc.low %vm976_vm5, %vm976_vm5 }
 0x11d   : > { %4410 = vmatmul.mubr.bf16.vlgmr.msra.gmra.mrb[16].mxu0 %v2487_v40  ;;  %v5542_v32 = vcombine.low %v1445_v39, %v1446_v34  ;;  %725 = vst [vmem:[#allocation2 + $0x30] sm:$0xff] %v7710_v13  ;;  %v591_v58 = vadd.f32 %v7516_v57, %v590_v51  ;;  %v2469_v30 = vshrl.u32 %v1787_v53, 16  ;;  %v2472_v42 = vshll.u32 %v1787_v53, 16  ;;  %9824 = vst [vmem:[#allocation19_spill] sm:$0xff] %v7727_v49  ;;  %v593_v39 = vpop.f32.mrb[15].mxu0  ;;  %v7735_v51 = vpop.f32.mrb[14].mxu1 }
 0x11e   : > { %v1566_v55 = vshrl.u32 %v5541_v44, 16  ;;  %5997 = vmatpush3.bf16.msra.mxu0 %v6415_v11  ;;  %v683_v5 = vmax.f32 %v599_v35, 0.0  ;;  %v602_v6 = vadd.f32 %v6187_v52, %v7516_v57  ;;  %v2591_v40 = vsel %vm1509_vm14, %v7648_v21, %v2590_v48  ;;  %v7740_v27 = vpop.f32.mrb[15].mxu1  ;;  %v6422_v21 = vld [vmem:[%s9681_s3 + $0x1d0] sm:$0xff]  }
 0x11f   : > { %v1574_v34 = vshrl.u32 %v5542_v32, 16  ;;  %5998 = vmatprep.subr.bf16.mxu0 %v6418_v41  ;;  %v681_v53 = vmax.f32 %v591_v58, 0.0  ;;  %v594_v63 = vadd.f32 %v7516_v57, %v593_v39  ;;  %v7738_v49 = vrot.slane %v2469_v30, 7  ;;  %4417 = vmatprep.mubr.bf16.mxu0 %v2591_v40 }
 0x120   : > { %v1577_v11 = vshll.u32 %v5542_v32, 16  ;;  %v684_v35 = vmax.f32 %v602_v6, 0.0  ;;  %v1568_v52 = vrot.slane %v1566_v55, 7  ;;  %v1569_v45 = vshll.u32 %v5541_v44, 16  ;;  %v6423_v55 = vld [vmem:[%s9681_s3 + $0x190] sm:$0xff]  }
 0x121   : > { %v7742_v10 = vrot.slane %v1574_v34, 7  ;;  %v682_v48 = vmax.f32 %v594_v63, 0.0  ;;  %v2474_v32 = vor.u32 %v2472_v42, %v7738_v49  ;;  %v1790_v58 = vor.u32 %v1788_v31, %v1786_v4  ;;  %v6407_v63 = vld [vmem:[%s9681_s3 + $0x100] sm:$0xff]  }
 0x122   : > { %v7755_v30 = vrot.slane %v1962_v46, 1  ;;  %5999 = vmatpush3.bf16.msra.mxu0 %v6419_v19  ;;  %vm9709_vm8 = vcmp.ne.s16.totalorder %v7526_v25, 0  ;;  %v7761_v44 = vpack.c.bf16 %v684_v35, %v683_v5  ;;  %v1571_v6 = vor.u32 %v1569_v45, %v1568_v52  ;;  %v6408_v19 = vld [vmem:[%s9681_s3 + $0x148] sm:$0xff]   ;;  %v7782_v5 = vld [vmem:[#allocation2] sm:$0xff] }
 0x123   : > { %v1579_v20 = vor.u32 %v1577_v11, %v7742_v10  ;;  %v7770_v42 = vsel %vm9715_vm0, %v7584_v14, 0  ;;  %6000 = vmatprep.subr.bf16.mxu0 %v6422_v21  ;;  %v7772_v46 = vpack.c.bf16 %v682_v48, %v681_v53  ;;  %v2475_v4 = vsel %vm1509_vm14, %v7258_v15, %v2474_v32 }
 0x124   : > { %v1795_v31 = vsel %vm1090_vm15, %v1790_v58, %v7755_v30  ;;  %v9707_v45 = vrot.slane %v7770_v42, 1  ;;  %v1040_v39 = vsel %vm7750_vm6, 65537, %v7782_v5  ;;  %728 = vst [vmem:[#allocation2 + $0x48] sm:$0xff] %v7761_v44  ;;  %4248 = vmatprep.mubr.bf16.mxu1 %v2475_v4  ;;  %v7790_v15 = vsel %vm1509_vm14, %v7574_v9, %v1571_v6  ;;  %v6410_v58 = vld [vmem:[%s9681_s3 + $0x150] sm:$0xff]  }
 0x125   : > { %v1580_v40 = vsel %vm1509_vm14, %v1568_v52, %v1579_v20  ;;  %v2569_v34 = vshrl.u32 %v1795_v31, 16  ;;  %v9827_v53 = vshrl.u32 %v7582_v43, 16  ;;  %727 = vst [vmem:[#allocation2 + $0x40] sm:$0xff] %v7772_v46  ;;  %4249 = vmatmul.mubr.bf16.vlgmr.msra.gmra.mrb[16].mxu1 %v7522_v22  ;;  %v9828_v35 = vrot.slane %v7613_v61, 1  ;;  %v6409_v61 = vld [vmem:[%s9681_s3 + $0x108] sm:$0xff]  }
 0x126   : > { %vm1645_vm5 = vcmp.ne.s16.totalorder %v1580_v40, 0  ;;  %v1676_v9 = vsel %vm9714_vm2, %v7644_v33, 0  ;;  %6001 = vmatpush3.bf16.msra.mxu0 %v6423_v55  ;;  %vm1644_vm6 = vcmp.ne.s16.totalorder %v7790_v15, 0  ;;  %5885 = vmatpush3.bf16.msra.mxu1 %v6407_v63  ;;  %v2572_v22 = vshll.u32 %v1795_v31, 16  ;;  %v1328_v55 = vpop.permute.xlu1 %1327 }
 0x127   : > { %v1209_v11 = vor.u32 %v9827_v53, %v7642_v0  ;;  %v1925_v21 = vsel %vm1920_vm9, %v9828_v35, %v9707_v45  ;;  %v7808_v43 = vsel %vm1645_vm5, %v7761_v44, 0  ;;  %v7811_v0 = vsel %vm1645_vm5, %v7594_v29, 0  ;;  %5886 = vmatprep.subr.bf16.mxu1 %v6408_v19 }
 0x128   : > { %v7819_v52 = vsel %vm1644_vm6, %v7761_v44, 0  ;;  %v7824_v41 = vsel %vm1644_vm6, %v7594_v29, 0  ;;  %v7827_v48 = vsel %vm1645_vm5, %v7586_v1, 0  ;;  %v7829_v32 = vrot.slane %v2569_v34, 7 }
 0x129   : > { %9829 = vst [vmem:[#allocation20_spill] sm:$0xff] %v7824_v41  ;;  %9830 = vst [vmem:[#allocation21_spill] sm:$0xff] %v7827_v48  ;;  %v2577_v6 = vshrl.u32 %v1925_v21, 16  ;;  %v2657_v63 = vshrl.u32 %v1676_v9, 16  ;;  %v2580_v29 = vshll.u32 %v1925_v21, 16  ;;  %v9831_v31 = vsel %vm7537_vm4, 65537, %v7038_v7 }
 0x12a   : > { %v2574_v4 = vor.u32 %v2572_v22, %v7829_v32  ;;  %v5533_v40 = vcombine.low %v1040_v39, %v9831_v31  ;;  %v1237_v19 = vsel %vm9708_vm13, %v7592_v26, 0  ;;  %vm9716_vm5 = vcmp.ne.s16.totalorder %v7492_v37, 0  ;;  %5887 = vmatpush3.bf16.msra.mxu1 %v6409_v61 }
 0x12b   : > { %v7845_v34 = vrot.slane %v2577_v6, 7  ;;  %v7847_v53 = vrot.slane %v2657_v63, 7  ;;  %v2660_v35 = vshll.u32 %v1676_v9, 16  ;;  %v2561_v20 = vshrl.u32 %v1237_v19, 16  ;;  %5888 = vmatprep.subr.bf16.mxu1 %v6410_v58  ;;  %v6412_v6 = vld [vmem:[%s9681_s3 + $0x158] sm:$0xff]  }
 0x12c   : > { %v2575_v39 = vsel %vm1509_vm14, %v7738_v49, %v2574_v4  ;;  %v1211_v21 = vshll.u32 %v5533_v40, 16  ;;  %v2564_v22 = vshll.u32 %v1237_v19, 16  ;;  %v1796_v26 = vshrl.u32 %v7584_v14, 16 }
 0x12d   : > { %4256 = vmatprep.mubr.bf16.mxu1 %v2575_v39  ;;  %v2582_v9 = vor.u32 %v2580_v29, %v7845_v34  ;;  %v2662_v61 = vor.u32 %v2660_v35, %v7847_v53  ;;  %v7860_v63 = vrot.slane %v2561_v20, 7  ;;  %v1800_v31 = vshll.u32 %v7644_v33, 16 }
 0x12e   : > { %v1213_v45 = vrot.slane %v1211_v21, 1  ;;  %v1215_v49 = vshrl.u32 %v5533_v40, 16  ;;  %vm1384_vm4 = vcmp.eq.s32.totalorder %v1328_v55, 1  ;;  %v7866_v58 = vsel %vm9709_vm8, %v7644_v33, 0  ;;  %5889 = vmatpush3.bf16.msra.mxu1 %v6411_v28  ;;  %v6413_v55 = vld [vmem:[%s9681_s3 + $0x118] sm:$0xff]   ;;  %v6416_v28 = vld [vmem:[%s9681_s3 + $0x160] sm:$0xff]  }
 0x12f   : > { %v2583_v4 = vsel %vm1509_vm14, %v7689_v18, %v2582_v9  ;;  %v2566_v19 = vor.u32 %v2564_v22, %v7860_v63  ;;  %v1798_v29 = vor.u32 %v1796_v26, %v7755_v30  ;;  %v7872_v35 = vrot.slane %v1800_v31, 1  ;;  %vm7874_vm13 = vmpackc.low %vm1384_vm4, %vm1384_vm4  ;;  %5890 = vmatprep.subr.bf16.mxu1 %v6412_v6  ;;  %v6426_v22 = vld [vmem:[%s9681_s3 + $0x1d8] sm:$0xff]   ;;  %v1331_v31 = vpop.permute.xlu1 %1330 }
 0x130   : > { %4418 = vmatmul.mubr.bf16.gmra.mrb[20].mxu0 %v2583_v4  ;;  %v2663_v40 = vsel %vm1509_vm14, %v7701_v54, %v2662_v61  ;;  %v7884_v18 = vsel %vm1090_vm15, %v1209_v11, %v1213_v45  ;;  %v1448_v39 = vsel %vm7874_vm13, 65537, %v7782_v5  ;;  %v9710_v21 = vrot.slane %v7866_v58, 1  ;;  %v6427_v54 = vld [vmem:[%s9681_s3 + $0x198] sm:$0xff]   ;;  %6002 = vmatprep.subr.bf16.mxu0 %v6426_v22 }
 0x131   : > { %4425 = vmatprep.mubr.bf16.mxu0 %v2663_v40  ;;  %v2567_v26 = vsel %vm1509_vm14, %v7430_v2, %v2566_v19  ;;  %v1803_v6 = vsel %vm1090_vm15, %v1798_v29, %v7872_v35  ;;  %v9834_v9 = vsel %vm7570_vm3, 65537, %v7038_v7  ;;  %vm9713_vm13 = vcmp.ne.s16.totalorder %v7529_v36, 0  ;;  %6003 = vmatpush3.bf16.msra.mxu0 %v6427_v54  ;;  %v6420_v54 = vld [vmem:[%s9681_s3 + $0x168] sm:$0xff]  }
 0x132   : > { %v5543_v61 = vcombine.low %v9834_v9, %v1448_v39  ;;  %v7909_v4 = vor.u32 %v1215_v49, %v1213_v45  ;;  %4257 = vmatmul.mubr.bf16.gmra.mrb[20].mxu1 %v2567_v26  ;;  %v2641_v20 = vshrl.u32 %v1803_v6, 16  ;;  %v2644_v11 = vshll.u32 %v1803_v6, 16  ;;  %v6417_v45 = vld [vmem:[%s9681_s3 + $0x120] sm:$0xff]   ;;  %6004 = vmatprep.subr.bf16.mxu0 %v6428_v60  ;;  %v6432_v60 = vld [vmem:[%s9681_s3 + $0x1e8] sm:$0xff]  }
 0x133   : > { %v9835_v2 = vrot.slane %v7770_v42, 1  ;;  %5891 = vmatpush3.bf16.msra.mxu1 %v6413_v55  ;;  %v6430_v42 = vld [vmem:[%s9681_s3 + $0x1a0] sm:$0xff]   ;;  %v1677_v22 = vsel %vm9716_vm5, %v7638_v23, 0  ;;  %vm1385_vm3 = vcmp.eq.s32.totalorder %v1331_v31, 1  ;;  %v1238_v55 = vsel %vm9714_vm2, %v7584_v14, 0  ;;  %v7941_v31 = vpop.permute.xlu0 %1339 }
 0x134   : > { %v1582_v29 = vshrl.u32 %v5543_v61, 16  ;;  %v1585_v40 = vshll.u32 %v5543_v61, 16  ;;  %v7925_v49 = vrot.slane %v2641_v20, 7  ;;  %5892 = vmatprep.subr.bf16.mxu1 %v6416_v28  ;;  %vm9722_vm4 = vcmp.ne.s16.totalorder %v7507_v59, 0  ;;  %vm1417_vm8 = vmpackc.low %vm1385_vm3, %vm1385_vm3 }
 0x135   : > { %v1927_v19 = vsel %vm1920_vm9, %v9835_v2, %v9710_v21  ;;  %v2729_v61 = vshrl.u32 %v1677_v22, 16  ;;  %v2732_v20 = vshll.u32 %v1677_v22, 16  ;;  %v1449_v14 = vsel %vm1417_vm8, 65537, %v7782_v5  ;;  %6005 = vmatpush3.bf16.msra.mxu0 %v6430_v42 }
 0x136   : > { %v2649_v39 = vshrl.u32 %v1927_v19, 16  ;;  %v2652_v9 = vshll.u32 %v1927_v19, 16  ;;  %v7937_v26 = vrot.slane %v1582_v29, 7  ;;  %v2646_v2 = vor.u32 %v2644_v11, %v7925_v49  ;;  %v6421_v11 = vld [vmem:[%s9681_s3 + $0x128] sm:$0xff]   ;;  %6006 = vmatprep.subr.bf16.mxu0 %v6432_v60 }
 0x137   : > { %v2633_v28 = vshrl.u32 %v1238_v55, 16  ;;  %v2636_v19 = vshll.u32 %v1238_v55, 16  ;;  %v7950_v21 = vrot.slane %v2729_v61, 7  ;;  %v9836_v22 = vsel %vm7578_vm1, 65537, %v7038_v7  ;;  %5893 = vmatpush3.bf16.msra.mxu1 %v6417_v45  ;;  %v6433_v55 = vld [vmem:[%s9681_s3 + $0x1a8] sm:$0xff]   ;;  %v6424_v45 = vld [vmem:[%s9681_s3 + $0x170] sm:$0xff]  }
 0x138   : > { %v7939_v6 = vrot.slane %v2649_v39, 7  ;;  %v1587_v29 = vor.u32 %v1585_v40, %v7937_v26  ;;  %v5544_v48 = vcombine.low %v1449_v14, %v9836_v22  ;;  %v2647_v40 = vsel %vm1509_vm14, %v7829_v32, %v2646_v2  ;;  %5894 = vmatprep.subr.bf16.mxu1 %v6420_v54  ;;  %v6429_v22 = vld [vmem:[%s9681_s3 + $0x178] sm:$0xff]  }
 0x139   : > { %v7968_v62 = vadd.f32 %v7663_v56, %v7516_v57  ;;  %v1804_v7 = vshrl.u32 %v7644_v33, 16  ;;  %vm1388_vm1 = vcmp.eq.s32.totalorder %v7941_v31, 1  ;;  %4264 = vmatprep.mubr.bf16.mxu1 %v2647_v40  ;;  %v2734_v56 = vor.u32 %v2732_v20, %v7950_v21  ;;  %6007 = vmatpush3.bf16.msra.mxu0 %v6433_v55 }
 0x13a   : > { %v2654_v39 = vor.u32 %v2652_v9, %v7939_v6  ;;  %v7964_v9 = vrot.slane %v2633_v28, 7  ;;  %v7977_v32 = vsel %vm1509_vm14, %v7742_v10, %v1587_v29  ;;  %v1590_v61 = vshrl.u32 %v5544_v48, 16  ;;  %v6434_v28 = vld [vmem:[%s9681_s3 + $0x1f0] sm:$0xff]   ;;  %vm8078_vm0 = vmpackc.low %vm1388_vm1, %vm1388_vm1 }
 0x13b   : > { %vm1646_vm8 = vcmp.ne.s16.totalorder %v7977_v32, 0  ;;  %v1593_v54 = vshll.u32 %v5544_v48, 16  ;;  %v695_v14 = vmax.f32 %v7968_v62, 0.0  ;;  %v2735_v48 = vsel %vm1509_vm14, %v7847_v53, %v2734_v56  ;;  %5895 = vmatpush3.bf16.msra.mxu1 %v6421_v11  ;;  %6008 = vmatprep.subr.bf16.mxu0 %v6434_v28  ;;  %v6436_v56 = vld [vmem:[%s9681_s3 + $0x1f8] sm:$0xff]  }
 0x13c   : > { %v2655_v42 = vsel %vm1509_vm14, %v7845_v34, %v2654_v39  ;;  %v2638_v2 = vor.u32 %v2636_v19, %v7964_v9  ;;  %v7991_v10 = vsel %vm1646_vm8, %v7586_v1, 0  ;;  %v7996_v34 = vsel %vm1646_vm8, %v7646_v16, 0  ;;  %v6425_v19 = vld [vmem:[%s9681_s3 + $0x130] sm:$0xff]   ;;  %5896 = vmatprep.subr.bf16.mxu1 %v6424_v45 }
 0x13d   : > { %4426 = vmatmul.mubr.bf16.gmra.mrb[24].mxu0 %v2655_v42  ;;  %9837 = vst [vmem:[#allocation22_spill] sm:$0xff] %v7996_v34  ;;  %v8000_v20 = vrot.slane %v1590_v61, 7  ;;  %v6435_v1 = vld [vmem:[%s9681_s3 + $0x1b0] sm:$0xff]   ;;  %vm9717_vm3 = vcmp.ne.s16.totalorder %v7542_v3, 0  ;;  %v1806_v53 = vor.u32 %v1804_v7, %v7872_v35  ;;  %v1808_v29 = vshll.u32 %v7638_v23, 16  ;;  %v6431_v42 = vld [vmem:[%s9681_s3 + $0x138] sm:$0xff]  }
 0x13e   : > { %4433 = vmatprep.mubr.bf16.mxu0 %v2735_v48  ;;  %v2639_v60 = vsel %vm1509_vm14, %v7860_v63, %v2638_v2  ;;  %v639_v39 = vadd.f32 %v7516_v57, %v7676_v50  ;;  %v650_v55 = vadd.f32 %v7683_v12, %v7516_v57  ;;  %v642_v63 = vadd.f32 %v7516_v57, %v7691_v17  ;;  %v6437_v61 = vld [vmem:[%s9681_s3 + $0x1b8] sm:$0xff]  }
 0x13f   : > { %v1595_v11 = vor.u32 %v1593_v54, %v8000_v20  ;;  %4265 = vmatmul.mubr.bf16.gmra.mrb[24].mxu1 %v2639_v60  ;;  %v8026_v35 = vsel %vm9713_vm13, %v7638_v23, 0  ;;  %v1810_v50 = vrot.slane %v1808_v29, 1  ;;  %v1678_v7 = vsel %vm9722_vm4, %v7710_v13, 0  ;;  %6009 = vmatpush3.bf16.msra.mxu0 %v6435_v1 }
 0x140   : > { %v693_v40 = vmax.f32 %v639_v39, 0.0  ;;  %v1928_v62 = vrot.slane %v8026_v35, 1  ;;  %v696_v45 = vmax.f32 %v650_v55, 0.0  ;;  %v694_v57 = vmax.f32 %v642_v63, 0.0  ;;  %5897 = vmatpush3.bf16.msra.mxu1 %v6425_v19  ;;  %v9839_v19 = vld [vmem:[#allocation15_spill] sm:$0xff]  ;;  %6010 = vmatprep.subr.bf16.mxu0 %v6436_v56 }
 0x141   : > { %v8034_v12 = vsel %vm1509_vm14, %v7937_v26, %v1595_v11  ;;  %v2801_v17 = vshrl.u32 %v1678_v7, 16  ;;  %vm9720_vm13 = vcmp.ne.s16.totalorder %v7073_v38, 0  ;;  %v1811_v26 = vsel %vm1090_vm15, %v1806_v53, %v1810_v50  ;;  %5898 = vmatprep.subr.bf16.mxu1 %v6429_v22  ;;  %v1337_v22 = vpop.permute.xlu1 %1336 }
 0x142   : > { %vm1647_vm2 = vcmp.ne.s16.totalorder %v8034_v12, 0  ;;  %v9838_v54 = vrot.slane %v7866_v58, 1  ;;  %v2804_v28 = vshll.u32 %v1678_v7, 16  ;;  %v2713_v60 = vshrl.u32 %v1811_v26, 16 }
 0x143   : > { %v8056_v48 = vsel %vm1647_vm2, %v7646_v16, 0  ;;  %v8061_v1 = vsel %vm1647_vm2, %v9839_v19, 0  ;;  %v2716_v53 = vshll.u32 %v1811_v26, 16  ;;  %v8063_v29 = vpack.c.bf16 %v696_v45, %v695_v14  ;;  %6011 = vmatpush3.bf16.msra.mxu0 %v6437_v61 }
 0x144   : > { %v1929_v2 = vsel %vm1920_vm9, %v9838_v54, %v1928_v62  ;;  %9840 = vst [vmem:[#allocation15_spill] sm:$0xff] %v8061_v1  ;;  %v8065_v58 = vpack.c.bf16 %v694_v57, %v693_v40  ;;  %v8067_v55 = vrot.slane %v2713_v60, 7  ;;  %v8069_v63 = vrot.slane %v2801_v17, 7  ;;  %5899 = vmatpush3.bf16.msra.mxu1 %v6431_v42  ;;  %v6438_v42 = vld [vmem:[%s9681_s3 + $0x200] sm:$0xff]  }
 0x145   : > { %v2721_v39 = vshrl.u32 %v1929_v2, 16  ;;  %v2724_v11 = vshll.u32 %v1929_v2, 16  ;;  %v1239_v16 = vsel %vm9716_vm5, %v7644_v33, 0  ;;  %v1812_v7 = vshrl.u32 %v7638_v23, 16  ;;  %734 = vst [vmem:[#allocation2 + $0x78] sm:$0xff] %v8063_v29  ;;  %6204 = vmatprep.subr.bf16.mxu1 %v6438_v42 }
 0x146   : > { %733 = vst [vmem:[#allocation2 + $0x70] sm:$0xff] %v8065_v58  ;;  %v2705_v45 = vshrl.u32 %v1239_v16, 16  ;;  %v2708_v57 = vshll.u32 %v1239_v16, 16  ;;  %v1816_v33 = vshll.u32 %v7710_v13, 16  ;;  %v2718_v17 = vor.u32 %v2716_v53, %v8067_v55 }
 0x147   : > { %v8084_v40 = vrot.slane %v2721_v39, 7  ;;  %v2806_v31 = vor.u32 %v2804_v28, %v8069_v63  ;;  %v1814_v56 = vor.u32 %v1812_v7, %v1810_v50  ;;  %vm1387_vm1 = vcmp.eq.s32.totalorder %v1337_v22, 1  ;;  %v9843_v39 = vld [vmem:[#allocation14_spill] sm:$0xff] }
 0x148   : > { %v8093_v26 = vrot.slane %v2705_v45, 7  ;;  %v1818_v54 = vrot.slane %v1816_v33, 1  ;;  %vm1419_vm5 = vmpackc.low %vm1387_vm1, %vm1387_vm1  ;;  %v1452_v2 = vsel %vm8078_vm0, 65537, %v7782_v5  ;;  %v2719_v60 = vsel %vm1509_vm14, %v7925_v49, %v2718_v17  ;;  %v9844_v33 = vld [vmem:[#allocation17_spill] sm:$0xff] }
 0x149   : > { %v2726_v61 = vor.u32 %v2724_v11, %v8084_v40  ;;  %v2807_v50 = vsel %vm1509_vm14, %v7950_v21, %v2806_v31  ;;  %v1451_v28 = vsel %vm1419_vm5, 65537, %v7782_v5  ;;  %v8106_v53 = vsel %vm9717_vm3, %v7710_v13, 0  ;;  %4272 = vmatprep.mubr.bf16.mxu1 %v2719_v60  ;;  %v1343_v21 = vpop.permute.xlu1 %1342 }
 0x14a   : > { %vm9721_vm1 = vcmp.ne.s16.totalorder %v9843_v39, 0  ;;  %v2710_v22 = vor.u32 %v2708_v57, %v8093_v26  ;;  %v1819_v49 = vsel %vm1090_vm15, %v1814_v56, %v1818_v54  ;;  %v5545_v16 = vcombine.low %v1451_v28, %v1452_v2  ;;  %v9845_v56 = vld [vmem:[#allocation3_spill] sm:$0xff] }
 0x14b   : > { %v2727_v11 = vsel %vm1509_vm14, %v7939_v6, %v2726_v61  ;;  %v2785_v7 = vshrl.u32 %v1819_v49, 16  ;;  %v2788_v14 = vshll.u32 %v1819_v49, 16  ;;  %v1930_v45 = vrot.slane %v8106_v53, 1  ;;  %v1346_v61 = vpop.permute.xlu0 %1345 }
 0x14c   : > { %4434 = vmatmul.mubr.bf16.gmra.mrb[28].mxu0 %v2727_v11  ;;  %v1679_v17 = vsel %vm9720_vm13, %v9844_v33, 0  ;;  %v2711_v31 = vsel %vm1509_vm14, %v7964_v9, %v2710_v22  ;;  %v1598_v6 = vshrl.u32 %v5545_v16, 16  ;;  %v1601_v42 = vshll.u32 %v5545_v16, 16 }
 0x14d   : > { %4441 = vmatprep.mubr.bf16.mxu0 %v2807_v50  ;;  %v2873_v57 = vshrl.u32 %v1679_v17, 16  ;;  %vm9725_vm0 = vcmp.ne.s16.totalorder %v9845_v56, 0  ;;  %4273 = vmatmul.mubr.bf16.gmra.mrb[28].mxu1 %v2711_v31  ;;  %v8120_v2 = vrot.slane %v2785_v7, 7  ;;  %v1931_v60 = vsel %vm1920_vm9, %v1928_v62, %v1930_v45 }
 0x14e   : > { %v2876_v28 = vshll.u32 %v1679_v17, 16  ;;  %vm1389_vm5 = vcmp.eq.s32.totalorder %v1343_v21, 1  ;;  %v1600_v50 = vrot.slane %v1598_v6, 7  ;;  %v2793_v11 = vshrl.u32 %v1931_v60, 16 }
 0x14f   : > { %v2796_v9 = vshll.u32 %v1931_v60, 16  ;;  %v8127_v22 = vrot.slane %v2873_v57, 7  ;;  %vm8129_vm3 = vmpackc.low %vm1389_vm5, %vm1389_vm5  ;;  %v2790_v16 = vor.u32 %v2788_v14, %v8120_v2  ;;  %vm1390_vm11 = vcmp.eq.s32.totalorder %v1346_v61, 1 }
 0x150   : > { %v1453_v7 = vsel %vm8129_vm3, 65537, %v7782_v5  ;;  %v1240_v35 = vsel %vm9722_vm4, %v7638_v23, 0  ;;  %v1603_v62 = vor.u32 %v1601_v42, %v1600_v50  ;;  %v8140_v21 = vrot.slane %v2793_v11, 7  ;;  %vm1422_vm5 = vmpackc.low %vm1390_vm11, %vm1390_vm11 }
 0x151   : > { %v2878_v17 = vor.u32 %v2876_v28, %v8127_v22  ;;  %v2777_v31 = vshrl.u32 %v1240_v35, 16  ;;  %v2791_v6 = vsel %vm1509_vm14, %v8067_v55, %v2790_v16  ;;  %v1454_v14 = vsel %vm1422_vm5, 65537, %v7782_v5 }
 0x152   : > { %v2780_v57 = vshll.u32 %v1240_v35, 16  ;;  %v1820_v60 = vshrl.u32 %v7710_v13, 16  ;;  %4280 = vmatprep.mubr.bf16.mxu1 %v2791_v6  ;;  %v8149_v61 = vsel %vm1509_vm14, %v8000_v20, %v1603_v62  ;;  %v2798_v23 = vor.u32 %v2796_v9, %v8140_v21 }
 0x153   : > { %v2879_v42 = vsel %vm1509_vm14, %v8069_v63, %v2878_v17  ;;  %v5546_v28 = vcombine.low %v1453_v7, %v1454_v14  ;;  %vm1648_vm11 = vcmp.ne.s16.totalorder %v8149_v61, 0  ;;  %v2779_v11 = vrot.slane %v2777_v31, 7 }
 0x154   : > { %v1822_v55 = vor.u32 %v1820_v60, %v1818_v54  ;;  %v1824_v49 = vshll.u32 %v9844_v33, 16  ;;  %v8159_v16 = vsel %vm1648_vm11, %v9839_v19, 0  ;;  %v8164_v20 = vsel %vm1648_vm11, %v8065_v58, 0 }
 0x155   : > { %9848 = vst [vmem:[#allocation14_spill] sm:$0xff] %v8159_v16  ;;  %9849 = vst [vmem:[#allocation17_spill] sm:$0xff] %v8164_v20  ;;  %v2799_v63 = vsel %vm1509_vm14, %v8084_v40, %v2798_v23  ;;  %v1606_v9 = vshrl.u32 %v5546_v28, 16  ;;  %v1609_v7 = vshll.u32 %v5546_v28, 16  ;;  %v2782_v35 = vor.u32 %v2780_v57, %v2779_v11  ;;  %v9850_v23 = vld [vmem:[#allocation4_spill] sm:$0xff] }
 0x156   : > { %4442 = vmatmul.mubr.bf16.gmra.mrb[32].mxu0 %v2799_v63  ;;  %v1826_v54 = vrot.slane %v1824_v49, 1  ;;  %v8171_v62 = vsel %vm9721_vm1, %v9844_v33, 0  ;;  %v1680_v31 = vsel %vm9725_vm0, %v7772_v46, 0  ;;  %v1241_v40 = vsel %vm9720_vm13, %v7710_v13, 0 }
 0x157   : > { %4449 = vmatprep.mubr.bf16.mxu0 %v2879_v42  ;;  %v8173_v19 = vrot.slane %v1606_v9, 7  ;;  %v9719_v17 = vrot.slane %v8171_v62, 1  ;;  %v2783_v6 = vsel %vm1509_vm14, %v8093_v26, %v2782_v35  ;;  %v2945_v57 = vshrl.u32 %v1680_v31, 16 }
 0x158   : > { %v1827_v14 = vsel %vm1090_vm15, %v1822_v55, %v1826_v54  ;;  %v2948_v60 = vshll.u32 %v1680_v31, 16  ;;  %vm9724_vm3 = vcmp.ne.s16.totalorder %v9850_v23, 0  ;;  %4281 = vmatmul.mubr.bf16.gmra.mrb[32].mxu1 %v2783_v6  ;;  %v2849_v55 = vshrl.u32 %v1241_v40, 16  ;;  %v6472_v6 = vld [vmem:[%s9680_s2] ss:$0 sm:$0xff] }
 0x159   : > { %v1611_v42 = vor.u32 %v1609_v7, %v8173_v19  ;;  %v2857_v28 = vshrl.u32 %v1827_v14, 16  ;;  %v2860_v49 = vshll.u32 %v1827_v14, 16  ;;  %v1933_v13 = vsel %vm1920_vm9, %v1930_v45, %v9719_v17  ;;  %v9851_v14 = vld [vmem:[#allocation18_spill] sm:$0xff]  ;;  %v1352_v17 = vpop.permute.xlu0 %1351 }
 0x15a   : > { %v2865_v63 = vshrl.u32 %v1933_v13, 16  ;;  %v2868_v9 = vshll.u32 %v1933_v13, 16  ;;  %v8192_v26 = vrot.slane %v2945_v57, 7  ;;  %v2852_v7 = vshll.u32 %v1241_v40, 16  ;;  %v1349_v13 = vpop.permute.xlu1 %1348 }
 0x15b   : > { %v8195_v35 = vsel %vm1509_vm14, %v1600_v50, %v1611_v42  ;;  %v8197_v31 = vrot.slane %v2857_v28, 7  ;;  %v663_v20 = vadd.f32 %v6472_v6, %v9851_v14  ;;  %v8207_v57 = vrot.slane %v2849_v55, 7 }
 0x15c   : > { %vm1649_vm5 = vcmp.ne.s16.totalorder %v8195_v35, 0  ;;  %v8204_v53 = vrot.slane %v2865_v63, 7  ;;  %v2950_v45 = vor.u32 %v2948_v60, %v8192_v26  ;;  %v1828_v14 = vshrl.u32 %v9844_v33, 16 }
 0x15d   : > { %v8212_v50 = vsel %vm1649_vm5, %v8065_v58, 0  ;;  %v8217_v40 = vsel %vm1649_vm5, %v8063_v29, 0  ;;  %v2862_v42 = vor.u32 %v2860_v49, %v8197_v31  ;;  %v699_v28 = vmax.f32 %v663_v20, 0.0 }
 0x15e   : > { %9852 = vst [vmem:[#allocation3_spill] sm:$0xff] %v8212_v50  ;;  %9853 = vst [vmem:[#allocation4_spill] sm:$0xff] %v8217_v40  ;;  %v2870_v63 = vor.u32 %v2868_v9, %v8204_v53  ;;  %v2951_v60 = vsel %vm1509_vm14, %v8127_v22, %v2950_v45  ;;  %v2854_v55 = vor.u32 %v2852_v7, %v8207_v57  ;;  %v1832_v34 = vshll.u32 %v7772_v46, 16  ;;  %v9854_v40 = vld [vmem:[#allocation19_spill] sm:$0xff] }
 0x15f   : > { %v2863_v1 = vsel %vm1509_vm14, %v8120_v2, %v2862_v42  ;;  %v655_v41 = vadd.f32 %v6472_v6, %v9854_v40  ;;  %v666_v20 = vadd.f32 %v6472_v6, %v7735_v51  ;;  %v1830_v9 = vor.u32 %v1828_v14, %v1826_v54 }
 0x160   : > { %4288 = vmatprep.mubr.bf16.mxu1 %v2863_v1  ;;  %v2871_v49 = vsel %vm1509_vm14, %v8140_v21, %v2870_v63  ;;  %v2855_v22 = vsel %vm1509_vm14, %v2779_v11, %v2854_v55  ;;  %vm1391_vm13 = vcmp.eq.s32.totalorder %v1349_v13, 1  ;;  %v1834_v7 = vrot.slane %v1832_v34, 1  ;;  %v1355_v11 = vpop.permute.xlu1 %1354  ;;  %v9856_v55 = vld [vmem:[#allocation6_spill] sm:$0xff] }
 0x161   : > { %4450 = vmatmul.mubr.bf16.gmra.mrb[36].mxu0 %v2871_v49  ;;  %4289 = vmatmul.mubr.bf16.gmra.mrb[36].mxu1 %v2855_v22  ;;  %v697_v45 = vmax.f32 %v655_v41, 0.0  ;;  %v700_v50 = vmax.f32 %v666_v20, 0.0  ;;  %vm1423_vm1 = vmpackc.low %vm1391_vm13, %vm1391_vm13  ;;  %vm1392_vm4 = vcmp.eq.s32.totalorder %v1352_v17, 1  ;;  %v658_v51 = vadd.f32 %v6472_v6, %v7740_v27 }
 0x162   : > { %4457 = vmatprep.mubr.bf16.mxu0 %v2951_v60  ;;  %v1455_v2 = vsel %vm1423_vm1, 65537, %v7782_v5  ;;  %vm1424_vm12 = vmpackc.low %vm1392_vm4, %vm1392_vm4  ;;  %v1661_v1 = vsel %vm1644_vm6, %v7772_v46, 0  ;;  %v1681_v21 = vsel %vm9724_vm3, %v7761_v44, 0  ;;  %v1835_v41 = vsel %vm1090_vm15, %v1830_v9, %v1834_v7  ;;  %v1358_v60 = vpop.permute.xlu0 %1357 }
 0x163   : > { %v8242_v34 = vpack.c.bf16 %v700_v50, %v699_v28  ;;  %v1456_v54 = vsel %vm1424_vm12, 65537, %v7782_v5  ;;  %v1934_v17 = vrot.slane %v1661_v1, 1  ;;  %v2929_v40 = vshrl.u32 %v1835_v41, 16 }
 0x164   : > { %v2932_v42 = vshll.u32 %v1835_v41, 16  ;;  %v5547_v13 = vcombine.low %v1455_v2, %v1456_v54  ;;  %v698_v27 = vmax.f32 %v658_v51, 0.0  ;;  %v9855_v15 = vrot.slane %v8171_v62, 1 }
 0x165   : > { %736 = vst [vmem:[#allocation2 + $0x88] sm:$0xff] %v8242_v34  ;;  %v3017_v63 = vshrl.u32 %v1681_v21, 16  ;;  %v3020_v44 = vshll.u32 %v1681_v21, 16  ;;  %vm1393_vm6 = vcmp.eq.s32.totalorder %v1355_v11, 1  ;;  %vm1227_vm13 = vcmp.ne.s16.totalorder %v9856_v55, 0 }
 0x166   : > { %v1935_v6 = vsel %vm1920_vm9, %v9855_v15, %v1934_v17  ;;  %v8250_v50 = vrot.slane %v2929_v40, 7  ;;  %v1614_v28 = vshrl.u32 %v5547_v13, 16  ;;  %v1617_v14 = vshll.u32 %v5547_v13, 16  ;;  %vm8254_vm12 = vmpackc.low %vm1393_vm6, %vm1393_vm6  ;;  %v8269_v40 = vld [vmem:[#allocation2 + $0x48] sm:$0xff] }
 0x167   : > { %v8252_v20 = vpack.c.bf16 %v698_v27, %v697_v45  ;;  %v2937_v22 = vshrl.u32 %v1935_v6, 16  ;;  %v2940_v62 = vshll.u32 %v1935_v6, 16  ;;  %v8258_v9 = vrot.slane %v3017_v63, 7 }
 0x168   : > { %v1457_v2 = vsel %vm8254_vm12, 65537, %v7782_v5  ;;  %v2934_v51 = vor.u32 %v2932_v42, %v8250_v50  ;;  %v1616_v1 = vrot.slane %v1614_v28, 7  ;;  %vm1394_vm4 = vcmp.eq.s32.totalorder %v1358_v60, 1  ;;  %v9859_v60 = vld [vmem:[#allocation7_spill] sm:$0xff] }
 0x169   : > { %735 = vst [vmem:[#allocation2 + $0x80] sm:$0xff] %v8252_v20  ;;  %v1242_v45 = vsel %vm9725_vm0, %v9844_v33, 0  ;;  %v2939_v21 = vrot.slane %v2937_v22, 7  ;;  %v3022_v11 = vor.u32 %v3020_v44, %v8258_v9  ;;  %vm1426_vm1 = vmpackc.low %vm1394_vm4, %vm1394_vm4  ;;  %v1836_v15 = vshrl.u32 %v7772_v46, 16 }
 0x16a   : > { %v2921_v41 = vshrl.u32 %v1242_v45, 16  ;;  %v2924_v54 = vshll.u32 %v1242_v45, 16  ;;  %v2935_v13 = vsel %vm1509_vm14, %v8197_v31, %v2934_v51  ;;  %v1619_v42 = vor.u32 %v1617_v14, %v1616_v1  ;;  %v8286_v51 = vld [vmem:[#allocation2 + $0x50] sm:$0xff] }
 0x16b   : > { %v1458_v27 = vsel %vm1426_vm1, 65537, %v7782_v5  ;;  %4296 = vmatprep.mubr.bf16.mxu1 %v2935_v13  ;;  %v2942_v6 = vor.u32 %v2940_v62, %v2939_v21  ;;  %v3023_v33 = vsel %vm1509_vm14, %v8192_v26, %v3022_v11  ;;  %vm1228_vm6 = vcmp.ne.s16.totalorder %v9859_v60, 0 }
 0x16c   : > { %v5548_v63 = vcombine.low %v1457_v2, %v1458_v27  ;;  %v2923_v44 = vrot.slane %v2921_v41, 7  ;;  %v8280_v28 = vsel %vm1509_vm14, %v8173_v19, %v1619_v42  ;;  %v1838_v49 = vor.u32 %v1836_v15, %v1834_v7 }
 0x16d   : > { %v1840_v31 = vshll.u32 %v8269_v40, 16  ;;  %v9860_v14 = vrot.slane %v7808_v43, 1  ;;  %vm1650_vm12 = vcmp.ne.s16.totalorder %v8280_v28, 0  ;;  %v2943_v26 = vsel %vm1509_vm14, %v8204_v53, %v2942_v6 }
 0x16e   : > { %v1622_v62 = vshrl.u32 %v5548_v63, 16  ;;  %v1625_v2 = vshll.u32 %v5548_v63, 16  ;;  %v8294_v19 = vsel %vm1650_vm12, %v8063_v29, 0  ;;  %4458 = vmatmul.mubr.bf16.gmra.mrb[40].mxu0 %v2943_v26  ;;  %v2926_v7 = vor.u32 %v2924_v54, %v2923_v44 }
 0x16f   : > { %v1937_v22 = vsel %vm1920_vm9, %v1934_v17, %v9860_v14  ;;  %9861 = vst [vmem:[#allocation18_spill] sm:$0xff] %v8294_v19  ;;  %v1842_v45 = vrot.slane %v1840_v31, 1  ;;  %4465 = vmatprep.mubr.bf16.mxu0 %v3023_v33  ;;  %v1682_v13 = vsel %vm1227_vm13, %v8286_v51, 0  ;;  %v1243_v53 = vsel %vm9724_vm3, %v7772_v46, 0  ;;  %v9868_v19 = vld [vmem:[#allocation11_spill] sm:$0xff] }
 0x170   : > { %v3009_v11 = vshrl.u32 %v1937_v22, 16  ;;  %v8296_v17 = vrot.slane %v1622_v62, 7  ;;  %v3012_v41 = vshll.u32 %v1937_v22, 16  ;;  %v2927_v29 = vsel %vm1509_vm14, %v8207_v57, %v2926_v7 }
 0x171   : > { %v1843_v42 = vsel %vm1090_vm15, %v1838_v49, %v1842_v45  ;;  %v3089_v27 = vshrl.u32 %v1682_v13, 16  ;;  %4297 = vmatmul.mubr.bf16.gmra.mrb[40].mxu1 %v2927_v29  ;;  %v3092_v63 = vshll.u32 %v1682_v13, 16  ;;  %v2993_v22 = vshrl.u32 %v1243_v53, 16  ;;  %v8320_v13 = vld [vmem:[#allocation2 + $0x58] sm:$0xff] }
 0x172   : > { %v8307_v54 = vrot.slane %v3009_v11, 7  ;;  %v1627_v15 = vor.u32 %v1625_v2, %v8296_v17  ;;  %v3001_v6 = vshrl.u32 %v1843_v42, 16  ;;  %v3004_v33 = vshll.u32 %v1843_v42, 16 }
 0x173   : > { %v3091_v14 = vrot.slane %v3089_v27, 7  ;;  %v2996_v26 = vshll.u32 %v1243_v53, 16  ;;  %v1844_v49 = vshrl.u32 %v8269_v40, 16  ;;  %v1848_v62 = vshll.u32 %v8286_v51, 16  ;;  %v9864_v27 = vld [vmem:[#allocation9_spill] sm:$0xff] }
 0x174   : > { %v3014_v31 = vor.u32 %v3012_v41, %v8307_v54  ;;  %v8312_v46 = vsel %vm1509_vm14, %v1616_v1, %v1627_v15  ;;  %v3003_v57 = vrot.slane %v3001_v6, 7  ;;  %v8318_v11 = vrot.slane %v2993_v22, 7  ;;  %v1361_v41 = vpop.permute.xlu1 %1360 }
 0x175   : > { %vm1651_vm4 = vcmp.ne.s16.totalorder %v8312_v46, 0  ;;  %v3094_v7 = vor.u32 %v3092_v63, %v3091_v14  ;;  %v1846_v42 = vor.u32 %v1844_v49, %v1842_v45  ;;  %vm1229_vm1 = vcmp.ne.s16.totalorder %v9864_v27, 0 }
 0x176   : > { %v3015_v2 = vsel %vm1509_vm14, %v2939_v21, %v3014_v31  ;;  %v8325_v1 = vsel %vm1651_vm4, %v8252_v20, 0  ;;  %v8330_v53 = vsel %vm1651_vm4, %v8242_v34, 0  ;;  %v3006_v29 = vor.u32 %v3004_v33, %v3003_v57  ;;  %v1364_v33 = vpop.permute.xlu0 %1363 }
 0x177   : > { %9862 = vst [vmem:[#allocation19_spill] sm:$0xff] %v8325_v1  ;;  %9863 = vst [vmem:[#allocation6_spill] sm:$0xff] %v8330_v53  ;;  %4466 = vmatmul.mubr.bf16.gmra.mrb[44].mxu0 %v3015_v2  ;;  %v3095_v21 = vsel %vm1509_vm14, %v8258_v9, %v3094_v7  ;;  %v2998_v15 = vor.u32 %v2996_v26, %v8318_v11  ;;  %v1850_v6 = vrot.slane %v1848_v62, 1  ;;  %v1663_v63 = vsel %vm1646_vm8, %v8286_v51, 0 }
 0x178   : > { %v3007_v31 = vsel %vm1509_vm14, %v8250_v50, %v3006_v29  ;;  %4473 = vmatprep.mubr.bf16.mxu0 %v3095_v21  ;;  %v1938_v22 = vrot.slane %v1663_v63, 1  ;;  %v1683_v45 = vsel %vm1228_vm6, %v8320_v13, 0  ;;  %vm1395_vm3 = vcmp.eq.s32.totalorder %v1361_v41, 1 }
 0x179   : > { %4304 = vmatprep.mubr.bf16.mxu1 %v3007_v31  ;;  %v2999_v9 = vsel %vm1509_vm14, %v2923_v44, %v2998_v15  ;;  %v1851_v26 = vsel %vm1090_vm15, %v1846_v42, %v1850_v6  ;;  %v3161_v49 = vshrl.u32 %v1683_v45, 16  ;;  %v3164_v62 = vshll.u32 %v1683_v45, 16  ;;  %vm8346_vm0 = vmpackc.low %vm1395_vm3, %vm1395_vm3 }
 0x17a   : > { %4305 = vmatmul.mubr.bf16.gmra.mrb[44].mxu1 %v2999_v9  ;;  %v3073_v50 = vshrl.u32 %v1851_v26, 16  ;;  %v3076_v2 = vshll.u32 %v1851_v26, 16  ;;  %v9867_v7 = vrot.slane %v7808_v43, 1  ;;  %v1459_v41 = vsel %vm8346_vm0, 65537, %v7782_v5 }
 0x17b   : > { %v8356_v42 = vrot.slane %v3161_v49, 7  ;;  %vm1396_vm8 = vcmp.eq.s32.totalorder %v1364_v33, 1  ;;  %v1244_v63 = vsel %vm1227_vm13, %v8269_v40, 0  ;;  %v1852_v43 = vshrl.u32 %v8286_v51, 16 }
 0x17c   : > { %v1939_v29 = vsel %vm1920_vm9, %v9867_v7, %v1938_v22  ;;  %v8358_v15 = vrot.slane %v3073_v50, 7  ;;  %vm1428_vm3 = vmpackc.low %vm1396_vm8, %vm1396_vm8  ;;  %v1856_v31 = vshll.u32 %v8320_v13, 16  ;;  %v3065_v49 = vshrl.u32 %v1244_v63, 16 }
 0x17d   : > { %v3081_v44 = vshrl.u32 %v1939_v29, 16  ;;  %v3084_v21 = vshll.u32 %v1939_v29, 16  ;;  %v3166_v9 = vor.u32 %v3164_v62, %v8356_v42  ;;  %v1460_v26 = vsel %vm1428_vm3, 65537, %v7782_v5 }
 0x17e   : > { %v3078_v33 = vor.u32 %v3076_v2, %v8358_v15  ;;  %v5549_v32 = vcombine.low %v1459_v41, %v1460_v26  ;;  %v3068_v50 = vshll.u32 %v1244_v63, 16  ;;  %v1854_v7 = vor.u32 %v1852_v43, %v1850_v6  ;;  %v1705_v2 = vld [vmem:[#allocation2 + $0x90] sm:$0x1]  ;;  %v1758_v41 = vld [vmem:[#allocation2 + $0x98] sm:$0x1] }
 0x17f   : > { %v8365_v45 = vrot.slane %v3081_v44, 7  ;;  %v3167_v40 = vsel %vm1509_vm14, %v3091_v14, %v3166_v9  ;;  %v8372_v53 = vrot.slane %v3065_v49, 7  ;;  %v8374_v1 = vrot.slane %v1856_v31, 1  ;;  %v8376_v44 = vld [vmem:[#allocation2 + $0x60] sm:$0xff]  ;;  %v1268_v43 = vld [vmem:[#allocation2 + $0x88] sm:$0x1] }
 0x180   : > { %vm1230_vm0 = vcmp.ne.s16.totalorder %v9868_v19, 0  ;;  %v3079_v5 = vsel %vm1509_vm14, %v3003_v57, %v3078_v33  ;;  %v1630_v62 = vshrl.u32 %v5549_v32, 16  ;;  %v1633_v16 = vshll.u32 %v5549_v32, 16 }
 0x181   : > { %v3086_v29 = vor.u32 %v3084_v21, %v8365_v45  ;;  %v8383_v6 = vsel %vm1647_vm2, %v8320_v13, 0  ;;  %4312 = vmatprep.mubr.bf16.mxu1 %v3079_v5  ;;  %v3070_v21 = vor.u32 %v3068_v50, %v8372_v53  ;;  %v1859_v63 = vsel %vm1090_vm15, %v1854_v7, %v8374_v1 }
 0x182   : > { %v1940_v57 = vrot.slane %v8383_v6, 1  ;;  %v1632_v31 = vrot.slane %v1630_v62, 7  ;;  %v3145_v9 = vshrl.u32 %v1859_v63, 16  ;;  %v3148_v12 = vshll.u32 %v1859_v63, 16 }
 0x183   : > { %v3087_v14 = vsel %vm1509_vm14, %v8307_v54, %v3086_v29  ;;  %v1684_v26 = vsel %vm1229_vm1, %v8376_v44, 0  ;;  %v3071_v54 = vsel %vm1509_vm14, %v8318_v11, %v3070_v21  ;;  %v1247_v35 = vsel %vm1230_vm0, %v8376_v44, 0 }
 0x184   : > { %4474 = vmatmul.mubr.bf16.gmra.mrb[48].mxu0 %v3087_v14  ;;  %v1941_v49 = vsel %vm1920_vm9, %v1938_v22, %v1940_v57  ;;  %v3233_v33 = vshrl.u32 %v1684_v26, 16  ;;  %v3236_v32 = vshll.u32 %v1684_v26, 16  ;;  %v1635_v50 = vor.u32 %v1633_v16, %v1632_v31  ;;  %4313 = vmatmul.mubr.bf16.gmra.mrb[48].mxu1 %v3071_v54  ;;  %v8425_v54 = vld [vmem:[#allocation2 + $0x68] sm:$0xff] }
 0x185   : > { %4481 = vmatprep.mubr.bf16.mxu0 %v3167_v40  ;;  %vm1653_vm2 = vcmp.ne.s16.totalorder %v1632_v31, 0  ;;  %v8397_v7 = vrot.slane %v3145_v9, 7  ;;  %v3153_v29 = vshrl.u32 %v1941_v49, 16  ;;  %v3156_v40 = vshll.u32 %v1941_v49, 16 }
 0x186   : > { %v8399_v5 = vsel %vm1653_vm2, %v1268_v43, 0  ;;  %v8401_v62 = vsel %vm1653_vm2, %v1705_v2, 0  ;;  %v8403_v6 = vsel %vm1653_vm2, %v1758_v41, 0  ;;  %v1636_v11 = vsel %vm1509_vm14, %v8296_v17, %v1635_v50  ;;  %v9871_v2 = vld [vmem:[#allocation12_spill] sm:$0xff]  ;;  %v6473_v17 = vld [vmem:[#allocation2] sm:$0xff] }
 0x187   : > { %9869 = vst [vmem:[#allocation7_spill] sm:$0xff] %v8401_v62  ;;  %9870 = vst [vmem:[#allocation9_spill] sm:$0xff] %v8403_v6  ;;  %vm1652_vm8 = vcmp.ne.s16.totalorder %v1636_v11, 0  ;;  %v3150_v21 = vor.u32 %v3148_v12, %v8397_v7  ;;  %v8411_v63 = vrot.slane %v3153_v29, 7  ;;  %v3235_v43 = vrot.slane %v3233_v33, 7 }
 0x188   : > { %vm1231_vm3 = vcmp.ne.s16.totalorder %v9871_v2, 0  ;;  %v8415_v41 = vsel %vm1652_vm8, %v8252_v20, 0  ;;  %v8418_v31 = vsel %vm1652_vm8, %v8242_v34, 0  ;;  %v8420_v9 = vsel %vm1652_vm8, %v6473_v17, 0 }
 0x189   : > { %9872 = vst [vmem:[#allocation11_spill] sm:$0xff] %v8418_v31  ;;  %9873 = vst [vmem:[#allocation12_spill] sm:$0xff] %v8420_v9  ;;  %v1245_v26 = vsel %vm1228_vm6, %v8286_v51, 0  ;;  %v3151_v50 = vsel %vm1509_vm14, %v8358_v15, %v3150_v21  ;;  %v3158_v29 = vor.u32 %v3156_v40, %v8411_v63  ;;  %v3238_v11 = vor.u32 %v3236_v32, %v3235_v43 }
 0x18a   : > { %4320 = vmatprep.mubr.bf16.mxu1 %v3151_v50  ;;  %v3137_v17 = vshrl.u32 %v1245_v26, 16  ;;  %v3140_v16 = vshll.u32 %v1245_v26, 16  ;;  %v1860_v14 = vshrl.u32 %v8320_v13, 16  ;;  %v1864_v51 = vshll.u32 %v8376_v44, 16 }
 0x18b   : > { %v1665_v22 = vsel %vm1648_vm11, %v8376_v44, 0  ;;  %v1685_v33 = vsel %vm1230_vm0, %v8425_v54, 0  ;;  %v3159_v15 = vsel %vm1509_vm14, %v8365_v45, %v3158_v29  ;;  %v3239_v32 = vsel %vm1509_vm14, %v8356_v42, %v3238_v11 }
 0x18c   : > { %v3139_v40 = vrot.slane %v3137_v17, 7  ;;  %v1942_v21 = vrot.slane %v1665_v22, 1  ;;  %4482 = vmatmul.mubr.bf16.gmra.mrb[52].mxu0 %v3159_v15  ;;  %v1862_v26 = vor.u32 %v1860_v14, %v8374_v1  ;;  %v1866_v50 = vrot.slane %v1864_v51, 1  ;;  %v9874_v17 = vld [vmem:[#allocation16_spill] sm:$0xff] }
 0x18d   : > { %v3305_v49 = vshrl.u32 %v1685_v33, 16  ;;  %v3308_v12 = vshll.u32 %v1685_v33, 16  ;;  %4489 = vmatprep.mubr.bf16.mxu0 %v3239_v32  ;;  %v1246_v6 = vsel %vm1229_vm1, %v8320_v13, 0  ;;  %v1868_v45 = vshrl.u32 %v8376_v44, 16 }
 0x18e   : > { %v3142_v61 = vor.u32 %v3140_v16, %v3139_v40  ;;  %v1943_v9 = vsel %vm1920_vm9, %v1940_v57, %v1942_v21  ;;  %v1867_v42 = vsel %vm1090_vm15, %v1862_v26, %v1866_v50  ;;  %vm1232_vm11 = vcmp.ne.s16.totalorder %v9874_v17, 0 }
 0x18f   : > { %v3225_v29 = vshrl.u32 %v1943_v9, 16  ;;  %v3228_v22 = vshll.u32 %v1943_v9, 16  ;;  %v3307_v11 = vrot.slane %v3305_v49, 7  ;;  %v3217_v14 = vshrl.u32 %v1867_v42, 16 }
 0x190   : > { %v3143_v1 = vsel %vm1509_vm14, %v8372_v53, %v3142_v61  ;;  %v3220_v16 = vshll.u32 %v1867_v42, 16  ;;  %v3209_v33 = vshrl.u32 %v1246_v6, 16  ;;  %v3212_v15 = vshll.u32 %v1246_v6, 16 }
 0x191   : > { %4321 = vmatmul.mubr.bf16.gmra.mrb[52].mxu1 %v3143_v1  ;;  %v3227_v57 = vrot.slane %v3225_v29, 7  ;;  %v3310_v51 = vor.u32 %v3308_v12, %v3307_v11  ;;  %v1870_v13 = vor.u32 %v1868_v45, %v1866_v50  ;;  %v3219_v32 = vrot.slane %v3217_v14, 7 }
 0x192   : > { %v3211_v62 = vrot.slane %v3209_v33, 7  ;;  %v1872_v26 = vshll.u32 %v8425_v54, 16  ;;  %v1666_v9 = vsel %vm1649_vm5, %v8425_v54, 0  ;;  %v1686_v61 = vsel %vm1231_vm3, %v8065_v58, 0 }
 0x193   : > { %v3230_v49 = vor.u32 %v3228_v22, %v3227_v57  ;;  %v3311_v31 = vsel %vm1509_vm14, %v3235_v43, %v3310_v51  ;;  %v1944_v53 = vrot.slane %v1666_v9, 1  ;;  %v3222_v42 = vor.u32 %v3220_v16, %v3219_v32 }
 0x194   : > { %v3214_v12 = vor.u32 %v3212_v15, %v3211_v62  ;;  %v1874_v6 = vrot.slane %v1872_v26, 1  ;;  %v3377_v50 = vshrl.u32 %v1686_v61, 16  ;;  %v3380_v1 = vshll.u32 %v1686_v61, 16 }
 0x195   : > { %v3231_v45 = vsel %vm1509_vm14, %v8411_v63, %v3230_v49  ;;  %v1945_v29 = vsel %vm1920_vm9, %v1942_v21, %v1944_v53  ;;  %v3223_v43 = vsel %vm1509_vm14, %v8397_v7, %v3222_v42  ;;  %vm1233_vm5 = vcmp.ne.s16.totalorder %v7884_v18, 0  ;;  %v8475_v7 = vld [vmem:[#allocation2 + $0x78] sm:$0xff] }
 0x196   : > { %4490 = vmatmul.mubr.bf16.gmra.mrb[56].mxu0 %v3231_v45  ;;  %v3215_v22 = vsel %vm1509_vm14, %v3139_v40, %v3214_v12  ;;  %v1875_v14 = vsel %vm1090_vm15, %v1870_v13, %v1874_v6  ;;  %v3297_v16 = vshrl.u32 %v1945_v29, 16  ;;  %4328 = vmatprep.mubr.bf16.mxu1 %v3223_v43  ;;  %v3300_v51 = vshll.u32 %v1945_v29, 16 }
 0x197   : > { %4497 = vmatprep.mubr.bf16.mxu0 %v3311_v31  ;;  %v3289_v33 = vshrl.u32 %v1875_v14, 16  ;;  %v3292_v63 = vshll.u32 %v1875_v14, 16  ;;  %v3379_v21 = vrot.slane %v3377_v50, 7  ;;  %v3281_v26 = vshrl.u32 %v1247_v35, 16 }
 0x198   : > { %v3299_v15 = vrot.slane %v3297_v16, 7  ;;  %v3284_v44 = vshll.u32 %v1247_v35, 16  ;;  %v1876_v9 = vshrl.u32 %v8425_v54, 16  ;;  %v1880_v13 = vshll.u32 %v8065_v58, 16 }
 0x199   : > { %4329 = vmatmul.mubr.bf16.gmra.mrb[56].mxu1 %v3215_v22  ;;  %v3291_v40 = vrot.slane %v3289_v33, 7  ;;  %v3382_v49 = vor.u32 %v3380_v1, %v3379_v21  ;;  %v1667_v31 = vsel %vm1650_vm12, %v8065_v58, 0  ;;  %v3283_v42 = vrot.slane %v3281_v26, 7 }
 0x19a   : > { %v3302_v61 = vor.u32 %v3300_v51, %v3299_v15  ;;  %v1878_v12 = vor.u32 %v1876_v9, %v1874_v6  ;;  %v1946_v50 = vrot.slane %v1667_v31, 1  ;;  %v1882_v35 = vrot.slane %v1880_v13, 1 }
 0x19b   : > { %v3294_v45 = vor.u32 %v3292_v63, %v3291_v40  ;;  %v3383_v29 = vsel %vm1509_vm14, %v3307_v11, %v3382_v49  ;;  %v1687_v43 = vsel %vm1232_vm11, %v8475_v7, 0  ;;  %v3286_v22 = vor.u32 %v3284_v44, %v3283_v42 }
 0x19c   : > { %v3303_v1 = vsel %vm1509_vm14, %v3227_v57, %v3302_v61  ;;  %v1947_v14 = vsel %vm1920_vm9, %v1944_v53, %v1946_v50  ;;  %v3449_v16 = vshrl.u32 %v1687_v43, 16  ;;  %v1883_v51 = vsel %vm1090_vm15, %v1878_v12, %v1882_v35 }
 0x19d   : > { %v3295_v33 = vsel %vm1509_vm14, %v3219_v32, %v3294_v45  ;;  %v3369_v6 = vshrl.u32 %v1947_v14, 16  ;;  %v3372_v26 = vshll.u32 %v1947_v14, 16  ;;  %v3287_v11 = vsel %vm1509_vm14, %v3211_v62, %v3286_v22 }
 0x19e   : > { %4336 = vmatprep.mubr.bf16.mxu1 %v3295_v33  ;;  %4498 = vmatmul.mubr.bf16.gmra.mrb[60].mxu0 %v3303_v1  ;;  %v3361_v63 = vshrl.u32 %v1883_v51, 16  ;;  %v3364_v9 = vshll.u32 %v1883_v51, 16  ;;  %v3451_v49 = vrot.slane %v3449_v16, 7  ;;  %v3452_v57 = vshll.u32 %v1687_v43, 16 }
 0x19f   : > { %4505 = vmatprep.mubr.bf16.mxu0 %v3383_v29  ;;  %v3371_v13 = vrot.slane %v3369_v6, 7  ;;  %v1248_v53 = vsel %vm1231_vm3, %v8425_v54, 0  ;;  %v1884_v32 = vshrl.u32 %v8065_v58, 16  ;;  %vm1234_vm2 = vcmp.ne.s16.totalorder %v7909_v4, 0 }
 0x1a0   : > { %v3363_v44 = vrot.slane %v3361_v63, 7  ;;  %v3353_v31 = vshrl.u32 %v1248_v53, 16  ;;  %v3356_v61 = vshll.u32 %v1248_v53, 16  ;;  %v1888_v12 = vshll.u32 %v8475_v7, 16 }
 0x1a1   : > { %4337 = vmatmul.mubr.bf16.gmra.mrb[60].mxu1 %v3287_v11  ;;  %v3374_v62 = vor.u32 %v3372_v26, %v3371_v13  ;;  %v3454_v45 = vor.u32 %v3452_v57, %v3451_v49  ;;  %v1886_v1 = vor.u32 %v1884_v32, %v1882_v35  ;;  %v1668_v29 = vsel %vm1651_vm4, %v8475_v7, 0 }
 0x1a2   : > { %v3366_v43 = vor.u32 %v3364_v9, %v3363_v44  ;;  %v3355_v22 = vrot.slane %v3353_v31, 7  ;;  %v1890_v54 = vrot.slane %v1888_v12, 1  ;;  %v1948_v14 = vrot.slane %v1668_v29, 1 }
 0x1a3   : > { %v3375_v16 = vsel %vm1509_vm14, %v3299_v15, %v3374_v62  ;;  %v3455_v33 = vsel %vm1509_vm14, %v3379_v21, %v3454_v45  ;;  %v1688_v51 = vsel %vm1233_vm5, %v8252_v20, 0  ;;  %v1249_v35 = vsel %vm1232_vm11, %v8065_v58, 0 }
 0x1a4   : > { %v3367_v6 = vsel %vm1509_vm14, %v3291_v40, %v3366_v43  ;;  %v3358_v46 = vor.u32 %v3356_v61, %v3355_v22  ;;  %v1891_v26 = vsel %vm1090_vm15, %v1886_v1, %v1890_v54  ;;  %v1949_v11 = vsel %vm1920_vm9, %v1946_v50, %v1948_v14 }
 0x1a5   : > { %4344 = vmatprep.mubr.bf16.mxu1 %v3367_v6  ;;  %v3433_v63 = vshrl.u32 %v1891_v26, 16  ;;  %v3436_v15 = vshll.u32 %v1891_v26, 16  ;;  %v3441_v9 = vshrl.u32 %v1949_v11, 16  ;;  %v3444_v21 = vshll.u32 %v1949_v11, 16 }
 0x1a6   : > { %4506 = vmatmul.mubr.bf16.gmra.mrb[64].mxu0 %v3375_v16  ;;  %v3359_v57 = vsel %vm1509_vm14, %v3283_v42, %v3358_v46  ;;  %v3521_v53 = vshrl.u32 %v1688_v51, 16  ;;  %v3524_v32 = vshll.u32 %v1688_v51, 16  ;;  %v3425_v31 = vshrl.u32 %v1249_v35, 16 }
 0x1a7   : > { %4513 = vmatprep.mubr.bf16.mxu0 %v3455_v33  ;;  %v3435_v58 = vrot.slane %v3433_v63, 7  ;;  %v3443_v12 = vrot.slane %v3441_v9, 7  ;;  %v3428_v40 = vshll.u32 %v1249_v35, 16  ;;  %v1892_v61 = vshrl.u32 %v8475_v7, 16 }
 0x1a8   : > { %v3523_v62 = vrot.slane %v3521_v53, 7  ;;  %v3427_v45 = vrot.slane %v3425_v31, 7  ;;  %v1896_v50 = vshll.u32 %v8252_v20, 16  ;;  %v9875_v1 = vrot.slane %v8415_v41, 1 }
 0x1a9   : > { %4345 = vmatmul.mubr.bf16.gmra.mrb[64].mxu1 %v3359_v57  ;;  %v3438_v43 = vor.u32 %v3436_v15, %v3435_v58  ;;  %v3446_v42 = vor.u32 %v3444_v21, %v3443_v12  ;;  %v1894_v16 = vor.u32 %v1892_v61, %v1890_v54  ;;  %v1689_v9 = vsel %vm1234_vm2, %v8242_v34, 0  ;;  %v1691_v61 = vld [vmem:[#allocation2 + $0x18] sm:$0xff] }
 0x1aa   : > { %v1951_v29 = vsel %vm1920_vm9, %v1948_v14, %v9875_v1  ;;  %v3526_v6 = vor.u32 %v3524_v32, %v3523_v62  ;;  %v3430_v33 = vor.u32 %v3428_v40, %v3427_v45  ;;  %v1898_v46 = vrot.slane %v1896_v50, 1 }
 0x1ab   : > { %v3513_v51 = vshrl.u32 %v1951_v29, 16  ;;  %v3516_v26 = vshll.u32 %v1951_v29, 16  ;;  %v3439_v35 = vsel %vm1509_vm14, %v3363_v44, %v3438_v43  ;;  %v3447_v11 = vsel %vm1509_vm14, %v3371_v13, %v3446_v42 }
 0x1ac   : > { %4352 = vmatprep.mubr.bf16.mxu1 %v3439_v35  ;;  %v3527_v14 = vsel %vm1509_vm14, %v3451_v49, %v3526_v6  ;;  %v3431_v15 = vsel %vm1509_vm14, %v3355_v22, %v3430_v33  ;;  %v1899_v54 = vsel %vm1090_vm15, %v1894_v16, %v1898_v46  ;;  %v3593_v21 = vshrl.u32 %v1689_v9, 16  ;;  %v1690_v35 = vld [vmem:[#allocation2 + $0x10] sm:$0xff] }
 0x1ad   : > { %v3515_v63 = vrot.slane %v3513_v51, 7  ;;  %v3505_v57 = vshrl.u32 %v1899_v54, 16  ;;  %v3508_v53 = vshll.u32 %v1899_v54, 16  ;;  %v3596_v31 = vshll.u32 %v1689_v9, 16 }
 0x1ae   : > { %4514 = vmatmul.mubr.bf16.gmra.mrb[68].mxu0 %v3447_v11  ;;  %v3595_v44 = vrot.slane %v3593_v21, 7  ;;  %v1250_v13 = vsel %vm1233_vm5, %v8475_v7, 0  ;;  %v1900_v34 = vshrl.u32 %v8252_v20, 16  ;;  %v9876_v40 = vrot.slane %v8399_v5, 1  ;;  %v8534_v7 = vld [vmem:[#allocation2 + $0x20] sm:$0xff] }
 0x1af   : > { %v3518_v32 = vor.u32 %v3516_v26, %v3515_v63  ;;  %v9877_v49 = vmov %v9875_v1  ;;  %4521 = vmatprep.mubr.bf16.mxu0 %v3527_v14  ;;  %v3507_v50 = vrot.slane %v3505_v57, 7  ;;  %v3497_v29 = vshrl.u32 %v1250_v13, 16 }
 0x1b0   : > { %v1953_v22 = vsel %vm1920_vm9, %v9877_v49, %v9876_v40  ;;  %v3500_v43 = vshll.u32 %v1250_v13, 16  ;;  %v3598_v42 = vor.u32 %v3596_v31, %v3595_v44  ;;  %v1902_v16 = vor.u32 %v1900_v34, %v1898_v46 }
 0x1b1   : > { %v3519_v1 = vsel %vm1509_vm14, %v3443_v12, %v3518_v32  ;;  %v3585_v51 = vshrl.u32 %v1953_v22, 16  ;;  %v3588_v6 = vshll.u32 %v1953_v22, 16  ;;  %4353 = vmatmul.mubr.bf16.gmra.mrb[68].mxu1 %v3431_v15  ;;  %v3510_v33 = vor.u32 %v3508_v53, %v3507_v50 }
 0x1b2   : > { %v3499_v5 = vrot.slane %v3497_v29, 7  ;;  %v2132_v26 = vshll.u32 %v1691_v61, 16  ;;  %v2135_v41 = vshrl.u32 %v1691_v61, 16  ;;  %v3599_v11 = vsel %vm1509_vm14, %v3523_v62, %v3598_v42 }
 0x1b3   : > { %v3577_v9 = vshrl.u32 %v1902_v16, 16  ;;  %v3580_v14 = vshll.u32 %v1902_v16, 16  ;;  %v3587_v54 = vrot.slane %v3585_v51, 7  ;;  %v3511_v12 = vsel %vm1509_vm14, %v3435_v58, %v3510_v33 }
 0x1b4   : > { %v3502_v21 = vor.u32 %v3500_v43, %v3499_v5  ;;  %v2134_v57 = vrot.slane %v2132_v26, 1  ;;  %v2139_v46 = vshll.u32 %v8534_v7, 16  ;;  %4360 = vmatprep.mubr.bf16.mxu1 %v3511_v12  ;;  %v1251_v15 = vsel %vm1234_vm2, %v8252_v20, 0  ;;  %v1723_v43 = vld [vmem:[#allocation2 + $0x10] sm:$0x80] }
 0x1b5   : > { %v3579_v32 = vrot.slane %v3577_v9, 7  ;;  %v3590_v31 = vor.u32 %v3588_v6, %v3587_v54  ;;  %v1706_v44 = vsel %vm1637_vm7, %v1690_v35, 0  ;;  %v3569_v22 = vshrl.u32 %v1251_v15, 16 }
 0x1b6   : > { %v3503_v62 = vsel %vm1509_vm14, %v3427_v45, %v3502_v21  ;;  %v2137_v13 = vor.u32 %v2135_v41, %v2134_v57  ;;  %v2141_v34 = vrot.slane %v2139_v46, 1  ;;  %v2537_v40 = vshrl.u32 %v2134_v57, 16  ;;  %4522 = vmatmul.mubr.bf16.gmra.mrb[72].mxu0 %v3519_v1 }
 0x1b7   : > { %v3582_v58 = vor.u32 %v3580_v14, %v3579_v32  ;;  %v3591_v49 = vsel %vm1509_vm14, %v3515_v63, %v3590_v31  ;;  %v3572_v29 = vshll.u32 %v1251_v15, 16  ;;  %4529 = vmatprep.mubr.bf16.mxu0 %v3599_v11  ;;  %v1707_v51 = vsel %vm1638_vm10, %v1691_v61, 0  ;;  %v9880_v63 = vld [vmem:[#allocation5_spill] sm:$0xff]  ;;  %v9882_v14 = vld [vmem:[#allocation8_spill] sm:$0xff] }
 0x1b8   : > { %v2142_v42 = vsel %vm1090_vm15, %v2137_v13, %v2141_v34  ;;  %v2539_v16 = vrot.slane %v2537_v40, 7  ;;  %v2098_v6 = vrot.slane %v1706_v44, 1  ;;  %v3571_v41 = vrot.slane %v3569_v22, 7  ;;  %v8560_v40 = vld [vmem:[#allocation2 + $0x28] sm:$0xff] }
 0x1b9   : > { %v3583_v45 = vsel %vm1509_vm14, %v3507_v50, %v3582_v58  ;;  %v2541_v33 = vshrl.u32 %v2142_v42, 16  ;;  %v2544_v26 = vshll.u32 %v2142_v42, 16  ;;  %4361 = vmatmul.mubr.bf16.gmra.mrb[72].mxu1 %v3503_v62  ;;  %v2099_v1 = vrot.slane %v1707_v51, 1  ;;  %v6474_v51 = vld [vmem:[#allocation2 + $0x10] sm:$0xff] }
 0x1ba   : > { %v2513_v35 = vshrl.u32 %v2098_v6, 16  ;;  %vm9881_vm4 = vcmp.ne.s16.totalorder %v9880_v63, 0  ;;  %vm9883_vm8 = vcmp.ne.s16.totalorder %v9882_v14, 0  ;;  %4368 = vmatprep.mubr.bf16.mxu1 %v3583_v45  ;;  %v3574_v12 = vor.u32 %v3572_v29, %v3571_v41 }
 0x1bb   : > { %v1725_v9 = vsel %vm9881_vm4, %v1723_v43, 0  ;;  %v1726_v11 = vsel %vm9883_vm8, %v1691_v61, 0  ;;  %v8554_v54 = vrot.slane %v2541_v33, 7  ;;  %v2100_v50 = vsel %vm1920_vm9, %v2098_v6, %v2099_v1 }
 0x1bc   : > { %v2525_v21 = vshrl.u32 %v1725_v9, 16  ;;  %v2529_v57 = vshrl.u32 %v1726_v11, 16  ;;  %v2515_v46 = vrot.slane %v2513_v35, 7  ;;  %v2532_v32 = vshll.u32 %v1726_v11, 16 }
 0x1bd   : > { %v2143_v31 = vshrl.u32 %v8534_v7, 16  ;;  %v2546_v15 = vor.u32 %v2544_v26, %v8554_v54  ;;  %v3575_v44 = vsel %vm1509_vm14, %v3499_v5, %v3574_v12  ;;  %v2517_v62 = vshrl.u32 %v2100_v50, 16 }
 0x1be   : > { %v2520_v13 = vshll.u32 %v2100_v50, 16  ;;  %v2527_v61 = vrot.slane %v2525_v21, 7  ;;  %v2531_v58 = vrot.slane %v2529_v57, 7  ;;  %v2147_v29 = vshll.u32 %v8560_v40, 16  ;;  %4530 = vmatmul.mubr.bf16.gmra.mrb[76].mxu0 %v3591_v49 }
 0x1bf   : > { %v2145_v22 = vor.u32 %v2143_v31, %v2141_v34  ;;  %v2547_v43 = vsel %vm1509_vm14, %v2539_v16, %v2546_v15  ;;  %v2519_v42 = vrot.slane %v2517_v62, 7  ;;  %v1955_v6 = vshll.u32 %v6474_v51, 16 }
 0x1c0   : > { %v1958_v45 = vshrl.u32 %v6474_v51, 16  ;;  %4731 = vmatprep.mubr.bf16.mxu0 %v2547_v43  ;;  %v2534_v33 = vor.u32 %v2532_v32, %v2531_v58  ;;  %v2149_v26 = vrot.slane %v2147_v29, 1  ;;  %vm9884_vm4 = vcmp.ne.s16.totalorder %v7511_v47, 0 }
 0x1c1   : > { %v1708_v5 = vsel %vm9884_vm4, %v8534_v7, 0  ;;  %v2522_v41 = vor.u32 %v2520_v13, %v2519_v42  ;;  %v1957_v35 = vrot.slane %v1955_v6, 1  ;;  %vm9885_vm8 = vcmp.ne.s16.totalorder %v7479_v24, 0  ;;  %4369 = vmatmul.mubr.bf16.gmra.mrb[76].mxu1 %v3575_v44  ;;  %v8576_v24 = vld [vmem:[#allocation2 + $0x30] sm:$0xff] }
 0x1c2   : > { %v2101_v63 = vrot.slane %v1708_v5, 1  ;;  %v1727_v34 = vsel %vm9885_vm8, %v8534_v7, 0  ;;  %v2535_v49 = vsel %vm1509_vm14, %v2527_v61, %v2534_v33  ;;  %v2150_v16 = vsel %vm1090_vm15, %v2145_v22, %v2149_v26  ;;  %v6475_v5 = vld [vmem:[#allocation2 + $0x18] sm:$0xff] }
 0x1c3   : > { %v2609_v9 = vshrl.u32 %v1727_v34, 16  ;;  %v2612_v14 = vshll.u32 %v1727_v34, 16  ;;  %v2523_v11 = vsel %vm1509_vm14, %v2515_v46, %v2522_v41  ;;  %v2617_v12 = vshrl.u32 %v2150_v16, 16 }
 0x1c4   : > { %v2620_v21 = vshll.u32 %v2150_v16, 16  ;;  %v1960_v57 = vor.u32 %v1958_v45, %v1957_v35  ;;  %4570 = vmatprep.mubr.bf16.mxu1 %v2523_v11  ;;  %v2501_v50 = vshrl.u32 %v1957_v35, 16  ;;  %v2102_v32 = vsel %vm1920_vm9, %v2099_v1, %v2101_v63  ;;  %v6476_v35 = vld [vmem:[#allocation2 + $0x20] sm:$0xff] }
 0x1c5   : > { %v8574_v31 = vrot.slane %v2609_v9, 7  ;;  %v2151_v7 = vshrl.u32 %v8560_v40, 16  ;;  %v8579_v15 = vrot.slane %v2617_v12, 7  ;;  %v2601_v62 = vshrl.u32 %v2102_v32, 16 }
 0x1c6   : > { %v1965_v44 = vsel %vm1090_vm15, %v1960_v57, %v7755_v30  ;;  %v2604_v46 = vshll.u32 %v2102_v32, 16  ;;  %v2503_v13 = vrot.slane %v2501_v50, 7  ;;  %4732 = vmatmul.mubr.bf16.vlgmr.msra.gmra.mrb[80].mxu0 %v2535_v49  ;;  %v2155_v6 = vshll.u32 %v8576_v24, 16  ;;  %v6439_v32 = vld [vmem:[%s9681_s3 + $0x208] sm:$0xff]  }
 0x1c7   : > { %v2505_v61 = vshrl.u32 %v1965_v44, 16  ;;  %v2508_v22 = vshll.u32 %v1965_v44, 16  ;;  %v2614_v29 = vor.u32 %v2612_v14, %v8574_v31  ;;  %v2622_v1 = vor.u32 %v2620_v21, %v8579_v15 }
 0x1c8   : > { %v8585_v43 = vrot.slane %v2601_v62, 7  ;;  %v2153_v51 = vor.u32 %v2151_v7, %v2149_v26  ;;  %v1966_v41 = vshrl.u32 %v6475_v5, 16  ;;  %v1970_v34 = vshll.u32 %v6476_v35, 16 }
 0x1c9   : > { %v2507_v45 = vrot.slane %v2505_v61, 7  ;;  %v2615_v33 = vsel %vm1509_vm14, %v2531_v58, %v2614_v29  ;;  %v2623_v16 = vsel %vm1509_vm14, %v8554_v54, %v2622_v1  ;;  %v2157_v49 = vrot.slane %v2155_v6, 1 }
 0x1ca   : > { %v2606_v9 = vor.u32 %v2604_v46, %v8585_v43  ;;  %vm9886_vm4 = vcmp.ne.s16.totalorder %v7526_v25, 0  ;;  %4739 = vmatprep.mubr.bf16.mxu0 %v2623_v16  ;;  %v1968_v11 = vor.u32 %v1966_v41, %v7755_v30  ;;  %v1972_v58 = vrot.slane %v1970_v34, 1  ;;  %v6440_v34 = vld [vmem:[%s9681_s3 + $0x210] sm:$0xff]  }
 0x1cb   : > { %v8595_v14 = vsel %vm9886_vm4, %v8560_v40, 0  ;;  %v2510_v26 = vor.u32 %v2508_v22, %v2507_v45  ;;  %v2158_v57 = vsel %vm1090_vm15, %v2153_v51, %v2157_v49  ;;  %vm9887_vm8 = vcmp.ne.s16.totalorder %v7489_v8, 0  ;;  %v6477_v8 = vld [vmem:[%s9681_s3 + $0x200] sm:$0xff]   ;;  %v8616_v51 = vld [vmem:[#allocation2 + $0x38] sm:$0xff] }
 0x1cc   : > { %v2103_v12 = vrot.slane %v8595_v14, 1  ;;  %v2607_v21 = vsel %vm1509_vm14, %v2519_v42, %v2606_v9  ;;  %v1728_v54 = vsel %vm9887_vm8, %v8560_v40, 0  ;;  %v2159_v50 = vshrl.u32 %v8576_v24, 16 }
 0x1cd   : > { %v2511_v7 = vsel %vm1509_vm14, %v2503_v13, %v2510_v26  ;;  %v2689_v30 = vshrl.u32 %v2158_v57, 16  ;;  %v2692_v44 = vshll.u32 %v2158_v57, 16  ;;  %v1973_v62 = vsel %vm1090_vm15, %v1968_v11, %v1972_v58  ;;  %v6478_v26 = vld [vmem:[#allocation2 + $0x28] sm:$0xff] }
 0x1ce   : > { %4571 = vmatmul.mubr.bf16.vlgmr.msra.gmra.mrb[80].mxu1 %v2511_v7  ;;  %v2593_v42 = vshrl.u32 %v1973_v62, 16  ;;  %v2596_v46 = vshll.u32 %v1973_v62, 16  ;;  %v2104_v61 = vsel %vm1920_vm9, %v2101_v63, %v2103_v12  ;;  %v2681_v22 = vshrl.u32 %v1728_v54, 16  ;;  %4740 = vmatmul.mubr.bf16.gmra.mrb[84].mxu0 %v2615_v33 }
 0x1cf   : > { %6205 = vmatpush3.bf16.msra.mxu1 %v6477_v8  ;;  %4578 = vmatprep.mubr.bf16.mxu1 %v2607_v21  ;;  %v8614_v40 = vrot.slane %v2689_v30, 7  ;;  %v2673_v29 = vshrl.u32 %v2104_v61, 16  ;;  %v2676_v13 = vshll.u32 %v2104_v61, 16  ;;  %v2684_v1 = vshll.u32 %v1728_v54, 16 }
 0x1d0   : > { %v8618_v6 = vrot.slane %v2593_v42, 7  ;;  %v8620_v5 = vrot.slane %v2681_v22, 7  ;;  %v2161_v63 = vor.u32 %v2159_v50, %v2157_v49  ;;  %v2163_v41 = vshll.u32 %v8616_v51, 16  ;;  %6206 = vmatprep.subr.bf16.mxu1 %v6439_v32 }
 0x1d1   : > { %v2694_v16 = vor.u32 %v2692_v44, %v8614_v40  ;;  %v8627_v9 = vrot.slane %v2673_v29, 7  ;;  %v1974_v14 = vshrl.u32 %v6476_v35, 16  ;;  %v1978_v11 = vshll.u32 %v6478_v26, 16 }
 0x1d2   : > { %v2598_v33 = vor.u32 %v2596_v46, %v8618_v6  ;;  %v2686_v21 = vor.u32 %v2684_v1, %v8620_v5  ;;  %v2165_v57 = vrot.slane %v2163_v41, 1  ;;  %vm9888_vm4 = vcmp.ne.s16.totalorder %v7529_v36, 0 }
 0x1d3   : > { %v8634_v49 = vsel %vm9888_vm4, %v8576_v24, 0  ;;  %v2695_v54 = vsel %vm1509_vm14, %v8579_v15, %v2694_v16  ;;  %v2678_v50 = vor.u32 %v2676_v13, %v8627_v9  ;;  %v1976_v7 = vor.u32 %v1974_v14, %v1972_v58  ;;  %6207 = vmatpush3.bf16.msra.mxu1 %v6439_v32  ;;  %v6441_v15 = vld [vmem:[%s9681_s3 + $0x218] sm:$0xff]  }
 0x1d4   : > { %v1980_v30 = vrot.slane %v1978_v11, 1  ;;  %4747 = vmatprep.mubr.bf16.mxu0 %v2695_v54  ;;  %v2599_v35 = vsel %vm1509_vm14, %v2507_v45, %v2598_v33  ;;  %v2687_v44 = vsel %vm1509_vm14, %v8574_v31, %v2686_v21  ;;  %v2166_v62 = vsel %vm1090_vm15, %v2161_v63, %v2165_v57  ;;  %6208 = vmatprep.subr.bf16.mxu1 %v6440_v34  ;;  %v8650_v45 = vld [vmem:[#allocation2 + $0x40] sm:$0xff] }
 0x1d5   : > { %v2105_v42 = vrot.slane %v8634_v49, 1  ;;  %v2679_v58 = vsel %vm1509_vm14, %v8585_v43, %v2678_v50  ;;  %v2761_v46 = vshrl.u32 %v2166_v62, 16  ;;  %v2764_v32 = vshll.u32 %v2166_v62, 16 }
 0x1d6   : > { %v1981_v61 = vsel %vm1090_vm15, %v1976_v7, %v1980_v30  ;;  %4579 = vmatmul.mubr.bf16.gmra.mrb[84].mxu1 %v2599_v35  ;;  %vm9889_vm8 = vcmp.ne.s16.totalorder %v7492_v37, 0  ;;  %4748 = vmatmul.mubr.bf16.gmra.mrb[88].mxu0 %v2687_v44  ;;  %v2167_v14 = vshrl.u32 %v8616_v51, 16  ;;  %v2171_v11 = vshll.u32 %v8650_v45, 16  ;;  %v6442_v37 = vld [vmem:[%s9681_s3 + $0x220] sm:$0xff]   ;;  %v6479_v7 = vld [vmem:[#allocation2 + $0x30] sm:$0xff] }
 0x1d7   : > { %v2665_v31 = vshrl.u32 %v1981_v61, 16  ;;  %v2668_v22 = vshll.u32 %v1981_v61, 16  ;;  %v2106_v8 = vsel %vm1920_vm9, %v2103_v12, %v2105_v42  ;;  %v1729_v29 = vsel %vm9889_vm8, %v8576_v24, 0  ;;  %4586 = vmatprep.mubr.bf16.mxu1 %v2679_v58  ;;  %6209 = vmatpush3.bf16.msra.mxu1 %v6440_v34 }
 0x1d8   : > { %v8658_v13 = vrot.slane %v2761_v46, 7  ;;  %v2745_v43 = vshrl.u32 %v2106_v8, 16  ;;  %v2748_v1 = vshll.u32 %v2106_v8, 16  ;;  %v2753_v63 = vshrl.u32 %v1729_v29, 16  ;;  %6210 = vmatprep.subr.bf16.mxu1 %v6441_v15 }
 0x1d9   : > { %v8660_v41 = vrot.slane %v2665_v31, 7  ;;  %v2756_v16 = vshll.u32 %v1729_v29, 16  ;;  %v1982_v34 = vshrl.u32 %v6478_v26, 16  ;;  %v2169_v54 = vor.u32 %v2167_v14, %v2165_v57 }
 0x1da   : > { %v2766_v24 = vor.u32 %v2764_v32, %v8658_v13  ;;  %v8668_v12 = vrot.slane %v2745_v43, 7  ;;  %v8670_v33 = vrot.slane %v2753_v63, 7  ;;  %v2173_v50 = vrot.slane %v2171_v11, 1 }
 0x1db   : > { %v2670_v21 = vor.u32 %v2668_v22, %v8660_v41  ;;  %v1986_v35 = vshll.u32 %v6479_v7, 16  ;;  %v1984_v46 = vor.u32 %v1982_v34, %v1980_v30  ;;  %6211 = vmatpush3.bf16.msra.mxu1 %v6441_v15  ;;  %vm9890_vm4 = vcmp.ne.s16.totalorder %v7542_v3, 0 }
 0x1dc   : > { %v2767_v44 = vsel %vm1509_vm14, %v8614_v40, %v2766_v24  ;;  %v2750_v62 = vor.u32 %v2748_v1, %v8668_v12  ;;  %v2758_v58 = vor.u32 %v2756_v16, %v8670_v33  ;;  %v2174_v26 = vsel %vm1090_vm15, %v2169_v54, %v2173_v50  ;;  %6212 = vmatprep.subr.bf16.mxu1 %v6442_v37  ;;  %v6443_v40 = vld [vmem:[%s9681_s3 + $0x228] sm:$0xff]  }
 0x1dd   : > { %4755 = vmatprep.mubr.bf16.mxu0 %v2767_v44  ;;  %v2671_v32 = vsel %vm1509_vm14, %v8618_v6, %v2670_v21  ;;  %v1988_v61 = vrot.slane %v1986_v35, 1  ;;  %v8683_v57 = vsel %vm9890_vm4, %v8616_v51, 0  ;;  %v2833_v6 = vshrl.u32 %v2174_v26, 16  ;;  %v8703_v24 = vld [vmem:[#allocation2 + $0x48] sm:$0xff] }
 0x1de   : > { %v2751_v30 = vsel %vm1509_vm14, %v8627_v9, %v2750_v62  ;;  %v2759_v15 = vsel %vm1509_vm14, %v8620_v5, %v2758_v58  ;;  %v2836_v31 = vshll.u32 %v2174_v26, 16  ;;  %4587 = vmatmul.mubr.bf16.gmra.mrb[88].mxu1 %v2671_v32  ;;  %v2107_v8 = vrot.slane %v8683_v57, 1 }
 0x1df   : > { %v1989_v22 = vsel %vm1090_vm15, %v1984_v46, %v1988_v61  ;;  %vm9891_vm8 = vcmp.ne.s16.totalorder %v7507_v59, 0  ;;  %v2175_v43 = vshrl.u32 %v8650_v45, 16  ;;  %4594 = vmatprep.mubr.bf16.mxu1 %v2751_v30  ;;  %v8698_v1 = vrot.slane %v2833_v6, 7  ;;  %6213 = vmatpush3.bf16.msra.mxu1 %v6442_v37 }
 0x1e0   : > { %v1730_v29 = vsel %vm9891_vm8, %v8616_v51, 0  ;;  %v2737_v9 = vshrl.u32 %v1989_v22, 16  ;;  %v2740_v63 = vshll.u32 %v1989_v22, 16  ;;  %4756 = vmatmul.mubr.bf16.gmra.mrb[92].mxu0 %v2759_v15  ;;  %v2108_v5 = vsel %vm1920_vm9, %v2105_v42, %v2107_v8  ;;  %6214 = vmatprep.subr.bf16.mxu1 %v6443_v40  ;;  %v6444_v51 = vld [vmem:[%s9681_s3 + $0x230] sm:$0xff]   ;;  %v6445_v22 = vld [vmem:[%s9681_s3 + $0x238] sm:$0xff]  }
 0x1e1   : > { %v2825_v16 = vshrl.u32 %v1730_v29, 16  ;;  %v2828_v14 = vshll.u32 %v1730_v29, 16  ;;  %v2177_v11 = vor.u32 %v2175_v43, %v2173_v50  ;;  %v2179_v59 = vshll.u32 %v8703_v24, 16  ;;  %v6481_v50 = vld [vmem:[#allocation2 + $0x38] sm:$0xff] }
 0x1e2   : > { %v2838_v34 = vor.u32 %v2836_v31, %v8698_v1  ;;  %v2739_v21 = vrot.slane %v2737_v9, 7  ;;  %v2817_v37 = vshrl.u32 %v2108_v5, 16  ;;  %v2820_v54 = vshll.u32 %v2108_v5, 16 }
 0x1e3   : > { %v8710_v35 = vrot.slane %v2825_v16, 7  ;;  %v8712_v49 = vrot.slane %v2179_v59, 1  ;;  %v1990_v42 = vshrl.u32 %v6479_v7, 16  ;;  %v1994_v44 = vshll.u32 %v6481_v50, 16  ;;  %6215 = vmatpush3.bf16.msra.mxu1 %v6443_v40 }
 0x1e4   : > { %v2839_v62 = vsel %vm1509_vm14, %v8658_v13, %v2838_v34  ;;  %v2742_v58 = vor.u32 %v2740_v63, %v2739_v21  ;;  %v2819_v46 = vrot.slane %v2817_v37, 7  ;;  %vm9892_vm4 = vcmp.ne.s16.totalorder %v9843_v39, 0  ;;  %6216 = vmatprep.subr.bf16.mxu1 %v6444_v51 }
 0x1e5   : > { %v1712_v32 = vsel %vm9892_vm4, %v8650_v45, 0  ;;  %4763 = vmatprep.mubr.bf16.mxu0 %v2839_v62  ;;  %v2830_v26 = vor.u32 %v2828_v14, %v8710_v35  ;;  %v2182_v57 = vsel %vm1090_vm15, %v2177_v11, %v8712_v49  ;;  %v1992_v30 = vor.u32 %v1990_v42, %v1988_v61 }
 0x1e6   : > { %v1996_v7 = vrot.slane %v1994_v44, 1  ;;  %v2743_v15 = vsel %vm1509_vm14, %v8660_v41, %v2742_v58  ;;  %v2822_v13 = vor.u32 %v2820_v54, %v2819_v46  ;;  %v2905_v6 = vshrl.u32 %v2182_v57, 16  ;;  %v8743_v54 = vld [vmem:[#allocation2 + $0x50] sm:$0xff]  ;;  %v6483_v58 = vld [vmem:[#allocation2 + $0x40] sm:$0xff] }
 0x1e7   : > { %v2908_v31 = vshll.u32 %v2182_v57, 16  ;;  %4595 = vmatmul.mubr.bf16.gmra.mrb[92].mxu1 %v2743_v15  ;;  %v2831_v40 = vsel %vm1509_vm14, %v8670_v33, %v2830_v26  ;;  %v2109_v43 = vrot.slane %v1712_v32, 1  ;;  %vm9893_vm8 = vcmp.ne.s16.totalorder %v7073_v38, 0 }
 0x1e8   : > { %v1997_v29 = vsel %vm1090_vm15, %v1992_v30, %v1996_v7  ;;  %v1731_v61 = vsel %vm9893_vm8, %v8650_v45, 0  ;;  %v2823_v41 = vsel %vm1509_vm14, %v8668_v12, %v2822_v13  ;;  %v8735_v9 = vrot.slane %v2905_v6, 7  ;;  %6217 = vmatpush3.bf16.msra.mxu1 %v6444_v51  ;;  %4764 = vmatmul.mubr.bf16.gmra.mrb[96].mxu0 %v2831_v40 }
 0x1e9   : > { %v2809_v63 = vshrl.u32 %v1997_v29, 16  ;;  %v2812_v16 = vshll.u32 %v1997_v29, 16  ;;  %4602 = vmatprep.mubr.bf16.mxu1 %v2823_v41  ;;  %v2110_v5 = vsel %vm1920_vm9, %v2107_v8, %v2109_v43  ;;  %v2897_v33 = vshrl.u32 %v1731_v61, 16  ;;  %6218 = vmatprep.subr.bf16.mxu1 %v6445_v22 }
 0x1ea   : > { %v2900_v14 = vshll.u32 %v1731_v61, 16  ;;  %v2183_v11 = vshrl.u32 %v8703_v24, 16  ;;  %v2910_v59 = vor.u32 %v2908_v31, %v8735_v9  ;;  %v2889_v45 = vshrl.u32 %v2110_v5, 16 }
 0x1eb   : > { %v2811_v38 = vrot.slane %v2809_v63, 7  ;;  %v2892_v34 = vshll.u32 %v2110_v5, 16  ;;  %v2899_v12 = vrot.slane %v2897_v33, 7  ;;  %v2187_v51 = vshll.u32 %v8743_v54, 16 }
 0x1ec   : > { %v8741_v37 = vor.u32 %v2183_v11, %v8712_v49  ;;  %v1998_v42 = vshrl.u32 %v6481_v50, 16  ;;  %v2911_v8 = vsel %vm1509_vm14, %v8698_v1, %v2910_v59  ;;  %v2891_v62 = vrot.slane %v2889_v45, 7  ;;  %6219 = vmatpush3.bf16.msra.mxu1 %v6445_v22  ;;  %v6484_v11 = vld [vmem:[#allocation2 + $0x58] sm:$0xff] }
 0x1ed   : > { %v2814_v44 = vor.u32 %v2812_v16, %v2811_v38  ;;  %v2002_v32 = vshll.u32 %v6483_v58, 16  ;;  %4771 = vmatprep.mubr.bf16.mxu0 %v2911_v8  ;;  %v2902_v26 = vor.u32 %v2900_v14, %v2899_v12  ;;  %v2189_v57 = vrot.slane %v2187_v51, 1 }
 0x1ee   : > { %v2000_v30 = vor.u32 %v1998_v42, %v1996_v7  ;;  %v2111_v15 = vrot.slane %v7819_v52, 1  ;;  %v2894_v6 = vor.u32 %v2892_v34, %v2891_v62  ;;  %vm9894_vm4 = vcmp.ne.s16.totalorder %v9845_v56, 0 }
 0x1ef   : > { %v2815_v13 = vsel %vm1509_vm14, %v2739_v21, %v2814_v44  ;;  %v2004_v31 = vrot.slane %v2002_v32, 1  ;;  %v1732_v50 = vsel %vm9894_vm4, %v8703_v24, 0  ;;  %v2903_v1 = vsel %vm1509_vm14, %v8710_v35, %v2902_v26 }
 0x1f0   : > { %4603 = vmatmul.mubr.bf16.gmra.mrb[96].mxu1 %v2815_v13  ;;  %v2190_v22 = vsel %vm1090_vm15, %v8741_v37, %v2189_v57  ;;  %v2112_v40 = vsel %vm1920_vm9, %v2109_v43, %v2111_v15  ;;  %v2969_v7 = vshrl.u32 %v1732_v50, 16  ;;  %v2895_v52 = vsel %vm1509_vm14, %v2819_v46, %v2894_v6  ;;  %4772 = vmatmul.mubr.bf16.gmra.mrb[100].mxu0 %v2903_v1 }
 0x1f1   : > { %v2977_v29 = vshrl.u32 %v2190_v22, 16  ;;  %v2980_v21 = vshll.u32 %v2190_v22, 16  ;;  %v2005_v61 = vsel %vm1090_vm15, %v2000_v30, %v2004_v31  ;;  %4610 = vmatprep.mubr.bf16.mxu1 %v2895_v52  ;;  %v2961_v41 = vshrl.u32 %v2112_v40, 16 }
 0x1f2   : > { %v2881_v56 = vshrl.u32 %v2005_v61, 16  ;;  %v2884_v24 = vshll.u32 %v2005_v61, 16  ;;  %v2964_v63 = vshll.u32 %v2112_v40, 16  ;;  %v8760_v35 = vrot.slane %v2969_v7, 7  ;;  %v8775_v40 = vpop.f32.mrb[16].mxu0 }
 0x1f3   : > { %v2979_v16 = vrot.slane %v2977_v29, 7  ;;  %v2972_v5 = vshll.u32 %v1732_v50, 16  ;;  %v2191_v33 = vshrl.u32 %v8743_v54, 16  ;;  %v2963_v14 = vrot.slane %v2961_v41, 7 }
 0x1f4   : > { %v2883_v43 = vrot.slane %v2881_v56, 7  ;;  %v2195_v46 = vshll.u32 %v6484_v11, 16  ;;  %v2006_v59 = vshrl.u32 %v6483_v58, 16  ;;  %v9895_v42 = vrot.slane %v7811_v0, 1 }
 0x1f5   : > { %v2982_v45 = vor.u32 %v2980_v21, %v2979_v16  ;;  %v2974_v34 = vor.u32 %v2972_v5, %v8760_v35  ;;  %v2193_v51 = vor.u32 %v2191_v33, %v2189_v57  ;;  %v2966_v32 = vor.u32 %v2964_v63, %v2963_v14  ;;  %v8784_v21 = vld [vmem:[#allocation2 + $0x60] sm:$0xff] }
 0x1f6   : > { %v2114_v8 = vsel %vm1920_vm9, %v2111_v15, %v9895_v42  ;;  %v2886_v44 = vor.u32 %v2884_v24, %v2883_v43  ;;  %v2197_v26 = vrot.slane %v2195_v46, 1  ;;  %v2008_v30 = vor.u32 %v2006_v59, %v2004_v31 }
 0x1f7   : > { %v2983_v13 = vsel %vm1509_vm14, %v8735_v9, %v2982_v45  ;;  %v2975_v6 = vsel %vm1509_vm14, %v2899_v12, %v2974_v34  ;;  %v3033_v50 = vshrl.u32 %v2114_v8, 16  ;;  %v3036_v1 = vshll.u32 %v2114_v8, 16  ;;  %v8777_v12 = vpop.f32.mrb[17].mxu0  ;;  %v6486_v45 = vld [vmem:[#allocation2 + $0x50] sm:$0xff] }
 0x1f8   : > { %4779 = vmatprep.mubr.bf16.mxu0 %v2983_v13  ;;  %v2887_v58 = vsel %vm1509_vm14, %v2811_v38, %v2886_v44  ;;  %v2967_v57 = vsel %vm1509_vm14, %v2891_v62, %v2966_v32  ;;  %v2198_v22 = vsel %vm1090_vm15, %v2193_v51, %v2197_v26  ;;  %v2013_v15 = vsel %vm1090_vm15, %v2008_v30, %v8712_v49  ;;  %v8787_v61 = vpop.f32.mrb[18].mxu0 }
 0x1f9   : > { %4611 = vmatmul.mubr.bf16.gmra.mrb[100].mxu1 %v2887_v58  ;;  %v3049_v31 = vshrl.u32 %v2198_v22, 16  ;;  %v3052_v7 = vshll.u32 %v2198_v22, 16  ;;  %v2953_v9 = vshrl.u32 %v2013_v15, 16  ;;  %v2956_v52 = vshll.u32 %v2013_v15, 16  ;;  %4780 = vmatmul.mubr.bf16.gmra.mrb[104].mxu0 %v2975_v6  ;;  %v8789_v5 = vpop.f32.mrb[19].mxu0  ;;  %v8808_v22 = vpop.f32.mrb[16].mxu1 }
 0x1fa   : > { %4618 = vmatprep.mubr.bf16.mxu1 %v2967_v57  ;;  %v8779_v29 = vrot.slane %v3033_v50, 7  ;;  %vm9896_vm8 = vcmp.ne.s16.totalorder %v9850_v23, 0  ;;  %v2199_v62 = vshrl.u32 %v6484_v11, 16  ;;  %v2203_v49 = vshll.u32 %v8784_v21, 16 }
 0x1fb   : > { %v1733_v38 = vsel %vm9896_vm8, %v8743_v54, 0  ;;  %v3051_v56 = vrot.slane %v3049_v31, 7  ;;  %v2955_v24 = vrot.slane %v2953_v9, 7  ;;  %v2018_v23 = vshll.u32 %v6486_v45, 16 }
 0x1fc   : > { %v3041_v41 = vshrl.u32 %v1733_v38, 16  ;;  %v3044_v63 = vshll.u32 %v1733_v38, 16  ;;  %v3038_v33 = vor.u32 %v3036_v1, %v8779_v29  ;;  %v2201_v46 = vor.u32 %v2199_v62, %v2197_v26  ;;  %v8818_v38 = vld [vmem:[#allocation2 + $0x68] sm:$0xff] }
 0x1fd   : > { %v2205_v59 = vrot.slane %v2203_v49, 1  ;;  %v3054_v54 = vor.u32 %v3052_v7, %v3051_v56  ;;  %v2958_v34 = vor.u32 %v2956_v52, %v2955_v24  ;;  %v2115_v42 = vrot.slane %v7991_v10, 1  ;;  %v8812_v7 = vpop.f32.mrb[17].mxu1 }
 0x1fe   : > { %v3043_v51 = vrot.slane %v3041_v41, 7  ;;  %v3039_v8 = vsel %vm1509_vm14, %v2963_v14, %v3038_v33  ;;  %v2020_v32 = vrot.slane %v2018_v23, 1  ;;  %v1734_v30 = vsel %vm1227_vm13, %v6484_v11, 0  ;;  %v8821_v49 = vpop.f32.mrb[18].mxu1 }
 0x1ff   : > { %v2206_v44 = vsel %vm1090_vm15, %v2201_v46, %v2205_v59  ;;  %v3055_v13 = vsel %vm1509_vm14, %v2979_v16, %v3054_v54  ;;  %v2959_v26 = vsel %vm1509_vm14, %v2883_v43, %v2958_v34  ;;  %v9897_v10 = vrot.slane %v7811_v0, 1  ;;  %v6488_v46 = vld [vmem:[#allocation2 + $0x58] sm:$0xff]  ;;  %v8826_v54 = vpop.f32.mrb[19].mxu1 }
 0x200   : > { %v3046_v6 = vor.u32 %v3044_v63, %v3043_v51  ;;  %v3121_v50 = vshrl.u32 %v2206_v44, 16  ;;  %4787 = vmatprep.mubr.bf16.mxu0 %v3055_v13  ;;  %v3124_v1 = vshll.u32 %v2206_v44, 16  ;;  %v2021_v58 = vsel %vm1090_vm15, %v8741_v37, %v2020_v32 }
 0x201   : > { %v2116_v14 = vsel %vm1920_vm9, %v9897_v10, %v2115_v42  ;;  %v3113_v57 = vshrl.u32 %v1734_v30, 16  ;;  %4619 = vmatmul.mubr.bf16.gmra.mrb[104].mxu1 %v2959_v26  ;;  %v3025_v16 = vshrl.u32 %v2021_v58, 16  ;;  %v3028_v43 = vshll.u32 %v2021_v58, 16 }
 0x202   : > { %v3047_v55 = vsel %vm1509_vm14, %v8760_v35, %v3046_v6  ;;  %v8806_v11 = vrot.slane %v3121_v50, 7  ;;  %4626 = vmatprep.mubr.bf16.mxu1 %v3039_v8  ;;  %v3105_v15 = vshrl.u32 %v2116_v14, 16  ;;  %v3108_v31 = vshll.u32 %v2116_v14, 16 }
 0x203   : > { %4788 = vmatmul.mubr.bf16.gmra.mrb[108].mxu0 %v3047_v55  ;;  %v8810_v37 = vrot.slane %v3113_v57, 7  ;;  %v3116_v0 = vshll.u32 %v1734_v30, 16  ;;  %v8815_v52 = vrot.slane %v3025_v16, 7  ;;  %v2207_v35 = vshrl.u32 %v8784_v21, 16 }
 0x204   : > { %v3126_v9 = vor.u32 %v3124_v1, %v8806_v11  ;;  %v2211_v62 = vshll.u32 %v8818_v38, 16  ;;  %v8823_v41 = vrot.slane %v3105_v15, 7  ;;  %v2022_v33 = vshrl.u32 %v6486_v45, 16 }
 0x205   : > { %v3118_v63 = vor.u32 %v3116_v0, %v8810_v37  ;;  %v2026_v23 = vshll.u32 %v6488_v46, 16  ;;  %v3030_v8 = vor.u32 %v3028_v43, %v8815_v52  ;;  %v2209_v44 = vor.u32 %v2207_v35, %v2205_v59 }
 0x206   : > { %v3127_v34 = vsel %vm1509_vm14, %v3051_v56, %v3126_v9  ;;  %v2213_v30 = vrot.slane %v2211_v62, 1  ;;  %v3110_v13 = vor.u32 %v3108_v31, %v8823_v41  ;;  %v2024_v6 = vor.u32 %v2022_v33, %v2020_v32  ;;  %v8849_v31 = vld [vmem:[#allocation2 + $0x70] sm:$0xff]  ;;  %v8852_v9 = vpop.f32.mrb[20].mxu0 }
 0x207   : > { %4795 = vmatprep.mubr.bf16.mxu0 %v3127_v34  ;;  %v3119_v26 = vsel %vm1509_vm14, %v3043_v51, %v3118_v63  ;;  %v2028_v50 = vrot.slane %v2026_v23, 1  ;;  %v3031_v1 = vsel %vm1509_vm14, %v2955_v24, %v3030_v8  ;;  %v2117_v58 = vrot.slane %v8056_v48, 1  ;;  %v6490_v63 = vld [vmem:[#allocation2 + $0x60] sm:$0xff]  ;;  %v8857_v23 = vpop.f32.mrb[21].mxu0 }
 0x208   : > { %v2214_v45 = vsel %vm1090_vm15, %v2209_v44, %v2213_v30  ;;  %v1735_v56 = vsel %vm1228_vm6, %v8784_v21, 0  ;;  %v3111_v59 = vsel %vm1509_vm14, %v8779_v29, %v3110_v13  ;;  %v2215_v15 = vshrl.u32 %v8818_v38, 16 }
 0x209   : > { %v3193_v10 = vshrl.u32 %v2214_v45, 16  ;;  %v3196_v14 = vshll.u32 %v2214_v45, 16  ;;  %v2029_v57 = vsel %vm1090_vm15, %v2024_v6, %v2028_v50  ;;  %4627 = vmatmul.mubr.bf16.gmra.mrb[108].mxu1 %v3031_v1  ;;  %v2118_v24 = vsel %vm1920_vm9, %v2115_v42, %v2117_v58  ;;  %v8865_v6 = vpop.f32.mrb[22].mxu0 }
 0x20a   : > { %v3097_v51 = vshrl.u32 %v2029_v57, 16  ;;  %v3100_v32 = vshll.u32 %v2029_v57, 16  ;;  %v3185_v55 = vshrl.u32 %v1735_v56, 16  ;;  %4634 = vmatprep.mubr.bf16.mxu1 %v3111_v59  ;;  %v3177_v16 = vshrl.u32 %v2118_v24, 16 }
 0x20b   : > { %4796 = vmatmul.mubr.bf16.gmra.mrb[112].mxu0 %v3119_v26  ;;  %v8842_v48 = vrot.slane %v3193_v10, 7  ;;  %v3180_v60 = vshll.u32 %v2118_v24, 16  ;;  %v3188_v21 = vshll.u32 %v1735_v56, 16  ;;  %v2219_v0 = vshll.u32 %v8849_v31, 16  ;;  %v8863_v26 = vpop.f32.mrb[20].mxu1  ;;  %v8872_v10 = vpop.f32.mrb[23].mxu0 }
 0x20c   : > { %v8844_v43 = vrot.slane %v3097_v51, 7  ;;  %v8846_v29 = vrot.slane %v3185_v55, 7  ;;  %v8855_v35 = vrot.slane %v3177_v16, 7  ;;  %v2030_v62 = vshrl.u32 %v6488_v46, 16  ;;  %v8870_v59 = vpop.f32.mrb[21].mxu1  ;;  %v9898_v51 = vld [vmem:[#allocation14_spill] sm:$0xff] }
 0x20d   : > { %v3198_v42 = vor.u32 %v3196_v14, %v8842_v48  ;;  %v2034_v33 = vshll.u32 %v6490_v63, 16  ;;  %v2217_v44 = vor.u32 %v2215_v15, %v2213_v30  ;;  %v8861_v13 = vrot.slane %v2219_v0, 1 }
 0x20e   : > { %v3102_v34 = vor.u32 %v3100_v32, %v8844_v43  ;;  %v3190_v8 = vor.u32 %v3188_v21, %v8846_v29  ;;  %v3182_v46 = vor.u32 %v3180_v60, %v8855_v35  ;;  %v2032_v45 = vor.u32 %v2030_v62, %v2028_v50  ;;  %v8881_v32 = vpop.f32.mrb[22].mxu1 }
 0x20f   : > { %v3199_v1 = vsel %vm1509_vm14, %v8806_v11, %v3198_v42  ;;  %v2036_v56 = vrot.slane %v2034_v33, 1  ;;  %v2222_v57 = vsel %vm1090_vm15, %v2217_v44, %v8861_v13  ;;  %v2119_v11 = vrot.slane %v9898_v51, 1  ;;  %v8886_v60 = vpop.f32.mrb[23].mxu1  ;;  %v8897_v44 = vld [vmem:[#allocation2 + $0x78] sm:$0xff] }
 0x210   : > { %4803 = vmatprep.mubr.bf16.mxu0 %v3199_v1  ;;  %v3103_v30 = vsel %vm1509_vm14, %v8815_v52, %v3102_v34  ;;  %v3191_v14 = vsel %vm1509_vm14, %v8810_v37, %v3190_v8  ;;  %v3183_v50 = vsel %vm1509_vm14, %v8823_v41, %v3182_v46  ;;  %v3265_v24 = vshrl.u32 %v2222_v57, 16 }
 0x211   : > { %v3268_v55 = vshll.u32 %v2222_v57, 16  ;;  %v2037_v16 = vsel %vm1090_vm15, %v2032_v45, %v2036_v56  ;;  %4635 = vmatmul.mubr.bf16.gmra.mrb[112].mxu1 %v3103_v30  ;;  %v2120_v37 = vsel %vm1920_vm9, %v2117_v58, %v2119_v11  ;;  %v1736_v15 = vsel %vm1229_vm1, %v8818_v38, 0  ;;  %v8909_v57 = vld [vmem:[#allocation2 + $0x68] sm:$0xff] }
 0x212   : > { %v3169_v52 = vshrl.u32 %v2037_v16, 16  ;;  %v3172_v21 = vshll.u32 %v2037_v16, 16  ;;  %4642 = vmatprep.mubr.bf16.mxu1 %v3183_v50  ;;  %v8892_v0 = vrot.slane %v3265_v24, 7  ;;  %v3249_v41 = vshrl.u32 %v2120_v37, 16  ;;  %v8912_v50 = vpop.f32.mrb[24].mxu0 }
 0x213   : > { %4804 = vmatmul.mubr.bf16.gmra.mrb[116].mxu0 %v3191_v14  ;;  %v3252_v42 = vshll.u32 %v2120_v37, 16  ;;  %v3257_v62 = vshrl.u32 %v1736_v15, 16  ;;  %v3260_v34 = vshll.u32 %v1736_v15, 16  ;;  %v2223_v8 = vshrl.u32 %v8849_v31, 16 }
 0x214   : > { %v8894_v33 = vrot.slane %v3169_v52, 7  ;;  %v2227_v58 = vshll.u32 %v8897_v44, 16  ;;  %v3270_v1 = vor.u32 %v3268_v55, %v8892_v0  ;;  %v8901_v27 = vrot.slane %v3249_v41, 7  ;;  %v8918_v52 = vpop.f32.mrb[25].mxu0  ;;  %v9899_v41 = vld [vmem:[#allocation3_spill] sm:$0xff] }
 0x215   : > { %v8903_v38 = vrot.slane %v3257_v62, 7  ;;  %v2038_v46 = vshrl.u32 %v6490_v63, 16  ;;  %v8907_v30 = vor.u32 %v2223_v8, %v8861_v13  ;;  %v2042_v51 = vshll.u32 %v8909_v57, 16  ;;  %v8925_v8 = vpop.f32.mrb[26].mxu0 }
 0x216   : > { %v3174_v45 = vor.u32 %v3172_v21, %v8894_v33  ;;  %v2229_v14 = vrot.slane %v2227_v58, 1  ;;  %v3271_v24 = vsel %vm1509_vm14, %v8842_v48, %v3270_v1  ;;  %v3254_v55 = vor.u32 %v3252_v42, %v8901_v27  ;;  %v8936_v58 = vpop.f32.mrb[24].mxu1  ;;  %v8938_v1 = vpop.f32.mrb[27].mxu0 }
 0x217   : > { %v3262_v16 = vor.u32 %v3260_v34, %v8903_v38  ;;  %v2040_v63 = vor.u32 %v2038_v46, %v2036_v56  ;;  %4811 = vmatprep.mubr.bf16.mxu0 %v3271_v24  ;;  %v2044_v15 = vrot.slane %v2042_v51, 1  ;;  %v2121_v62 = vrot.slane %v9899_v41, 1  ;;  %v8948_v51 = vpop.f32.mrb[25].mxu1 }
 0x218   : > { %v3175_v21 = vsel %vm1509_vm14, %v8844_v43, %v3174_v45  ;;  %v2230_v37 = vsel %vm1090_vm15, %v8907_v30, %v2229_v14  ;;  %v3255_v48 = vsel %vm1509_vm14, %v8855_v35, %v3254_v55  ;;  %v8934_v43 = vld [vmem:[%s9682_s4] ss:$0 sm:$0xff]  ;;  %v8944_v35 = vadd.f32 %v8777_v12, %v8775_v40 }
 0x219   : > { %v3263_v56 = vsel %vm1509_vm14, %v8846_v29, %v3262_v16  ;;  %v3337_v42 = vshrl.u32 %v2230_v37, 16  ;;  %v3340_v34 = vshll.u32 %v2230_v37, 16  ;;  %4643 = vmatmul.mubr.bf16.gmra.mrb[116].mxu1 %v3175_v21  ;;  %v2045_v46 = vsel %vm1090_vm15, %v2040_v63, %v2044_v15  ;;  %v8952_v37 = vpop.f32.mrb[26].mxu1 }
 0x21a   : > { %v2122_v45 = vsel %vm1920_vm9, %v2119_v11, %v2121_v62  ;;  %v5678_v29 = vadd.f32 %v8812_v7, %v8808_v22  ;;  %4650 = vmatprep.mubr.bf16.mxu1 %v3255_v48  ;;  %v3241_v55 = vshrl.u32 %v2045_v46, 16  ;;  %v3244_v16 = vshll.u32 %v2045_v46, 16  ;;  %v8963_v22 = vpop.f32.mrb[27].mxu1 }
 0x21b   : > { %4812 = vmatmul.mubr.bf16.gmra.mrb[120].mxu0 %v3263_v56  ;;  %v8950_v24 = vrot.slane %v3337_v42, 7  ;;  %v3321_v21 = vshrl.u32 %v2122_v45, 16  ;;  %v3324_v63 = vshll.u32 %v2122_v45, 16  ;;  %v8959_v40 = vadd.f32 %v8789_v5, %v8787_v61  ;;  %v8978_v45 = vld [vmem:[#allocation2 + $0x80] sm:$0xff] }
 0x21c   : > { %v8955_v11 = vadd.f32 %v5678_v29, %v8934_v43  ;;  %v5681_v12 = vadd.f32 %v8826_v54, %v8821_v49  ;;  %v8966_v41 = vrot.slane %v3241_v55, 7  ;;  %v1737_v56 = vsel %vm1230_vm0, %v8849_v31, 0 }
 0x21d   : > { %v3342_v7 = vor.u32 %v3340_v34, %v8950_v24  ;;  %v3323_v48 = vrot.slane %v3321_v21, 7  ;;  %v3329_v46 = vshrl.u32 %v1737_v56, 16  ;;  %v3332_v61 = vshll.u32 %v1737_v56, 16  ;;  %v9900_v21 = vld [vmem:[#allocation18_spill] sm:$0xff] }
 0x21e   : > { %v8972_v42 = vadd.f32 %v5681_v12, %v8934_v43  ;;  %v2231_v5 = vshrl.u32 %v8897_v44, 16  ;;  %v3246_v54 = vor.u32 %v3244_v16, %v8966_v41  ;;  %v2235_v29 = vshll.u32 %v8978_v45, 16 }
 0x21f   : > { %v3343_v49 = vsel %vm1509_vm14, %v8892_v0, %v3342_v7  ;;  %v3326_v34 = vor.u32 %v3324_v63, %v3323_v48  ;;  %v8981_v19 = vrot.slane %v3329_v46, 7  ;;  %v2046_v55 = vshrl.u32 %v8909_v57, 16 }
 0x220   : > { %4819 = vmatprep.mubr.bf16.mxu0 %v3343_v49  ;;  %v2233_v31 = vor.u32 %v2231_v5, %v2229_v14  ;;  %v2123_v12 = vrot.slane %v9900_v21, 1  ;;  %v3247_v56 = vsel %vm1509_vm14, %v8894_v33, %v3246_v54  ;;  %v8989_v16 = vrot.slane %v2235_v29, 1 }
 0x221   : > { %v3327_v0 = vsel %vm1509_vm14, %v8901_v27, %v3326_v34  ;;  %v8993_v63 = vadd.f32 %v8857_v23, %v8852_v9  ;;  %4651 = vmatmul.mubr.bf16.gmra.mrb[120].mxu1 %v3247_v56  ;;  %v3334_v7 = vor.u32 %v3332_v61, %v8981_v19  ;;  %v2048_v14 = vor.u32 %v2046_v55, %v2044_v15  ;;  %v9014_v34 = vpop.f32.mrb[28].mxu0 }
 0x222   : > { %v2124_v57 = vsel %vm1920_vm9, %v2121_v62, %v2123_v12  ;;  %v5684_v46 = vadd.f32 %v8870_v59, %v8863_v26  ;;  %4658 = vmatprep.mubr.bf16.mxu1 %v3327_v0  ;;  %v2238_v33 = vsel %vm1090_vm15, %v2233_v31, %v8989_v16  ;;  %v9003_v49 = vadd.f32 %v8872_v10, %v8865_v6  ;;  %v9026_v31 = vpop.f32.mrb[29].mxu0 }
 0x223   : > { %v3393_v27 = vshrl.u32 %v2124_v57, 16  ;;  %v3396_v5 = vshll.u32 %v2124_v57, 16  ;;  %v3335_v9 = vsel %vm1509_vm14, %v8903_v38, %v3334_v7  ;;  %v3409_v23 = vshrl.u32 %v2238_v33, 16  ;;  %v9031_v7 = vpop.f32.mrb[28].mxu1 }
 0x224   : > { %9901 = vst [vmem:[#allocation16_spill] sm:$0xff] %v9003_v49  ;;  %v3412_v15 = vshll.u32 %v2238_v33, 16  ;;  %v2053_v62 = vsel %vm1090_vm15, %v2048_v14, %v8861_v13  ;;  %4820 = vmatmul.mubr.bf16.gmra.mrb[124].mxu0 %v3335_v9  ;;  %v9012_v54 = vadd.f32 %v5684_v46, %v8934_v43  ;;  %v5687_v10 = vadd.f32 %v8886_v60, %v8881_v32  ;;  %v9023_v13 = vld [vmem:[#allocation2 + $0x88] sm:$0xff]  ;;  %v9033_v14 = vpop.f32.mrb[30].mxu0  ;;  %v9040_v57 = vpop.f32.mrb[29].mxu1  ;;  %v6495_v9 = vld [vmem:[#allocation2 + $0x78] sm:$0xff] }
 0x225   : > { %v3313_v26 = vshrl.u32 %v2053_v62, 16  ;;  %v3316_v59 = vshll.u32 %v2053_v62, 16  ;;  %v9009_v61 = vrot.slane %v3393_v27, 7  ;;  %v9016_v6 = vrot.slane %v3409_v23, 7  ;;  %v9042_v46 = vpop.f32.mrb[31].mxu0  ;;  %v9048_v62 = vpop.f32.mrb[30].mxu1 }
 0x226   : > { %v1738_v38 = vsel %vm1231_vm3, %v8897_v44, 0  ;;  %v2074_v29 = vshll.u32 %v9023_v13, 16  ;;  %v9037_v2 = vadd.f32 %v5687_v10, %v8934_v43  ;;  %v2239_v44 = vshrl.u32 %v8978_v45, 16  ;;  %v9902_v10 = vld [vmem:[#allocation19_spill] sm:$0xff] }
 0x227   : > { %v9028_v55 = vrot.slane %v3313_v26, 7  ;;  %v3398_v21 = vor.u32 %v3396_v5, %v9009_v61  ;;  %v3401_v56 = vshrl.u32 %v1738_v38, 16  ;;  %v3404_v0 = vshll.u32 %v1738_v38, 16 }
 0x228   : > { %v3414_v32 = vor.u32 %v3412_v15, %v9016_v6  ;;  %v2076_v60 = vrot.slane %v2074_v29, 1  ;;  %v2058_v23 = vshll.u32 %v6495_v9, 16  ;;  %v2241_v26 = vor.u32 %v2239_v44, %v8989_v16 }
 0x229   : > { %v3318_v33 = vor.u32 %v3316_v59, %v9028_v55  ;;  %v3399_v27 = vsel %vm1509_vm14, %v3323_v48, %v3398_v21  ;;  %v9046_v5 = vrot.slane %v3401_v56, 7  ;;  %v2125_v38 = vrot.slane %v9902_v10, 1  ;;  %v9058_v59 = vpop.f32.mrb[31].mxu1 }
 0x22a   : > { %v3415_v15 = vsel %vm1509_vm14, %v8950_v24, %v3414_v32  ;;  %v9056_v29 = vadd.f32 %v8918_v52, %v8912_v50  ;;  %v2060_v56 = vrot.slane %v2058_v23, 1  ;;  %v5690_v24 = vadd.f32 %v8948_v51, %v8936_v58 }
 0x22b   : > { %4827 = vmatprep.mubr.bf16.mxu0 %v3415_v15  ;;  %v3319_v48 = vsel %vm1509_vm14, %v8966_v41, %v3318_v33  ;;  %v3406_v21 = vor.u32 %v3404_v0, %v9046_v5  ;;  %v2242_v32 = vsel %vm1090_vm15, %v2241_v26, %v2076_v60  ;;  %v2126_v44 = vsel %vm1920_vm9, %v2123_v12, %v2125_v38 }
 0x22c   : > { %9903 = vst [vmem:[#allocation10_spill] sm:$0xff] %v9056_v29  ;;  %4659 = vmatmul.mubr.bf16.gmra.mrb[124].mxu1 %v3319_v48  ;;  %v9069_v50 = vadd.f32 %v8938_v1, %v8925_v8  ;;  %v5693_v52 = vadd.f32 %v8963_v22, %v8952_v37  ;;  %v3481_v0 = vshrl.u32 %v2242_v32, 16  ;;  %v3484_v33 = vshll.u32 %v2242_v32, 16  ;;  %v9088_v22 = vpop.f32.mrb[32].mxu0 }
 0x22d   : > { %4666 = vmatprep.mubr.bf16.mxu1 %v3399_v27  ;;  %v3407_v41 = vsel %vm1509_vm14, %v8981_v19, %v3406_v21  ;;  %v2061_v58 = vsel %vm1090_vm15, %v8907_v30, %v2060_v56  ;;  %v3465_v12 = vshrl.u32 %v2126_v44, 16  ;;  %v3468_v15 = vshll.u32 %v2126_v44, 16  ;;  %v9092_v48 = vpop.f32.mrb[33].mxu0  ;;  %v6446_v21 = vld [vmem:[%s9683_s5] sm:$0xff]  }
 0x22e   : > { %9904 = vst [vmem:[#allocation13_spill] sm:$0xff] %v9069_v50  ;;  %4828 = vmatmul.mubr.bf16.gmra.mrb[128].mxu0 %v3407_v41  ;;  %v3385_v51 = vshrl.u32 %v2061_v58, 16  ;;  %v3388_v23 = vshll.u32 %v2061_v58, 16  ;;  %v9077_v26 = vrot.slane %v3481_v0, 7  ;;  %v9080_v8 = vadd.f32 %v5690_v24, %v8934_v43  ;;  %v9099_v44 = vld [vmem:[#allocation2] sm:$0xff]  ;;  %v5700_v50 = vpop.f32.mrb[32].mxu1  ;;  %6252 = vmatprep.subr.bf16.mxu0 %v6446_v21 }
 0x22f   : > { %v9083_v1 = vadd.f32 %v5693_v52, %v8934_v43  ;;  %v1739_v37 = vsel %vm1232_vm11, %v8978_v45, 0  ;;  %v3467_v19 = vrot.slane %v3465_v12, 7  ;;  %v2078_v32 = vshrl.u32 %v9023_v13, 16  ;;  %v9102_v52 = vpop.f32.mrb[34].mxu0  ;;  %v5701_v49 = vpop.f32.mrb[33].mxu1  ;;  %6253 = vmatpush3.bf16.msra.mxu0 %v6446_v21 }
 0x230   : > { %9905 = vst [vmem:[#allocation5_spill] sm:$0xff] %v9080_v8  ;;  %v9090_v30 = vrot.slane %v3385_v51, 7  ;;  %v3473_v27 = vshrl.u32 %v1739_v37, 16  ;;  %v3476_v10 = vshll.u32 %v1739_v37, 16  ;;  %v3486_v24 = vor.u32 %v3484_v33, %v9077_v26  ;;  %v9907_v51 = vld [vmem:[#allocation11_spill] sm:$0xff]  ;;  %v9110_v33 = vpop.f32.mrb[35].mxu0 }
 0x231   : > { %9906 = vst [vmem:[#allocation8_spill] sm:$0xff] %v9083_v1  ;;  %v2244_v17 = vshll.u32 %v9099_v44, 16  ;;  %v2062_v45 = vshrl.u32 %v6495_v9, 16  ;;  %v3470_v0 = vor.u32 %v3468_v15, %v3467_v19  ;;  %v9908_v12 = vrot.slane %v9907_v51, 1 }
 0x232   : > { %v3390_v41 = vor.u32 %v3388_v23, %v9090_v30  ;;  %v9105_v58 = vrot.slane %v3473_v27, 7  ;;  %v3487_v1 = vsel %vm1509_vm14, %v9016_v6, %v3486_v24  ;;  %v9114_v29 = vor.u32 %v2078_v32, %v2076_v60 }
 0x233   : > { %v2128_v37 = vsel %vm1920_vm9, %v2125_v38, %v9908_v12  ;;  %v2246_v9 = vrot.slane %v2244_v17, 1  ;;  %v2064_v8 = vor.u32 %v2062_v45, %v2060_v56  ;;  %4835 = vmatprep.mubr.bf16.mxu0 %v3487_v1  ;;  %v3471_v38 = vsel %vm1509_vm14, %v9009_v61, %v3470_v0  ;;  %v5703_v12 = vpop.f32.mrb[34].mxu1 }
 0x234   : > { %v3391_v23 = vsel %vm1509_vm14, %v9028_v55, %v3390_v41  ;;  %v3478_v15 = vor.u32 %v3476_v10, %v9105_v58  ;;  %v3537_v27 = vshrl.u32 %v2128_v37, 16  ;;  %v3540_v56 = vshll.u32 %v2128_v37, 16  ;;  %v5704_v55 = vpop.f32.mrb[35].mxu1 }
 0x235   : > { %4667 = vmatmul.mubr.bf16.gmra.mrb[128].mxu1 %v3391_v23  ;;  %v2247_v6 = vsel %vm1090_vm15, %v9114_v29, %v2246_v9  ;;  %v2069_v60 = vsel %vm1090_vm15, %v2064_v8, %v8989_v16  ;;  %v9127_v1 = vadd.f32 %v9026_v31, %v9014_v34  ;;  %v5696_v41 = vadd.f32 %v9040_v57, %v9031_v7 }
 0x236   : > { %4674 = vmatprep.mubr.bf16.mxu1 %v3471_v38  ;;  %v3479_v61 = vsel %vm1509_vm14, %v9046_v5, %v3478_v15  ;;  %v3553_v10 = vshrl.u32 %v2247_v6, 16  ;;  %v3556_v21 = vshll.u32 %v2247_v6, 16  ;;  %v3457_v32 = vshrl.u32 %v2069_v60, 16  ;;  %v5818_v15 = vpop.f32.mrb[36].mxu0 }
 0x237   : > { %4836 = vmatmul.mubr.bf16.gmra.mrb[132].mxu0 %v3479_v61  ;;  %v3460_v17 = vshll.u32 %v2069_v60, 16  ;;  %v3539_v45 = vrot.slane %v3537_v27, 7  ;;  %v9135_v16 = vadd.f32 %v9042_v46, %v9033_v14  ;;  %v5699_v8 = vadd.f32 %v9058_v59, %v9048_v62  ;;  %v5706_v62 = vpop.f32.mrb[36].mxu1  ;;  %v9909_v27 = vld [vmem:[#allocation7_spill] sm:$0xff]  ;;  %v5819_v61 = vpop.f32.mrb[37].mxu0 }
 0x238   : > { %v9137_v34 = vrot.slane %v3553_v10, 7  ;;  %v3459_v31 = vrot.slane %v3457_v32, 7  ;;  %v1740_v5 = vsel %vm1233_vm5, %v9023_v13, 0  ;;  %v9145_v37 = vadd.f32 %v5696_v41, %v8934_v43  ;;  %v5707_v10 = vpop.f32.mrb[37].mxu1  ;;  %v5821_v41 = vpop.f32.mrb[38].mxu0 }
 0x239   : > { %v3542_v0 = vor.u32 %v3540_v56, %v3539_v45  ;;  %v3545_v23 = vshrl.u32 %v1740_v5, 16  ;;  %v3548_v7 = vshll.u32 %v1740_v5, 16  ;;  %v9149_v46 = vadd.f32 %v5699_v8, %v8934_v43  ;;  %v5709_v8 = vpop.f32.mrb[38].mxu1 }
 0x23a   : > { %v3558_v57 = vor.u32 %v3556_v21, %v9137_v34  ;;  %v3462_v14 = vor.u32 %v3460_v17, %v3459_v31  ;;  %v2248_v38 = vshrl.u32 %v9099_v44, 16  ;;  %v3535_v13 = vsel %vm1509_vm14, %v3459_v31, %v3486_v24 }
 0x23b   : > { %v3543_v59 = vsel %vm1509_vm14, %v3467_v19, %v3542_v0  ;;  %v9153_v18 = vrot.slane %v3545_v23, 7  ;;  %v9910_v6 = vrot.slane %v9909_v27, 1  ;;  %v9911_v60 = vrot.slane %v9907_v51, 1  ;;  %v5822_v0 = vpop.f32.mrb[39].mxu0  ;;  %v5710_v23 = vpop.f32.mrb[39].mxu1 }
 0x23c   : > { %v3559_v21 = vsel %vm1509_vm14, %v9077_v26, %v3558_v57  ;;  %v3463_v32 = vsel %vm1509_vm14, %v9090_v30, %v3462_v14  ;;  %v2250_v17 = vor.u32 %v2248_v38, %v2246_v9  ;;  %v9168_v51 = vadd.f32 %v9092_v48, %v9088_v22  ;;  %v1742_v14 = vld [vmem:[#allocation2 + $0x18] sm:$0xff] }
 0x23d   : > { %v2130_v56 = vsel %vm1920_vm9, %v9911_v60, %v9910_v6  ;;  %4843 = vmatprep.mubr.bf16.mxu0 %v3559_v21  ;;  %4675 = vmatmul.mubr.bf16.gmra.mrb[132].mxu1 %v3463_v32  ;;  %v3550_v24 = vor.u32 %v3548_v7, %v9153_v18  ;;  %v5702_v5 = vadd.f32 %v5701_v49, %v5700_v50  ;;  %v1741_v49 = vsel %vm1234_vm2, %v9099_v44, 0  ;;  %v1743_v50 = vld [vmem:[#allocation2 + $0x20] sm:$0xff] }
 0x23e   : > { %v3609_v19 = vshrl.u32 %v2130_v56, 16  ;;  %v3612_v31 = vshll.u32 %v2130_v56, 16  ;;  %4682 = vmatprep.mubr.bf16.mxu1 %v3543_v59  ;;  %v3625_v57 = vshrl.u32 %v2250_v17, 16  ;;  %v3628_v27 = vshll.u32 %v2250_v17, 16 }
 0x23f   : > { %v9172_v9 = vadd.f32 %v9110_v33, %v9102_v52  ;;  %v3551_v7 = vsel %vm1509_vm14, %v9105_v58, %v3550_v24  ;;  %v9177_v38 = vadd.f32 %v5702_v5, %v8934_v43  ;;  %v5705_v22 = vadd.f32 %v5704_v55, %v5703_v12  ;;  %v6447_v52 = vld [vmem:[%s9683_s5 + $0x8] sm:$0xff]  }
 0x240   : > { %v3611_v30 = vrot.slane %v3609_v19, 7  ;;  %4844 = vmatmul.mubr.bf16.gmra.mrb[136].mxu0 %v3551_v7  ;;  %v3627_v48 = vrot.slane %v3625_v57, 7  ;;  %v3617_v6 = vshrl.u32 %v1741_v49, 16  ;;  %v3620_v60 = vshll.u32 %v1741_v49, 16  ;;  %6254 = vmatprep.subr.bf16.mxu0 %v6447_v52  ;;  %v1744_v57 = vld [vmem:[#allocation2 + $0x28] sm:$0xff]  ;;  %v1746_v7 = vld [vmem:[#allocation2 + $0x38] sm:$0xff] }
 0x241   : > { %v9186_v58 = vadd.f32 %v5705_v22, %v8934_v43  ;;  %v3601_v33 = vshrl.u32 %v9114_v29, 16  ;;  %v3604_v12 = vshll.u32 %v9114_v29, 16  ;;  %v1759_v4 = vsel %vm1637_vm7, %v1742_v14, 0  ;;  %6255 = vmatpush3.bf16.msra.mxu0 %v6447_v52  ;;  %v1745_v14 = vld [vmem:[#allocation2 + $0x30] sm:$0xff]  ;;  %v1748_v22 = vld [vmem:[#allocation2 + $0x48] sm:$0xff] }
 0x242   : > { %v3614_v59 = vor.u32 %v3612_v31, %v3611_v30  ;;  %v3630_v44 = vor.u32 %v3628_v27, %v3627_v48  ;;  %v3619_v56 = vrot.slane %v3617_v6, 7  ;;  %v1760_v21 = vsel %vm1638_vm10, %v1743_v50, 0 }
 0x243   : > { %v3603_v32 = vrot.slane %v3601_v33, 7  ;;  %v2268_v17 = vrot.slane %v1759_v4, 1  ;;  %v2269_v19 = vrot.slane %v1760_v21, 1  ;;  %v9195_v24 = vadd.f32 %v5819_v61, %v5818_v15 }
 0x244   : > { %v3615_v55 = vsel %vm1509_vm14, %v3539_v45, %v3614_v59  ;;  %v3631_v29 = vsel %vm1509_vm14, %v9137_v34, %v3630_v44  ;;  %v3622_v31 = vor.u32 %v3620_v60, %v3619_v56  ;;  %v5708_v53 = vadd.f32 %v5707_v10, %v5706_v62  ;;  %v1747_v10 = vld [vmem:[#allocation2 + $0x40] sm:$0xff]  ;;  %v5712_v4 = vpop.f32.mrb[40].mxu1 }
 0x245   : > { %v9199_v5 = vadd.f32 %v5822_v0, %v5821_v41  ;;  %4851 = vmatprep.mubr.bf16.mxu0 %v3631_v29  ;;  %4683 = vmatmul.mubr.bf16.gmra.mrb[136].mxu1 %v3535_v13  ;;  %v3606_v45 = vor.u32 %v3604_v12, %v3603_v32  ;;  %v2270_v20 = vsel %vm1920_vm9, %v2268_v17, %v2269_v19  ;;  %v2549_v27 = vshrl.u32 %v2268_v17, 16  ;;  %v5713_v32 = vpop.f32.mrb[41].mxu1 }
 0x246   : > { %v5711_v30 = vadd.f32 %v5710_v23, %v5709_v8  ;;  %4690 = vmatprep.mubr.bf16.mxu1 %v3615_v55  ;;  %v3623_v15 = vsel %vm1509_vm14, %v9153_v18, %v3622_v31  ;;  %v2553_v61 = vshrl.u32 %v2270_v20, 16  ;;  %v2556_v34 = vshll.u32 %v2270_v20, 16  ;;  %v5824_v23 = vpop.f32.mrb[40].mxu0 }
 0x247   : > { %v9205_v62 = vadd.f32 %v5708_v53, %v8934_v43  ;;  %v3607_v13 = vsel %vm1509_vm14, %v9077_v26, %v3606_v45  ;;  %v2551_v41 = vrot.slane %v2549_v27, 7  ;;  %vm9912_vm15 = vcmp.ne.s16.totalorder %v7511_v47, 0  ;;  %v5825_v48 = vpop.f32.mrb[41].mxu0 }
 0x248   : > { %v9210_v0 = vadd.f32 %v5711_v30, %v8934_v43  ;;  %v1761_v8 = vsel %vm9912_vm15, %v1744_v57, 0  ;;  %4852 = vmatmul.mubr.bf16.gmra.mrb[140].mxu0 %v3623_v15  ;;  %v2555_v18 = vrot.slane %v2553_v61, 7  ;;  %vm9913_vm7 = vcmp.ne.s16.totalorder %v7526_v25, 0  ;;  %v5827_v60 = vpop.f32.mrb[42].mxu0  ;;  %v5715_v57 = vpop.f32.mrb[42].mxu1 }
 0x249   : > { %v2271_v49 = vrot.slane %v1761_v8, 1  ;;  %v1762_v50 = vsel %vm9913_vm7, %v1745_v14, 0  ;;  %vm9914_vm10 = vcmp.ne.s16.totalorder %v7529_v36, 0  ;;  %v9218_v6 = vadd.f32 %v5825_v48, %v5824_v23  ;;  %v5828_v44 = vpop.f32.mrb[43].mxu0  ;;  %v5716_v45 = vpop.f32.mrb[43].mxu1 }
 0x24a   : > { %v1763_v59 = vsel %vm9914_vm10, %v1746_v7, 0  ;;  %v2273_v26 = vrot.slane %v1762_v50, 1  ;;  %vm9915_vm13 = vcmp.ne.s16.totalorder %v7542_v3, 0  ;;  %v2558_v33 = vor.u32 %v2556_v34, %v2555_v18 }
 0x24b   : > { %v2275_v52 = vrot.slane %v1763_v59, 1  ;;  %v1764_v47 = vsel %vm9915_vm13, %v1747_v10, 0  ;;  %v2272_v12 = vsel %vm1920_vm9, %v2269_v19, %v2271_v49  ;;  %vm9916_vm6 = vcmp.ne.s16.totalorder %v9843_v39, 0  ;;  %v5830_v10 = vpop.f32.mrb[44].mxu0 }
 0x24c   : > { %v2277_v55 = vrot.slane %v1764_v47, 1  ;;  %v1765_v25 = vsel %vm9916_vm6, %v1748_v22, 0  ;;  %v2625_v56 = vshrl.u32 %v2272_v12, 16  ;;  %v2628_v36 = vshll.u32 %v2272_v12, 16  ;;  %v6448_v47 = vld [vmem:[%s9683_s5 + $0x10] sm:$0xff]  }
 0x24d   : > { %v2274_v21 = vsel %vm1920_vm9, %v2271_v49, %v2273_v26  ;;  %v9226_v17 = vadd.f32 %v5828_v44, %v5827_v60  ;;  %v2559_v29 = vsel %vm1509_vm14, %v2551_v41, %v2558_v33  ;;  %v5714_v53 = vadd.f32 %v5713_v32, %v5712_v4  ;;  %4691 = vmatmul.mubr.bf16.gmra.mrb[140].mxu1 %v3607_v13  ;;  %v5831_v49 = vpop.f32.mrb[45].mxu0  ;;  %v5718_v4 = vpop.f32.mrb[44].mxu1 }
 0x24e   : > { %v2697_v3 = vshrl.u32 %v2274_v21, 16  ;;  %v2700_v31 = vshll.u32 %v2274_v21, 16  ;;  %v2627_v19 = vrot.slane %v2625_v56, 7  ;;  %v2276_v20 = vsel %vm1920_vm9, %v2273_v26, %v2275_v52  ;;  %6220 = vmatprep.mubr.bf16.mxu1 %v2559_v29  ;;  %v5833_v60 = vpop.f32.mrb[46].mxu0  ;;  %v9917_v56 = vld [vmem:[#allocation20_spill] sm:$0xff]  ;;  %v5719_v21 = vpop.f32.mrb[45].mxu1  ;;  %6256 = vmatprep.subr.bf16.mxu0 %v6448_v47 }
 0x24f   : > { %v2278_v39 = vsel %vm1920_vm9, %v2275_v52, %v2277_v55  ;;  %v2279_v27 = vrot.slane %v1765_v25, 1  ;;  %v9232_v14 = vadd.f32 %v5714_v53, %v8934_v43  ;;  %v5717_v7 = vadd.f32 %v5716_v45, %v5715_v57  ;;  %v5834_v44 = vpop.f32.mrb[47].mxu0  ;;  %v9918_v29 = vld [vmem:[#allocation22_spill] sm:$0xff]  ;;  %v5721_v57 = vpop.f32.mrb[46].mxu1  ;;  %v9919_v45 = vld [vmem:[#allocation21_spill] sm:$0xff]  ;;  %6257 = vmatpush3.bf16.msra.mxu0 %v6448_v47 }
 0x250   : > { %v2699_v30 = vrot.slane %v2697_v3, 7  ;;  %v2769_v15 = vshrl.u32 %v2276_v20, 16  ;;  %v2630_v61 = vor.u32 %v2628_v36, %v2627_v19  ;;  %v2772_v34 = vshll.u32 %v2276_v20, 16 }
 0x251   : > { %v2841_v41 = vshrl.u32 %v2278_v39, 16  ;;  %v2844_v8 = vshll.u32 %v2278_v39, 16  ;;  %v9235_v23 = vadd.f32 %v5717_v7, %v8934_v43  ;;  %v2280_v50 = vsel %vm1920_vm9, %v2277_v55, %v2279_v27 }
 0x252   : > { %v2702_v13 = vor.u32 %v2700_v31, %v2699_v30  ;;  %v2771_v22 = vrot.slane %v2769_v15, 7  ;;  %v2631_v48 = vsel %vm1509_vm14, %v2555_v18, %v2630_v61  ;;  %v9239_v26 = vadd.f32 %v5831_v49, %v5830_v10  ;;  %v5722_v15 = vpop.f32.mrb[47].mxu1 }
 0x253   : > { %v2843_v59 = vrot.slane %v2841_v41, 7  ;;  %v2913_v52 = vshrl.u32 %v2280_v50, 16  ;;  %v2916_v25 = vshll.u32 %v2280_v50, 16  ;;  %v2281_v36 = vrot.slane %v9917_v56, 1  ;;  %v9923_v56 = vld [vmem:[#allocation17_spill] sm:$0xff] }
 0x254   : > { %v2703_v33 = vsel %vm1509_vm14, %v2627_v19, %v2702_v13  ;;  %v2774_v12 = vor.u32 %v2772_v34, %v2771_v22  ;;  %v9246_v18 = vadd.f32 %v5834_v44, %v5833_v60  ;;  %v2285_v3 = vrot.slane %v9918_v29, 1 }
 0x255   : > { %v2846_v55 = vor.u32 %v2844_v8, %v2843_v59  ;;  %v2915_v32 = vrot.slane %v2913_v52, 7  ;;  %v5720_v53 = vadd.f32 %v5719_v21, %v5718_v4  ;;  %v2282_v19 = vsel %vm1920_vm9, %v2279_v27, %v2281_v36  ;;  %6221 = vmatmul.mubr.bf16.vlgmr.msra.gmra.mrb[144].mxu1 %v2631_v48  ;;  %v1755_v4 = vld [vmem:[#allocation2 + $0x80] sm:$0xff] }
 0x256   : > { %v2775_v31 = vsel %vm1509_vm14, %v2699_v30, %v2774_v12  ;;  %v9920_v20 = vrot.slane %v9919_v45, 1  ;;  %v2985_v34 = vshrl.u32 %v2282_v19, 16  ;;  %v2988_v10 = vshll.u32 %v2282_v19, 16  ;;  %6224 = vmatprep.mubr.bf16.mxu1 %v2703_v33 }
 0x257   : > { %v2847_v7 = vsel %vm1509_vm14, %v2771_v22, %v2846_v55  ;;  %v2918_v61 = vor.u32 %v2916_v25, %v2915_v32  ;;  %v9256_v41 = vadd.f32 %v5720_v53, %v8934_v43  ;;  %v5723_v30 = vadd.f32 %v5722_v15, %v5721_v57  ;;  %v9922_v22 = vld [vmem:[#allocation15_spill] sm:$0xff]  ;;  %v5836_v21 = vpop.f32.mrb[48].mxu0 }
 0x258   : > { %v2284_v39 = vsel %vm1920_vm9, %v2281_v36, %v9920_v20  ;;  %v2987_v49 = vrot.slane %v2985_v34, 7  ;;  %v9921_v50 = vmov %v9920_v20  ;;  %v2287_v60 = vrot.slane %v9922_v22, 1  ;;  %v9924_v36 = vld [vmem:[#allocation4_spill] sm:$0xff]  ;;  %v5837_v20 = vpop.f32.mrb[49].mxu0  ;;  %v5724_v34 = vpop.f32.mrb[48].mxu1 }
 0x259   : > { %v3057_v8 = vshrl.u32 %v2284_v39, 16  ;;  %v3060_v13 = vshll.u32 %v2284_v39, 16  ;;  %v9259_v27 = vsel %vm1509_vm14, %v2843_v59, %v2918_v61  ;;  %v2286_v48 = vsel %vm1920_vm9, %v9921_v50, %v2285_v3  ;;  %v5725_v50 = vpop.f32.mrb[49].mxu1 }
 0x25a   : > { %v9266_v52 = vadd.f32 %v5723_v30, %v8934_v43  ;;  %v3129_v33 = vshrl.u32 %v2286_v48, 16  ;;  %v3132_v12 = vshll.u32 %v2286_v48, 16  ;;  %v2990_v44 = vor.u32 %v2988_v10, %v2987_v49  ;;  %v5839_v10 = vpop.f32.mrb[50].mxu0 }
 0x25b   : > { %v3059_v47 = vrot.slane %v3057_v8, 7  ;;  %v2288_v25 = vsel %vm1920_vm9, %v2285_v3, %v2287_v60  ;;  %v2289_v59 = vrot.slane %v9923_v56, 1  ;;  %v2291_v55 = vrot.slane %v9924_v36, 1 }
 0x25c   : > { %v3131_v53 = vrot.slane %v3129_v33, 7  ;;  %v3201_v57 = vshrl.u32 %v2288_v25, 16  ;;  %v3204_v19 = vshll.u32 %v2288_v25, 16  ;;  %v2991_v45 = vsel %vm1509_vm14, %v2915_v32, %v2990_v44  ;;  %v5840_v32 = vpop.f32.mrb[51].mxu0 }
 0x25d   : > { %v3062_v29 = vor.u32 %v3060_v13, %v3059_v47  ;;  %v2290_v39 = vsel %vm1920_vm9, %v2287_v60, %v2289_v59  ;;  %v2292_v15 = vsel %vm1920_vm9, %v2289_v59, %v2291_v55  ;;  %v1772_v61 = vsel %vm1650_vm12, %v1755_v4, 0  ;;  %6225 = vmatmul.mubr.bf16.gmra.mrb[148].mxu1 %v2775_v31  ;;  %v5727_v4 = vpop.f32.mrb[50].mxu1  ;;  %v9925_v31 = vld [vmem:[#allocation6_spill] sm:$0xff] }
 0x25e   : > { %v9276_v3 = vadd.f32 %v5837_v20, %v5836_v21  ;;  %v3134_v8 = vor.u32 %v3132_v12, %v3131_v53  ;;  %v3203_v13 = vrot.slane %v3201_v57, 7  ;;  %v3273_v48 = vshrl.u32 %v2290_v39, 16  ;;  %6228 = vmatprep.mubr.bf16.mxu1 %v2847_v7  ;;  %v9926_v20 = vld [vmem:[#allocation9_spill] sm:$0xff] }
 0x25f   : > { %v9279_v30 = vsel %vm1509_vm14, %v2987_v49, %v3062_v29  ;;  %v3276_v22 = vshll.u32 %v2290_v39, 16  ;;  %v3345_v60 = vshrl.u32 %v2292_v15, 16  ;;  %v3348_v33 = vshll.u32 %v2292_v15, 16  ;;  %v5728_v49 = vpop.f32.mrb[51].mxu1  ;;  %v9928_v15 = vld [vmem:[#allocation12_spill] sm:$0xff] }
 0x260   : > { %v5726_v44 = vadd.f32 %v5725_v50, %v5724_v34  ;;  %v9281_v28 = vadd.f32 %v5840_v32, %v5839_v10  ;;  %v9284_v25 = vsel %vm1509_vm14, %v3059_v47, %v3134_v8  ;;  %v3206_v56 = vor.u32 %v3204_v19, %v3203_v13  ;;  %v6449_v50 = vld [vmem:[%s9683_s5 + $0x18] sm:$0xff]  }
 0x261   : > { %v3275_v59 = vrot.slane %v3273_v48, 7  ;;  %v3347_v12 = vrot.slane %v3345_v60, 7  ;;  %v2293_v36 = vrot.slane %v1772_v61, 1  ;;  %v2295_v21 = vrot.slane %v9925_v31, 1  ;;  %6258 = vmatprep.subr.bf16.mxu0 %v6449_v50 }
 0x262   : > { %v9288_v29 = vadd.f32 %v5726_v44, %v8934_v43  ;;  %v5729_v57 = vadd.f32 %v5728_v49, %v5727_v4  ;;  %v9291_v7 = vsel %vm1509_vm14, %v3131_v53, %v3206_v56  ;;  %v9927_v39 = vrot.slane %v9926_v20, 1  ;;  %6259 = vmatpush3.bf16.msra.mxu0 %v6449_v50  ;;  %v9933_v50 = vld [vmem:[#allocation10_spill] sm:$0xff] }
 0x263   : > { %v9929_v34 = vrot.slane %v9928_v15, 1  ;;  %v3278_v19 = vor.u32 %v3276_v22, %v3275_v59  ;;  %v3350_v10 = vor.u32 %v3348_v33, %v3347_v12  ;;  %v2294_v8 = vsel %vm1920_vm9, %v2291_v55, %v2293_v36 }
 0x264   : > { %v2296_v61 = vsel %vm1920_vm9, %v2293_v36, %v2295_v21  ;;  %v4318_v32 = vadd.f32 %v5729_v57, %v8934_v43  ;;  %v3417_v53 = vshrl.u32 %v2294_v8, 16  ;;  %v3420_v48 = vshll.u32 %v2294_v8, 16  ;;  %v5842_v57 = vpop.f32.mrb[52].mxu0 }
 0x265   : > { %v2300_v47 = vsel %vm1920_vm9, %v9929_v34, %v9927_v39  ;;  %v3489_v60 = vshrl.u32 %v2296_v61, 16  ;;  %v9305_v44 = vsel %vm1509_vm14, %v3203_v13, %v3278_v19  ;;  %v9308_v4 = vsel %vm1509_vm14, %v3275_v59, %v3350_v10  ;;  %6229 = vmatmul.mubr.bf16.gmra.mrb[152].mxu1 %v9259_v27 }
 0x266   : > { %v3492_v22 = vshll.u32 %v2296_v61, 16  ;;  %v9930_v55 = vmov %v9929_v34  ;;  %v3419_v56 = vrot.slane %v3417_v53, 7  ;;  %v3633_v20 = vshrl.u32 %v2300_v47, 16  ;;  %6232 = vmatprep.mubr.bf16.mxu1 %v2991_v45  ;;  %v9931_v61 = vld [vmem:[#allocation16_spill] sm:$0xff] }
 0x267   : > { %v2298_v33 = vsel %vm1920_vm9, %v2295_v21, %v9930_v55  ;;  %v3491_v49 = vrot.slane %v3489_v60, 7  ;;  %v3636_v13 = vshll.u32 %v2300_v47, 16  ;;  %v9316_v59 = vadd.f32 %v8944_v35, %v8955_v11  ;;  %v5843_v21 = vpop.f32.mrb[53].mxu0  ;;  %v9932_v11 = vld [vmem:[#allocation5_spill] sm:$0xff] }
 0x268   : > { %v3561_v36 = vshrl.u32 %v2298_v33, 16  ;;  %v3564_v31 = vshll.u32 %v2298_v33, 16  ;;  %v9320_v39 = vadd.f32 %v8959_v40, %v8972_v42  ;;  %v3422_v15 = vor.u32 %v3420_v48, %v3419_v56  ;;  %v5845_v8 = vpop.f32.mrb[54].mxu0  ;;  %v9935_v48 = vld [vmem:[#allocation13_spill] sm:$0xff] }
 0x269   : > { %v3494_v34 = vor.u32 %v3492_v22, %v3491_v49  ;;  %v9324_v10 = vadd.f32 %v8993_v63, %v9012_v54  ;;  %v5844_v27 = vadd.f32 %v5843_v21, %v5842_v57  ;;  %v3635_v47 = vrot.slane %v3633_v20, 7  ;;  %v5846_v42 = vpop.f32.mrb[55].mxu0  ;;  %v9934_v54 = vld [vmem:[#allocation8_spill] sm:$0xff]  ;;  %v5730_v22 = vpop.f32.mrb[52].mxu1 }
 0x26a   : > { %v3563_v19 = vrot.slane %v3561_v36, 7  ;;  %v9328_v35 = vadd.f32 %v9931_v61, %v9037_v2  ;;  %v9332_v40 = vadd.f32 %v9933_v50, %v9932_v11  ;;  %v9335_v45 = vsel %vm1509_vm14, %v3347_v12, %v3422_v15  ;;  %v5731_v12 = vpop.f32.mrb[53].mxu1 }
 0x26b   : > { %v9338_v53 = vsel %vm1509_vm14, %v3419_v56, %v3494_v34  ;;  %v9342_v60 = vadd.f32 %v9935_v48, %v9934_v54  ;;  %v5847_v55 = vadd.f32 %v5846_v42, %v5845_v8  ;;  %v3638_v2 = vor.u32 %v3636_v13, %v3635_v47  ;;  %v5733_v20 = vpop.f32.mrb[54].mxu1 }
 0x26c   : > { %v3566_v63 = vor.u32 %v3564_v31, %v3563_v19  ;;  %v9346_v33 = vadd.f32 %v9127_v1, %v9145_v37  ;;  %v9350_v36 = vadd.f32 %v9135_v16, %v9149_v46  ;;  %v9357_v31 = vadd.f32 %v9168_v51, %v9177_v38  ;;  %v5734_v38 = vpop.f32.mrb[55].mxu1 }
 0x26d   : > { %v9361_v57 = vadd.f32 %v9172_v9, %v9186_v58  ;;  %v9365_v1 = vadd.f32 %v9195_v24, %v9205_v62  ;;  %v5732_v37 = vadd.f32 %v5731_v12, %v5730_v22  ;;  %v9368_v16 = vsel %vm1509_vm14, %v3563_v19, %v3638_v2  ;;  %6233 = vmatmul.mubr.bf16.gmra.mrb[156].mxu1 %v9279_v30  ;;  %v6450_v30 = vld [vmem:[%s9683_s5 + $0x20] sm:$0xff]  }
 0x26e   : > { %v9353_v56 = vsel %vm1509_vm14, %v3491_v49, %v3566_v63  ;;  %v9372_v46 = vadd.f32 %v9199_v5, %v9210_v0  ;;  %v9376_v51 = vadd.f32 %v9218_v6, %v9232_v14  ;;  %v9380_v9 = vadd.f32 %v9226_v17, %v9235_v23  ;;  %6236 = vmatprep.mubr.bf16.mxu1 %v9284_v25  ;;  %v5848_v17 = vpop.f32.mrb[56].mxu0 }
 0x26f   : > { %v9384_v58 = vadd.f32 %v9239_v26, %v9256_v41  ;;  %v9388_v24 = vadd.f32 %v9246_v18, %v9266_v52  ;;  %v9392_v5 = vadd.f32 %v9276_v3, %v9288_v29  ;;  %v4323_v62 = vadd.f32 %v5732_v37, %v8934_v43  ;;  %v5849_v23 = vpop.f32.mrb[57].mxu0  ;;  %v5736_v52 = vpop.f32.mrb[56].mxu1  ;;  %6260 = vmatprep.subr.bf16.mxu0 %v6450_v30 }
 0x270   : > { %v5735_v0 = vadd.f32 %v5734_v38, %v5733_v20  ;;  %v9397_v6 = vadd.f32 %v9281_v28, %v4318_v32  ;;  %v5850_v18 = vadd.f32 %v5849_v23, %v5848_v17  ;;  %v5851_v41 = vpop.f32.mrb[58].mxu0  ;;  %v5737_v28 = vpop.f32.mrb[57].mxu1  ;;  %6261 = vmatpush3.bf16.msra.mxu0 %v6450_v30 }
 0x271   : > { %v9401_v26 = vadd.f32 %v5844_v27, %v4323_v62  ;;  %v5852_v3 = vpop.f32.mrb[59].mxu0  ;;  %v5738_v49 = vadd.f32 %v5737_v28, %v5736_v52  ;;  %v5739_v25 = vpop.f32.mrb[58].mxu1 }
 0x272   : > { %v4326_v14 = vadd.f32 %v5735_v0, %v8934_v43  ;;  %v5853_v32 = vadd.f32 %v5852_v3, %v5851_v41  ;;  %v5740_v13 = vpop.f32.mrb[59].mxu1  ;;  %v5854_v34 = vpop.f32.mrb[60].mxu0 }
 0x273   : > { %v4331_v21 = vadd.f32 %v5738_v49, %v8934_v43  ;;  %v5741_v15 = vadd.f32 %v5740_v13, %v5739_v25  ;;  %v5855_v27 = vpop.f32.mrb[61].mxu0  ;;  %v6497_v49 = vld [vmem:[%s9682_s4] ss:$0 sm:$0xff] }
 0x274   : > { %v9406_v29 = vadd.f32 %v5847_v55, %v4326_v14  ;;  %v5856_v47 = vadd.f32 %v5855_v27, %v5854_v34  ;;  %v5857_v61 = vpop.f32.mrb[62].mxu0  ;;  %v5742_v11 = vpop.f32.mrb[60].mxu1 }
 0x275   : > { %6237 = vmatmul.mubr.bf16.gmra.mrb[160].mxu1 %v9291_v7  ;;  %v4334_v19 = vadd.f32 %v5741_v15, %v8934_v43  ;;  %v9412_v8 = vadd.f32 %v5850_v18, %v4331_v21  ;;  %v5858_v50 = vpop.f32.mrb[63].mxu0  ;;  %v5743_v63 = vpop.f32.mrb[61].mxu1 }
 0x276   : > { %6240 = vmatprep.mubr.bf16.mxu1 %v9305_v44  ;;  %v5859_v54 = vadd.f32 %v5858_v50, %v5857_v61  ;;  %v5744_v7 = vadd.f32 %v5743_v63, %v5742_v11  ;;  %v5745_v48 = vpop.f32.mrb[62].mxu1 }
 0x277   : > { %v9414_v42 = vadd.f32 %v5853_v32, %v4334_v19  ;;  %v5746_v22 = vpop.f32.mrb[63].mxu1 }
 0x278   : > { %v4339_v44 = vadd.f32 %v5744_v7, %v8934_v43  ;;  %v5747_v55 = vadd.f32 %v5746_v22, %v5745_v48 }
 0x279   : > { %v5860_v2 = vpop.f32.mrb[64].mxu0 }
 0x27a   : > { %v4342_v12 = vadd.f32 %v5747_v55, %v8934_v43  ;;  %v5861_v37 = vpop.f32.mrb[65].mxu0  ;;  %v9420_v20 = vadd.f32 %v5856_v47, %v4339_v44 }
 0x27b   : > { %v5862_v38 = vadd.f32 %v5861_v37, %v5860_v2  ;;  %v5863_v62 = vpop.f32.mrb[66].mxu0 }
 0x27c   : > { %v5748_v0 = vpop.f32.mrb[64].mxu1  ;;  %v5864_v17 = vpop.f32.mrb[67].mxu0  ;;  %v9425_v52 = vadd.f32 %v5859_v54, %v4342_v12 }
 0x27d   : > { %6241 = vmatmul.mubr.bf16.gmra.mrb[164].mxu1 %v9308_v4  ;;  %v5749_v14 = vpop.f32.mrb[65].mxu1  ;;  %v5865_v23 = vadd.f32 %v5864_v17, %v5863_v62  ;;  %v6451_v4 = vld [vmem:[%s9683_s5 + $0x28] sm:$0xff]  }
 0x27e   : > { %6244 = vmatprep.mubr.bf16.mxu1 %v9335_v45  ;;  %v5750_v18 = vadd.f32 %v5749_v14, %v5748_v0  ;;  %v5751_v41 = vpop.f32.mrb[66].mxu1  ;;  %6262 = vmatprep.subr.bf16.mxu0 %v6451_v4 }
 0x27f   : > { %v5752_v45 = vpop.f32.mrb[67].mxu1  ;;  %6263 = vmatpush3.bf16.msra.mxu0 %v6451_v4 }
 0x280   : > { %v4347_v3 = vadd.f32 %v5750_v18, %v8934_v43  ;;  %v5753_v30 = vadd.f32 %v5752_v45, %v5751_v41 }
 0x281   : > { %v5866_v28 = vpop.f32.mrb[68].mxu0 }
 0x282   : > { %v5867_v32 = vpop.f32.mrb[69].mxu0  ;;  %v4350_v25 = vadd.f32 %v6497_v49, %v5753_v30  ;;  %v9433_v15 = vadd.f32 %v5862_v38, %v4347_v3 }
 0x283   : > { %v5868_v13 = vadd.f32 %v5867_v32, %v5866_v28  ;;  %v5869_v21 = vpop.f32.mrb[70].mxu0 }
 0x284   : > { %v5754_v34 = vpop.f32.mrb[68].mxu1 }
 0x285   : > { %6245 = vmatmul.mubr.bf16.gmra.mrb[168].mxu1 %v9338_v53  ;;  %v5870_v53 = vpop.f32.mrb[71].mxu0  ;;  %v5755_v19 = vpop.f32.mrb[69].mxu1 }
 0x286   : > { %6248 = vmatprep.mubr.bf16.mxu1 %v9353_v56  ;;  %v5871_v43 = vadd.f32 %v5870_v53, %v5869_v21  ;;  %v5756_v27 = vadd.f32 %v5755_v19, %v5754_v34  ;;  %v5757_v47 = vpop.f32.mrb[70].mxu1  ;;  %v9435_v56 = vadd.f32 %v5865_v23, %v4350_v25 }
 0x287   : > { %v5758_v61 = vpop.f32.mrb[71].mxu1 }
 0x288   : > { %v4355_v11 = vadd.f32 %v6497_v49, %v5756_v27  ;;  %v5759_v50 = vadd.f32 %v5758_v61, %v5757_v47 }
 0x289   : > { %v5872_v63 = vpop.f32.mrb[72].mxu0 }
 0x28a   : > { %v5873_v54 = vpop.f32.mrb[73].mxu0  ;;  %v4358_v7 = vadd.f32 %v6497_v49, %v5759_v50  ;;  %v9438_v44 = vadd.f32 %v5868_v13, %v4355_v11 }
 0x28b   : > { %v5874_v48 = vadd.f32 %v5873_v54, %v5872_v63  ;;  %v5875_v22 = vpop.f32.mrb[74].mxu0 }
 0x28c   : > { %v5760_v55 = vpop.f32.mrb[72].mxu1  ;;  %v5876_v2 = vpop.f32.mrb[75].mxu0  ;;  %v9443_v17 = vadd.f32 %v5871_v43, %v4358_v7 }
 0x28d   : > { %6249 = vmatmul.mubr.bf16.gmra.mrb[172].mxu1 %v9368_v16  ;;  %v5761_v12 = vpop.f32.mrb[73].mxu1  ;;  %v5877_v37 = vadd.f32 %v5876_v2, %v5875_v22  ;;  %v6452_v16 = vld [vmem:[%s9683_s5 + $0x30] sm:$0xff]  }
 0x28e   : > { %v5762_v38 = vadd.f32 %v5761_v12, %v5760_v55  ;;  %v5763_v62 = vpop.f32.mrb[74].mxu1  ;;  %6264 = vmatprep.subr.bf16.mxu0 %v6452_v16  ;;  %v6453_v55 = vld [vmem:[%s9683_s5 + $0x38] sm:$0xff]  }
 0x28f   : > { %v5764_v0 = vpop.f32.mrb[75].mxu1  ;;  %6265 = vmatpush3.bf16.msra.mxu0 %v6452_v16 }
 0x290   : > { %v4363_v14 = vadd.f32 %v6497_v49, %v5762_v38  ;;  %v5765_v23 = vadd.f32 %v5764_v0, %v5763_v62  ;;  %6266 = vmatprep.subr.bf16.mxu0 %v6453_v55 }
 0x291   : > { %v5878_v18 = vpop.f32.mrb[76].mxu0 }
 0x292   : > { %v5879_v41 = vpop.f32.mrb[77].mxu0  ;;  %v4366_v4 = vadd.f32 %v6497_v49, %v5765_v23  ;;  %v9445_v30 = vadd.f32 %v5874_v48, %v4363_v14 }
 0x293   : > { %v5880_v45 = vadd.f32 %v5879_v41, %v5878_v18  ;;  %v5881_v3 = vpop.f32.mrb[78].mxu0  ;;  %6267 = vmatpush3.bf16.msra.mxu0 %v6453_v55 }
 0x294   : > { %v5766_v28 = vpop.f32.mrb[76].mxu1  ;;  %v5882_v32 = vpop.f32.mrb[79].mxu0  ;;  %v9447_v19 = vadd.f32 %v5877_v37, %v4366_v4 }
 0x295   : > { %v5767_v25 = vpop.f32.mrb[77].mxu1  ;;  %v5883_v13 = vadd.f32 %v5882_v32, %v5881_v3 }
 0x296   : > { %v5768_v21 = vadd.f32 %v5767_v25, %v5766_v28  ;;  %v5769_v34 = vpop.f32.mrb[78].mxu1 }
 0x297   : > { %v5770_v53 = vpop.f32.mrb[79].mxu1 }
 0x298   : > { %v4371_v43 = vadd.f32 %v6497_v49, %v5768_v21  ;;  %v5771_v27 = vadd.f32 %v5770_v53, %v5769_v34 }
 0x299   : > { %v6012_v47 = vpop.f32.mrb[80].mxu0 }
 0x29a   : > { %v6013_v61 = vpop.f32.mrb[81].mxu0  ;;  %v4374_v11 = vadd.f32 %v6497_v49, %v5771_v27  ;;  %v9449_v54 = vadd.f32 %v5880_v45, %v4371_v43 }
 0x29b   : > { %v6014_v50 = vadd.f32 %v6013_v61, %v6012_v47  ;;  %v6015_v63 = vpop.f32.mrb[82].mxu0 }
 0x29c   : > { %v6016_v7 = vpop.f32.mrb[83].mxu0  ;;  %v9454_v2 = vadd.f32 %v5883_v13, %v4374_v11 }
 0x29d   : > { %v6017_v48 = vadd.f32 %v6016_v7, %v6015_v63 }
 0x2a1   : > { %v5900_v22 = vpop.f32.mrb[80].mxu1  ;;  %v6018_v62 = vpop.f32.mrb[84].mxu0 }
 0x2a2   : > { %v5901_v12 = vpop.f32.mrb[81].mxu1  ;;  %v6019_v49 = vpop.f32.mrb[85].mxu0 }
 0x2a3   : > { %v5902_v37 = vadd.f32 %v5901_v12, %v5900_v22  ;;  %v5903_v38 = vpop.f32.mrb[82].mxu1  ;;  %v6020_v23 = vadd.f32 %v6019_v49, %v6018_v62  ;;  %v6021_v18 = vpop.f32.mrb[86].mxu0 }
 0x2a4   : > { %v5904_v0 = vpop.f32.mrb[83].mxu1  ;;  %v6022_v41 = vpop.f32.mrb[87].mxu0 }
 0x2a5   : > { %v4573_v16 = vadd.f32 %v5902_v37, %v9316_v59  ;;  %v5905_v14 = vadd.f32 %v5904_v0, %v5903_v38  ;;  %v6023_v45 = vadd.f32 %v6022_v41, %v6021_v18 }
 0x2a7   : > { %v4576_v4 = vadd.f32 %v5905_v14, %v9320_v39  ;;  %v9458_v3 = vadd.f32 %v6014_v50, %v4573_v16 }
 0x2a9   : > { %v5906_v28 = vpop.f32.mrb[84].mxu1  ;;  %v6024_v21 = vpop.f32.mrb[88].mxu0  ;;  %v9460_v43 = vadd.f32 %v6017_v48, %v4576_v4 }
 0x2aa   : > { %v5907_v32 = vpop.f32.mrb[85].mxu1  ;;  %v6025_v53 = vpop.f32.mrb[89].mxu0 }
 0x2ab   : > { %v5908_v25 = vadd.f32 %v5907_v32, %v5906_v28  ;;  %v5909_v13 = vpop.f32.mrb[86].mxu1  ;;  %v6026_v47 = vadd.f32 %v6025_v53, %v6024_v21  ;;  %v6027_v61 = vpop.f32.mrb[90].mxu0 }
 0x2ac   : > { %v5910_v34 = vpop.f32.mrb[87].mxu1  ;;  %v6028_v11 = vpop.f32.mrb[91].mxu0 }
 0x2ad   : > { %v4581_v59 = vadd.f32 %v5908_v25, %v9324_v10  ;;  %v5911_v27 = vadd.f32 %v5910_v34, %v5909_v13  ;;  %v6029_v63 = vadd.f32 %v6028_v11, %v6027_v61 }
 0x2af   : > { %v4584_v39 = vadd.f32 %v5911_v27, %v9328_v35  ;;  %v9464_v50 = vadd.f32 %v6020_v23, %v4581_v59 }
 0x2b1   : > { %v5912_v7 = vpop.f32.mrb[88].mxu1  ;;  %v9466_v22 = vadd.f32 %v6023_v45, %v4584_v39 }
 0x2b2   : > { %v5913_v55 = vpop.f32.mrb[89].mxu1 }
 0x2b3   : > { %v5914_v12 = vadd.f32 %v5913_v55, %v5912_v7  ;;  %v5915_v37 = vpop.f32.mrb[90].mxu1  ;;  %v6030_v38 = vpop.f32.mrb[92].mxu0 }
 0x2b4   : > { %v5916_v48 = vpop.f32.mrb[91].mxu1  ;;  %v6031_v62 = vpop.f32.mrb[93].mxu0 }
 0x2b5   : > { %v4589_v10 = vadd.f32 %v5914_v12, %v9332_v40  ;;  %v5917_v0 = vadd.f32 %v5916_v48, %v5915_v37  ;;  %v6032_v49 = vadd.f32 %v6031_v62, %v6030_v38  ;;  %v6033_v16 = vpop.f32.mrb[94].mxu0 }
 0x2b6   : > { %v6034_v14 = vpop.f32.mrb[95].mxu0 }
 0x2b7   : > { %v4592_v35 = vadd.f32 %v5917_v0, %v9342_v60  ;;  %v6035_v18 = vadd.f32 %v6034_v14, %v6033_v16  ;;  %v9470_v23 = vadd.f32 %v6026_v47, %v4589_v10 }
 0x2b9   : > { %v9472_v4 = vadd.f32 %v6029_v63, %v4592_v35 }
 0x2ba   : > { %v5918_v41 = vpop.f32.mrb[92].mxu1 }
 0x2bb   : > { %v5919_v45 = vpop.f32.mrb[93].mxu1  ;;  %v6036_v25 = vpop.f32.mrb[96].mxu0 }
 0x2bc   : > { %v5920_v28 = vadd.f32 %v5919_v45, %v5918_v41  ;;  %v5921_v32 = vpop.f32.mrb[94].mxu1  ;;  %v6037_v21 = vpop.f32.mrb[97].mxu0 }
 0x2bd   : > { %v5922_v13 = vpop.f32.mrb[95].mxu1  ;;  %v6038_v53 = vadd.f32 %v6037_v21, %v6036_v25  ;;  %v6039_v59 = vpop.f32.mrb[98].mxu0 }
 0x2be   : > { %v4597_v40 = vadd.f32 %v5920_v28, %v9346_v33  ;;  %v5923_v34 = vadd.f32 %v5922_v13, %v5921_v32  ;;  %v6040_v27 = vpop.f32.mrb[99].mxu0 }
 0x2bf   : > { %v6041_v61 = vadd.f32 %v6040_v27, %v6039_v59 }
 0x2c0   : > { %v4600_v60 = vadd.f32 %v5923_v34, %v9350_v36  ;;  %v9476_v47 = vadd.f32 %v6032_v49, %v4597_v40 }
 0x2c2   : > { %v9478_v39 = vadd.f32 %v6035_v18, %v4600_v60 }
 0x2c3   : > { %v5924_v11 = vpop.f32.mrb[96].mxu1  ;;  %v6042_v12 = vpop.f32.mrb[100].mxu0 }
 0x2c4   : > { %v5925_v63 = vpop.f32.mrb[97].mxu1  ;;  %v6043_v38 = vpop.f32.mrb[101].mxu0 }
 0x2c5   : > { %v5926_v7 = vadd.f32 %v5925_v63, %v5924_v11  ;;  %v5927_v55 = vpop.f32.mrb[98].mxu1  ;;  %v6044_v62 = vadd.f32 %v6043_v38, %v6042_v12  ;;  %v6045_v10 = vpop.f32.mrb[102].mxu0 }
 0x2c6   : > { %v5928_v37 = vpop.f32.mrb[99].mxu1  ;;  %v6046_v0 = vpop.f32.mrb[103].mxu0 }
 0x2c7   : > { %v4605_v33 = vadd.f32 %v5926_v7, %v9357_v31  ;;  %v5929_v48 = vadd.f32 %v5928_v37, %v5927_v55  ;;  %v6047_v16 = vadd.f32 %v6046_v0, %v6045_v10 }
 0x2c9   : > { %v4608_v36 = vadd.f32 %v5929_v48, %v9361_v57  ;;  %v9482_v49 = vadd.f32 %v6038_v53, %v4605_v33 }
 0x2cb   : > { %v9484_v14 = vadd.f32 %v6041_v61, %v4608_v36 }
 0x2cc   : > { %v5930_v35 = vpop.f32.mrb[100].mxu1  ;;  %v6048_v41 = vpop.f32.mrb[104].mxu0 }
 0x2cd   : > { %v5931_v18 = vpop.f32.mrb[101].mxu1  ;;  %v6049_v32 = vpop.f32.mrb[105].mxu0 }
 0x2ce   : > { %v5932_v45 = vadd.f32 %v5931_v18, %v5930_v35  ;;  %v5933_v28 = vpop.f32.mrb[102].mxu1  ;;  %v6050_v13 = vadd.f32 %v6049_v32, %v6048_v41  ;;  %v6051_v31 = vpop.f32.mrb[106].mxu0 }
 0x2cf   : > { %v5934_v25 = vpop.f32.mrb[103].mxu1  ;;  %v6052_v34 = vpop.f32.mrb[107].mxu0 }
 0x2d0   : > { %v4613_v21 = vadd.f32 %v5932_v45, %v9365_v1  ;;  %v5935_v40 = vadd.f32 %v5934_v25, %v5933_v28  ;;  %v6053_v59 = vadd.f32 %v6052_v34, %v6051_v31 }
 0x2d2   : > { %v4616_v57 = vadd.f32 %v5935_v40, %v9372_v46  ;;  %v9488_v53 = vadd.f32 %v6044_v62, %v4613_v21 }
 0x2d4   : > { %v5936_v27 = vpop.f32.mrb[104].mxu1  ;;  %v9490_v60 = vadd.f32 %v6047_v16, %v4616_v57 }
 0x2d5   : > { %v5937_v61 = vpop.f32.mrb[105].mxu1 }
 0x2d6   : > { %v6054_v11 = vpop.f32.mrb[108].mxu0  ;;  %v5938_v63 = vadd.f32 %v5937_v61, %v5936_v27  ;;  %v5939_v7 = vpop.f32.mrb[106].mxu1 }
 0x2d7   : > { %v6055_v55 = vpop.f32.mrb[109].mxu0  ;;  %v5940_v12 = vpop.f32.mrb[107].mxu1 }
 0x2d8   : > { %v6056_v37 = vadd.f32 %v6055_v55, %v6054_v11  ;;  %v6057_v38 = vpop.f32.mrb[110].mxu0  ;;  %v4621_v1 = vadd.f32 %v5938_v63, %v9376_v51  ;;  %v5941_v33 = vadd.f32 %v5940_v12, %v5939_v7 }
 0x2d9   : > { %v6058_v48 = vpop.f32.mrb[111].mxu0 }
 0x2da   : > { %v6059_v10 = vadd.f32 %v6058_v48, %v6057_v38  ;;  %v4624_v46 = vadd.f32 %v5941_v33, %v9380_v9  ;;  %v9494_v62 = vadd.f32 %v6050_v13, %v4621_v1 }
 0x2dc   : > { %v5942_v0 = vpop.f32.mrb[108].mxu1  ;;  %v9496_v36 = vadd.f32 %v6053_v59, %v4624_v46 }
 0x2dd   : > { %v5943_v16 = vpop.f32.mrb[109].mxu1 }
 0x2de   : > { %v6060_v35 = vpop.f32.mrb[112].mxu0  ;;  %v5944_v18 = vadd.f32 %v5943_v16, %v5942_v0  ;;  %v5945_v41 = vpop.f32.mrb[110].mxu1 }
 0x2df   : > { %v6061_v45 = vpop.f32.mrb[113].mxu0  ;;  %v5946_v28 = vpop.f32.mrb[111].mxu1 }
 0x2e0   : > { %v6062_v32 = vadd.f32 %v6061_v45, %v6060_v35  ;;  %v6063_v25 = vpop.f32.mrb[114].mxu0  ;;  %v4629_v51 = vadd.f32 %v5944_v18, %v9384_v58  ;;  %v5947_v31 = vadd.f32 %v5946_v28, %v5945_v41 }
 0x2e1   : > { %v6064_v21 = vpop.f32.mrb[115].mxu0 }
 0x2e2   : > { %v6065_v40 = vadd.f32 %v6064_v21, %v6063_v25  ;;  %v4632_v9 = vadd.f32 %v5947_v31, %v9388_v24  ;;  %v9500_v13 = vadd.f32 %v6056_v37, %v4629_v51 }
 0x2e4   : > { %v5948_v34 = vpop.f32.mrb[112].mxu1  ;;  %v9502_v59 = vadd.f32 %v6059_v10, %v4632_v9 }
 0x2e5   : > { %v5949_v57 = vpop.f32.mrb[113].mxu1 }
 0x2e6   : > { %v6066_v27 = vpop.f32.mrb[116].mxu0  ;;  %v5950_v61 = vadd.f32 %v5949_v57, %v5948_v34  ;;  %v5951_v11 = vpop.f32.mrb[114].mxu1 }
 0x2e7   : > { %v6067_v63 = vpop.f32.mrb[117].mxu0  ;;  %v5952_v7 = vpop.f32.mrb[115].mxu1 }
 0x2e8   : > { %v6068_v55 = vadd.f32 %v6067_v63, %v6066_v27  ;;  %v6069_v12 = vpop.f32.mrb[118].mxu0  ;;  %v4637_v58 = vadd.f32 %v5950_v61, %v9392_v5  ;;  %v5953_v38 = vadd.f32 %v5952_v7, %v5951_v11 }
 0x2e9   : > { %v6070_v1 = vpop.f32.mrb[119].mxu0 }
 0x2ea   : > { %v6071_v33 = vadd.f32 %v6070_v1, %v6069_v12  ;;  %v4640_v24 = vadd.f32 %v5953_v38, %v9397_v6  ;;  %v9506_v37 = vadd.f32 %v6062_v32, %v4637_v58 }
 0x2ec   : > { %v5954_v48 = vpop.f32.mrb[116].mxu1  ;;  %v9508_v10 = vadd.f32 %v6065_v40, %v4640_v24 }
 0x2ed   : > { %v5955_v46 = vpop.f32.mrb[117].mxu1 }
 0x2ee   : > { %v6072_v0 = vpop.f32.mrb[120].mxu0  ;;  %v5956_v16 = vadd.f32 %v5955_v46, %v5954_v48  ;;  %v5957_v35 = vpop.f32.mrb[118].mxu1 }
 0x2ef   : > { %v6073_v18 = vpop.f32.mrb[121].mxu0  ;;  %v5958_v41 = vpop.f32.mrb[119].mxu1 }
 0x2f0   : > { %v6074_v45 = vadd.f32 %v6073_v18, %v6072_v0  ;;  %v6075_v28 = vpop.f32.mrb[122].mxu0  ;;  %v4645_v5 = vadd.f32 %v5956_v16, %v9401_v26  ;;  %v5959_v25 = vadd.f32 %v5958_v41, %v5957_v35 }
 0x2f1   : > { %v6076_v51 = vpop.f32.mrb[123].mxu0 }
 0x2f2   : > { %v6077_v31 = vadd.f32 %v6076_v51, %v6075_v28  ;;  %v4648_v6 = vadd.f32 %v5959_v25, %v9406_v29  ;;  %v9512_v32 = vadd.f32 %v6068_v55, %v4645_v5 }
 0x2f4   : > { %v5960_v21 = vpop.f32.mrb[120].mxu1  ;;  %v9514_v40 = vadd.f32 %v6071_v33, %v4648_v6 }
 0x2f5   : > { %v5961_v9 = vpop.f32.mrb[121].mxu1 }
 0x2f6   : > { %v5962_v34 = vadd.f32 %v5961_v9, %v5960_v21  ;;  %v5963_v57 = vpop.f32.mrb[122].mxu1 }
 0x2f7   : > { %v5964_v27 = vpop.f32.mrb[123].mxu1  ;;  %v6078_v61 = vpop.f32.mrb[124].mxu0 }
 0x2f8   : > { %v4653_v11 = vadd.f32 %v5962_v34, %v9412_v8  ;;  %v5965_v63 = vadd.f32 %v5964_v27, %v5963_v57  ;;  %v6079_v7 = vpop.f32.mrb[125].mxu0 }
 0x2f9   : > { %v6080_v26 = vadd.f32 %v6079_v7, %v6078_v61  ;;  %v6081_v12 = vpop.f32.mrb[126].mxu0 }
 0x2fa   : > { %v4656_v58 = vadd.f32 %v5965_v63, %v9414_v42  ;;  %v6082_v38 = vpop.f32.mrb[127].mxu0  ;;  %v9518_v29 = vadd.f32 %v6074_v45, %v4653_v11 }
 0x2fb   : > { %v6083_v55 = vadd.f32 %v6082_v38, %v6081_v12 }
 0x2fc   : > { %v9520_v1 = vadd.f32 %v6077_v31, %v4656_v58 }
 0x2ff   : > { %v5966_v33 = vpop.f32.mrb[124].mxu1 }
 0x300   : > { %v5967_v24 = vpop.f32.mrb[125].mxu1 }
 0x301   : > { %v5968_v48 = vadd.f32 %v5967_v24, %v5966_v33  ;;  %v5969_v46 = vpop.f32.mrb[126].mxu1  ;;  %v6084_v0 = vpop.f32.mrb[128].mxu0 }
 0x302   : > { %v5970_v16 = vpop.f32.mrb[127].mxu1  ;;  %v6085_v35 = vpop.f32.mrb[129].mxu0 }
 0x303   : > { %v4661_v8 = vadd.f32 %v5968_v48, %v9420_v20  ;;  %v5971_v18 = vadd.f32 %v5970_v16, %v5969_v46  ;;  %v6086_v41 = vadd.f32 %v6085_v35, %v6084_v0  ;;  %v6087_v28 = vpop.f32.mrb[130].mxu0 }
 0x304   : > { %v6088_v5 = vpop.f32.mrb[131].mxu0 }
 0x305   : > { %v4664_v42 = vadd.f32 %v5971_v18, %v9425_v52  ;;  %v6089_v45 = vadd.f32 %v6088_v5, %v6087_v28  ;;  %v9524_v25 = vadd.f32 %v6080_v26, %v4661_v8 }
 0x307   : > { %v9526_v51 = vadd.f32 %v6083_v55, %v4664_v42 }
 0x308   : > { %v5972_v31 = vpop.f32.mrb[128].mxu1 }
 0x309   : > { %v5973_v6 = vpop.f32.mrb[129].mxu1 }
 0x30a   : > { %v5974_v21 = vadd.f32 %v5973_v6, %v5972_v31  ;;  %v5975_v9 = vpop.f32.mrb[130].mxu1  ;;  %v6090_v34 = vpop.f32.mrb[132].mxu0 }
 0x30b   : > { %v5976_v57 = vpop.f32.mrb[131].mxu1  ;;  %v6091_v27 = vpop.f32.mrb[133].mxu0 }
 0x30c   : > { %v4669_v20 = vadd.f32 %v5974_v21, %v9433_v15  ;;  %v5977_v61 = vadd.f32 %v5976_v57, %v5975_v9  ;;  %v6092_v11 = vadd.f32 %v6091_v27, %v6090_v34  ;;  %v6093_v63 = vpop.f32.mrb[134].mxu0 }
 0x30d   : > { %v6094_v7 = vpop.f32.mrb[135].mxu0 }
 0x30e   : > { %v4672_v52 = vadd.f32 %v5977_v61, %v9435_v56  ;;  %v6095_v12 = vadd.f32 %v6094_v7, %v6093_v63  ;;  %v9530_v26 = vadd.f32 %v6086_v41, %v4669_v20 }
 0x310   : > { %v5978_v58 = vpop.f32.mrb[132].mxu1  ;;  %v9532_v38 = vadd.f32 %v6089_v45, %v4672_v52 }
 0x311   : > { %v5979_v55 = vpop.f32.mrb[133].mxu1 }
 0x312   : > { %v5980_v33 = vadd.f32 %v5979_v55, %v5978_v58  ;;  %v5981_v24 = vpop.f32.mrb[134].mxu1 }
 0x313   : > { %v5982_v48 = vpop.f32.mrb[135].mxu1  ;;  %v6096_v46 = vpop.f32.mrb[136].mxu0 }
 0x314   : > { %v4677_v0 = vadd.f32 %v5980_v33, %v9438_v44  ;;  %v5983_v15 = vadd.f32 %v5982_v48, %v5981_v24  ;;  %v6097_v16 = vpop.f32.mrb[137].mxu0 }
 0x315   : > { %v6098_v35 = vadd.f32 %v6097_v16, %v6096_v46  ;;  %v6099_v8 = vpop.f32.mrb[138].mxu0 }
 0x316   : > { %v4680_v18 = vadd.f32 %v5983_v15, %v9443_v17  ;;  %v6100_v56 = vpop.f32.mrb[139].mxu0  ;;  %v9536_v28 = vadd.f32 %v6092_v11, %v4677_v0 }
 0x317   : > { %v6101_v41 = vadd.f32 %v6100_v56, %v6099_v8 }
 0x318   : > { %v5984_v5 = vpop.f32.mrb[136].mxu1  ;;  %v9538_v42 = vadd.f32 %v6095_v12, %v4680_v18 }
 0x319   : > { %v5985_v45 = vpop.f32.mrb[137].mxu1 }
 0x31a   : > { %v5986_v31 = vadd.f32 %v5985_v45, %v5984_v5  ;;  %v5987_v6 = vpop.f32.mrb[138].mxu1 }
 0x31b   : > { %v5988_v21 = vpop.f32.mrb[139].mxu1  ;;  %v6102_v9 = vpop.f32.mrb[140].mxu0 }
 0x31c   : > { %v4685_v44 = vadd.f32 %v5986_v31, %v9445_v30  ;;  %v5989_v34 = vadd.f32 %v5988_v21, %v5987_v6  ;;  %v6103_v57 = vpop.f32.mrb[141].mxu0 }
 0x31d   : > { %v6104_v27 = vadd.f32 %v6103_v57, %v6102_v9  ;;  %v6105_v20 = vpop.f32.mrb[142].mxu0 }
 0x31e   : > { %v4688_v17 = vadd.f32 %v5989_v34, %v9447_v19  ;;  %v6106_v61 = vpop.f32.mrb[143].mxu0  ;;  %v9542_v11 = vadd.f32 %v6098_v35, %v4685_v44 }
 0x31f   : > { %v6107_v63 = vadd.f32 %v6106_v61, %v6105_v20 }
 0x320   : > { %v5990_v7 = vpop.f32.mrb[140].mxu1  ;;  %v9544_v52 = vadd.f32 %v6101_v41, %v4688_v17 }
 0x321   : > { %v5991_v12 = vpop.f32.mrb[141].mxu1 }
 0x322   : > { %v5992_v58 = vadd.f32 %v5991_v12, %v5990_v7  ;;  %v5993_v55 = vpop.f32.mrb[142].mxu1 }
 0x323   : > { %v5994_v33 = vpop.f32.mrb[143].mxu1 }
 0x324   : > { %v4693_v24 = vadd.f32 %v5992_v58, %v9449_v54  ;;  %v5995_v30 = vadd.f32 %v5994_v33, %v5993_v55 }
 0x326   : > { %v4696_v48 = vadd.f32 %v5995_v30, %v9454_v2  ;;  %v9548_v46 = vadd.f32 %v6104_v27, %v4693_v24 }
 0x328   : > { %v6222_v0 = vpop.f32.mrb[144].mxu1  ;;  %v9550_v19 = vadd.f32 %v6107_v63, %v4696_v48 }
 0x329   : > { %v4903_v15 = vadd.f32 %v6222_v0, %v9464_v50  ;;  %v4894_v16 = vpop.f32.mrb[145].mxu1 }
 0x32a   : > { %v4895_v35 = vadd.f32 %v4894_v16, %v9458_v3  ;;  %v6223_v8 = vpop.f32.mrb[146].mxu1 }
 0x32b   : > { %v4906_v18 = vadd.f32 %v6223_v8, %v9466_v22  ;;  %v4897_v56 = vpop.f32.mrb[147].mxu1  ;;  %v5023_v54 = vmax.f32 %v4903_v15, 0.0 }
 0x32c   : > { %v4898_v41 = vadd.f32 %v4897_v56, %v9460_v43  ;;  %v5021_v45 = vmax.f32 %v4895_v35, 0.0 }
 0x32d   : > { %v5024_v5 = vmax.f32 %v4906_v18, 0.0 }
 0x32e   : > { %v5022_v2 = vmax.f32 %v4898_v41, 0.0 }
 0x32f   : > { %v5054_v31 = vpack.c.bf16 %v5024_v5, %v5023_v54 }
 0x330   : > { %v5053_v6 = vpack.c.bf16 %v5022_v2, %v5021_v45  ;;  %v6226_v21 = vpop.f32.mrb[148].mxu1 }
 0x331   : > { %v4919_v9 = vadd.f32 %v6226_v21, %v9476_v47  ;;  %v4910_v44 = vpop.f32.mrb[149].mxu1 }
 0x332   : > { %v4911_v50 = vadd.f32 %v4910_v44, %v9470_v23  ;;  %v6227_v34 = vpop.f32.mrb[150].mxu1  ;;  %6268 = vmatprep.mubr.bf16.mxu0 %v5053_v6 }
 0x333   : > { %v4922_v3 = vadd.f32 %v6227_v34, %v9478_v39  ;;  %v4913_v22 = vpop.f32.mrb[151].mxu1  ;;  %6269 = vmatmul.mubr.bf16.vlgmr.msra.gmra.mrb[144].mxu0 %v5054_v31  ;;  %v5027_v57 = vmax.f32 %v4919_v9, 0.0 }
 0x334   : > { %v4914_v43 = vadd.f32 %v4913_v22, %v9472_v4  ;;  %v5025_v20 = vmax.f32 %v4911_v50, 0.0 }
 0x335   : > { %v5028_v27 = vmax.f32 %v4922_v3, 0.0 }
 0x336   : > { %v5026_v17 = vmax.f32 %v4914_v43, 0.0 }
 0x337   : > { %v5056_v61 = vpack.c.bf16 %v5028_v27, %v5027_v57 }
 0x338   : > { %v5055_v63 = vpack.c.bf16 %v5026_v17, %v5025_v20  ;;  %v6230_v7 = vpop.f32.mrb[152].mxu1 }
 0x339   : > { %v4935_v47 = vadd.f32 %v6230_v7, %v9488_v53  ;;  %v4926_v12 = vpop.f32.mrb[153].mxu1 }
 0x33a   : > { %v4927_v23 = vadd.f32 %v4926_v12, %v9482_v49  ;;  %v6231_v58 = vpop.f32.mrb[154].mxu1  ;;  %6272 = vmatprep.mubr.bf16.mxu0 %v5055_v63 }
 0x33b   : > { %v4938_v39 = vadd.f32 %v6231_v58, %v9490_v60  ;;  %v4929_v55 = vpop.f32.mrb[155].mxu1  ;;  %6273 = vmatmul.mubr.bf16.gmra.mrb[148].mxu0 %v5056_v61  ;;  %v5031_v33 = vmax.f32 %v4935_v47, 0.0 }
 0x33c   : > { %v4930_v4 = vadd.f32 %v4929_v55, %v9484_v14  ;;  %v5029_v30 = vmax.f32 %v4927_v23, 0.0 }
 0x33d   : > { %v5032_v24 = vmax.f32 %v4938_v39, 0.0 }
 0x33e   : > { %v5030_v48 = vmax.f32 %v4930_v4, 0.0 }
 0x33f   : > { %v5058_v0 = vpack.c.bf16 %v5032_v24, %v5031_v33 }
 0x340   : > { %v5057_v15 = vpack.c.bf16 %v5030_v48, %v5029_v30  ;;  %v6234_v16 = vpop.f32.mrb[156].mxu1 }
 0x341   : > { %v4951_v53 = vadd.f32 %v6234_v16, %v9500_v13  ;;  %v4942_v35 = vpop.f32.mrb[157].mxu1 }
 0x342   : > { %v4943_v49 = vadd.f32 %v4942_v35, %v9494_v62  ;;  %v6235_v8 = vpop.f32.mrb[158].mxu1  ;;  %6276 = vmatprep.mubr.bf16.mxu0 %v5057_v15 }
 0x343   : > { %v4954_v60 = vadd.f32 %v6235_v8, %v9502_v59  ;;  %v4945_v18 = vpop.f32.mrb[159].mxu1  ;;  %6277 = vmatmul.mubr.bf16.gmra.mrb[152].mxu0 %v5058_v0  ;;  %v5035_v56 = vmax.f32 %v4951_v53, 0.0 }
 0x344   : > { %v4946_v14 = vadd.f32 %v4945_v18, %v9496_v36  ;;  %v5033_v54 = vmax.f32 %v4943_v49, 0.0 }
 0x345   : > { %v5036_v41 = vmax.f32 %v4954_v60, 0.0 }
 0x346   : > { %v5034_v5 = vmax.f32 %v4946_v14, 0.0 }
 0x347   : > { %v5060_v45 = vpack.c.bf16 %v5036_v41, %v5035_v56  ;;  %v6498_v41 = vld [vmem:[%s6604_s20 + $0x8] sm:$0xff]  }
 0x348   : > { %v5059_v2 = vpack.c.bf16 %v5034_v5, %v5033_v54  ;;  %v6238_v31 = vpop.f32.mrb[160].mxu1  ;;  %v6499_v54 = vld [vmem:[%s6604_s20] sm:$0xff]  }
 0x349   : > { %v4967_v13 = vadd.f32 %v6238_v31, %v9512_v32  ;;  %v4958_v6 = vpop.f32.mrb[161].mxu1  ;;  %v5301_v5 = vunpack.c.l.bf16 %v6499_v54  ;;  %v5304_v31 = vunpack.c.h.bf16 %v6498_v41 }
 0x34a   : > { %v4959_v62 = vadd.f32 %v4958_v6, %v9506_v37  ;;  %v6239_v21 = vpop.f32.mrb[162].mxu1  ;;  %6280 = vmatprep.mubr.bf16.mxu0 %v5059_v2 }
 0x34b   : > { %v4970_v59 = vadd.f32 %v6239_v21, %v9514_v40  ;;  %v4961_v9 = vpop.f32.mrb[163].mxu1  ;;  %6281 = vmatmul.mubr.bf16.gmra.mrb[156].mxu0 %v5060_v45  ;;  %v5039_v44 = vmax.f32 %v4967_v13, 0.0  ;;  %v5302_v13 = vunpack.c.h.bf16 %v6499_v54  ;;  %v6504_v54 = vld [vmem:[%s6604_s20 + $0x38] sm:$0xff]  }
 0x34c   : > { %v4962_v36 = vadd.f32 %v4961_v9, %v9508_v10  ;;  %v5037_v34 = vmax.f32 %v4959_v62, 0.0 }
 0x34d   : > { %v5040_v50 = vmax.f32 %v4970_v59, 0.0 }
 0x34e   : > { %v5038_v3 = vmax.f32 %v4962_v36, 0.0 }
 0x34f   : > { %v5062_v22 = vpack.c.bf16 %v5040_v50, %v5039_v44 }
 0x350   : > { %v5061_v43 = vpack.c.bf16 %v5038_v3, %v5037_v34  ;;  %v6242_v57 = vpop.f32.mrb[164].mxu1 }
 0x351   : > { %v4983_v32 = vadd.f32 %v6242_v57, %v9524_v25  ;;  %v4974_v27 = vpop.f32.mrb[165].mxu1  ;;  %v6500_v57 = vld [vmem:[%s6604_s20 + $0x18] sm:$0xff]  }
 0x352   : > { %v4975_v37 = vadd.f32 %v4974_v27, %v9518_v29  ;;  %v6243_v20 = vpop.f32.mrb[166].mxu1  ;;  %6284 = vmatprep.mubr.bf16.mxu0 %v5061_v43 }
 0x353   : > { %v4986_v40 = vadd.f32 %v6243_v20, %v9526_v51  ;;  %v4977_v17 = vpop.f32.mrb[167].mxu1  ;;  %6285 = vmatmul.mubr.bf16.gmra.mrb[160].mxu0 %v5062_v22  ;;  %v5043_v61 = vmax.f32 %v4983_v32, 0.0  ;;  %v5307_v32 = vunpack.c.l.bf16 %v6500_v57  ;;  %v6501_v20 = vld [vmem:[%s6604_s20 + $0x10] sm:$0xff]  }
 0x354   : > { %v4978_v10 = vadd.f32 %v4977_v17, %v9520_v1  ;;  %v5041_v7 = vmax.f32 %v4975_v37, 0.0 }
 0x355   : > { %v5044_v63 = vmax.f32 %v4986_v40, 0.0  ;;  %v5305_v40 = vunpack.c.l.bf16 %v6501_v20 }
 0x356   : > { %v5042_v47 = vmax.f32 %v4978_v10, 0.0 }
 0x357   : > { %v5064_v12 = vpack.c.bf16 %v5044_v63, %v5043_v61  ;;  %v5308_v61 = vunpack.c.h.bf16 %v6500_v57 }
 0x358   : > { %v5063_v23 = vpack.c.bf16 %v5042_v47, %v5041_v7  ;;  %v6246_v58 = vpop.f32.mrb[168].mxu1  ;;  %v5306_v47 = vunpack.c.h.bf16 %v6501_v20 }
 0x359   : > { %v4999_v25 = vadd.f32 %v6246_v58, %v9536_v28  ;;  %v4990_v39 = vpop.f32.mrb[169].mxu1 }
 0x35a   : > { %v4991_v29 = vadd.f32 %v4990_v39, %v9530_v26  ;;  %v6247_v55 = vpop.f32.mrb[170].mxu1  ;;  %6288 = vmatprep.mubr.bf16.mxu0 %v5063_v23 }
 0x35b   : > { %v5002_v51 = vadd.f32 %v6247_v55, %v9538_v42  ;;  %v4993_v4 = vpop.f32.mrb[171].mxu1  ;;  %6289 = vmatmul.mubr.bf16.gmra.mrb[164].mxu0 %v5064_v12  ;;  %v5047_v33 = vmax.f32 %v4999_v25, 0.0 }
 0x35c   : > { %v4994_v1 = vadd.f32 %v4993_v4, %v9532_v38  ;;  %v5045_v30 = vmax.f32 %v4991_v29, 0.0 }
 0x35d   : > { %v5048_v24 = vmax.f32 %v5002_v51, 0.0 }
 0x35e   : > { %v5046_v48 = vmax.f32 %v4994_v1, 0.0 }
 0x35f   : > { %v5066_v0 = vpack.c.bf16 %v5048_v24, %v5047_v33  ;;  %v6502_v33 = vld [vmem:[%s6604_s20 + $0x28] sm:$0xff]  }
 0x360   : > { %v5065_v15 = vpack.c.bf16 %v5046_v48, %v5045_v30  ;;  %v6250_v16 = vpop.f32.mrb[172].mxu1  ;;  %v5311_v24 = vunpack.c.l.bf16 %v6502_v33 }
 0x361   : > { %v5015_v28 = vadd.f32 %v6250_v16, %v9548_v46  ;;  %v5006_v53 = vpop.f32.mrb[173].mxu1 }
 0x362   : > { %v5007_v26 = vadd.f32 %v5006_v53, %v9542_v11  ;;  %v6251_v35 = vpop.f32.mrb[174].mxu1  ;;  %6292 = vmatprep.mubr.bf16.mxu0 %v5065_v15  ;;  %v9587_v11 = vld [vmem:[%s9684_s6] ss:$0 sm:$0xff]  ;;  %v5312_v53 = vunpack.c.h.bf16 %v6502_v33 }
 0x363   : > { %v5018_v42 = vadd.f32 %v6251_v35, %v9550_v19  ;;  %v5009_v49 = vpop.f32.mrb[175].mxu1  ;;  %6293 = vmatmul.mubr.bf16.gmra.mrb[168].mxu0 %v5066_v0  ;;  %v5051_v8 = vmax.f32 %v5015_v28, 0.0  ;;  %v5303_v19 = vunpack.c.l.bf16 %v6498_v41  ;;  %v6503_v0 = vld [vmem:[%s6604_s20 + $0x20] sm:$0xff]  }
 0x364   : > { %v5010_v38 = vadd.f32 %v5009_v49, %v9544_v52  ;;  %v5049_v18 = vmax.f32 %v5007_v26, 0.0  ;;  %v5309_v15 = vunpack.c.l.bf16 %v6503_v0 }
 0x365   : > { %v5052_v60 = vmax.f32 %v5018_v42, 0.0  ;;  %v5310_v42 = vunpack.c.h.bf16 %v6503_v0 }
 0x366   : > { %v5050_v14 = vmax.f32 %v5010_v38, 0.0 }
 0x367   : > { %v5068_v56 = vpack.c.bf16 %v5052_v60, %v5051_v8 }
 0x368   : > { %v5067_v46 = vpack.c.bf16 %v5050_v14, %v5049_v18 }
 0x36a   : > { %6296 = vmatprep.mubr.bf16.mxu0 %v5067_v46 }
 0x36b   : > { %6297 = vmatmul.mubr.bf16.gmra.mrb[172].mxu0 %v5068_v56 }
 0x406   : > { %v6270_v45 = vpop.f32.mrb[144].mxu0 }
 0x407   : > { %v5183_v52 = vadd.f32 %v6270_v45, %v9587_v11  ;;  %v5174_v2 = vpop.f32.mrb[145].mxu0 }
 0x408   : > { %v5175_v6 = vadd.f32 %v9587_v11, %v5174_v2  ;;  %v6271_v62 = vpop.f32.mrb[146].mxu0  ;;  %v6505_v2 = vld [vmem:[%s6604_s20 + $0x30] sm:$0xff]  }
 0x409   : > { %v5335_v21 = vadd.f32 %v5303_v19, %v5183_v52  ;;  %v5186_v59 = vadd.f32 %v6271_v62, %v9587_v11  ;;  %v5177_v9 = vpop.f32.mrb[147].mxu0  ;;  %v5316_v62 = vunpack.c.h.bf16 %v6504_v54 }
 0x40a   : > { %v5333_v36 = vadd.f32 %v5301_v5, %v5175_v6  ;;  %v5178_v44 = vadd.f32 %v9587_v11, %v5177_v9  ;;  %v5315_v5 = vunpack.c.l.bf16 %v6504_v54  ;;  %v5314_v9 = vunpack.c.h.bf16 %v6505_v2 }
 0x40b   : > { %v5367_v50 = vmax.f32 %v5335_v21, 0.0  ;;  %v5336_v34 = vadd.f32 %v5304_v31, %v5186_v59  ;;  %v5313_v31 = vunpack.c.l.bf16 %v6505_v2 }
 0x40c   : > { %v5365_v3 = vmax.f32 %v5333_v36, 0.0  ;;  %v5334_v22 = vadd.f32 %v5302_v13, %v5178_v44 }
 0x40d   : > { %5399 = vst [vmem:[%s9598_s18 + $0x10] sm:$0xff] %v5367_v50  ;;  %v5368_v43 = vmax.f32 %v5336_v34, 0.0 }
 0x40e   : > { %5397 = vst [vmem:[%s9598_s18] sm:$0xff] %v5365_v3  ;;  %v5366_v27 = vmax.f32 %v5334_v22, 0.0  ;;  %v6274_v37 = vpop.f32.mrb[148].mxu0 }
 0x40f   : > { %5400 = vst [vmem:[%s9598_s18 + $0x18] sm:$0xff] %v5368_v43  ;;  %v5199_v17 = vadd.f32 %v6274_v37, %v9587_v11  ;;  %v5190_v10 = vpop.f32.mrb[149].mxu0  ;;  %v6506_v37 = vld [vmem:[%s6604_s20 + $0x48] sm:$0xff]  }
 0x410   : > { %5398 = vst [vmem:[%s9598_s18 + $0x8] sm:$0xff] %v5366_v27  ;;  %v5191_v63 = vadd.f32 %v9587_v11, %v5190_v10  ;;  %v6275_v7 = vpop.f32.mrb[150].mxu0  ;;  %v5319_v20 = vunpack.c.l.bf16 %v6506_v37 }
 0x411   : > { %v5339_v12 = vadd.f32 %v5307_v32, %v5199_v17  ;;  %v5202_v23 = vadd.f32 %v6275_v7, %v9587_v11  ;;  %v5193_v58 = vpop.f32.mrb[151].mxu0 }
 0x412   : > { %v5337_v25 = vadd.f32 %v5305_v40, %v5191_v63  ;;  %v5194_v39 = vadd.f32 %v9587_v11, %v5193_v58  ;;  %v6507_v40 = vld [vmem:[%s6604_s20 + $0x40] sm:$0xff]  }
 0x413   : > { %v5371_v29 = vmax.f32 %v5339_v12, 0.0  ;;  %v5340_v55 = vadd.f32 %v5308_v61, %v5202_v23  ;;  %v5317_v17 = vunpack.c.l.bf16 %v6507_v40  ;;  %v5318_v12 = vunpack.c.h.bf16 %v6507_v40 }
 0x414   : > { %v5369_v51 = vmax.f32 %v5337_v25, 0.0  ;;  %v5338_v4 = vadd.f32 %v5306_v47, %v5194_v39  ;;  %v5320_v47 = vunpack.c.h.bf16 %v6506_v37 }
 0x415   : > { %5403 = vst [vmem:[%s9598_s18 + $0x30] sm:$0xff] %v5371_v29  ;;  %v5372_v1 = vmax.f32 %v5340_v55, 0.0 }
 0x416   : > { %5401 = vst [vmem:[%s9598_s18 + $0x20] sm:$0xff] %v5369_v51  ;;  %v5370_v30 = vmax.f32 %v5338_v4, 0.0  ;;  %v6278_v48 = vpop.f32.mrb[152].mxu0 }
 0x417   : > { %5404 = vst [vmem:[%s9598_s18 + $0x38] sm:$0xff] %v5372_v1  ;;  %v5215_v16 = vadd.f32 %v6278_v48, %v9587_v11  ;;  %v5206_v28 = vpop.f32.mrb[153].mxu0  ;;  %v6508_v48 = vld [vmem:[%s6604_s20 + $0x58] sm:$0xff]  }
 0x418   : > { %5402 = vst [vmem:[%s9598_s18 + $0x28] sm:$0xff] %v5370_v30  ;;  %v5207_v26 = vadd.f32 %v9587_v11, %v5206_v28  ;;  %v6279_v35 = vpop.f32.mrb[154].mxu0  ;;  %v5323_v0 = vunpack.c.l.bf16 %v6508_v48  ;;  %v6509_v28 = vld [vmem:[%s6604_s20 + $0x50] sm:$0xff]  }
 0x419   : > { %v5343_v49 = vadd.f32 %v5311_v24, %v5215_v16  ;;  %v5218_v38 = vadd.f32 %v6279_v35, %v9587_v11  ;;  %v5209_v8 = vpop.f32.mrb[155].mxu0 }
 0x41a   : > { %v5341_v60 = vadd.f32 %v5309_v15, %v5207_v26  ;;  %v5210_v18 = vadd.f32 %v9587_v11, %v5209_v8  ;;  %v5322_v8 = vunpack.c.h.bf16 %v6509_v28 }
 0x41b   : > { %v5375_v14 = vmax.f32 %v5343_v49, 0.0  ;;  %v5344_v56 = vadd.f32 %v5312_v53, %v5218_v38  ;;  %v5321_v53 = vunpack.c.l.bf16 %v6509_v28 }
 0x41c   : > { %v5373_v46 = vmax.f32 %v5341_v60, 0.0  ;;  %v5342_v41 = vadd.f32 %v5310_v42, %v5210_v18  ;;  %v5324_v42 = vunpack.c.h.bf16 %v6508_v48 }
 0x41d   : > { %5407 = vst [vmem:[%s9598_s18 + $0x50] sm:$0xff] %v5375_v14  ;;  %v5376_v19 = vmax.f32 %v5344_v56, 0.0 }
 0x41e   : > { %5405 = vst [vmem:[%s9598_s18 + $0x40] sm:$0xff] %v5373_v46  ;;  %v5374_v45 = vmax.f32 %v5342_v41, 0.0  ;;  %v6282_v52 = vpop.f32.mrb[156].mxu0 }
 0x41f   : > { %5408 = vst [vmem:[%s9598_s18 + $0x58] sm:$0xff] %v5376_v19  ;;  %v5231_v13 = vadd.f32 %v6282_v52, %v9587_v11  ;;  %v5222_v6 = vpop.f32.mrb[157].mxu0  ;;  %v6510_v52 = vld [vmem:[%s6604_s20 + $0x68] sm:$0xff]  }
 0x420   : > { %5406 = vst [vmem:[%s9598_s18 + $0x48] sm:$0xff] %v5374_v45  ;;  %v5223_v21 = vadd.f32 %v9587_v11, %v5222_v6  ;;  %v6283_v59 = vpop.f32.mrb[158].mxu0  ;;  %v5327_v2 = vunpack.c.l.bf16 %v6510_v52  ;;  %v6511_v6 = vld [vmem:[%s6604_s20 + $0x60] sm:$0xff]  }
 0x421   : > { %v5347_v36 = vadd.f32 %v5315_v5, %v5231_v13  ;;  %v5234_v44 = vadd.f32 %v6283_v59, %v9587_v11  ;;  %v5225_v50 = vpop.f32.mrb[159].mxu0 }
 0x422   : > { %v5345_v34 = vadd.f32 %v5313_v31, %v5223_v21  ;;  %v5226_v3 = vadd.f32 %v9587_v11, %v5225_v50  ;;  %v5326_v50 = vunpack.c.h.bf16 %v6511_v6 }
 0x423   : > { %v5379_v22 = vmax.f32 %v5347_v36, 0.0  ;;  %v5348_v43 = vadd.f32 %v5316_v62, %v5234_v44  ;;  %v5325_v62 = vunpack.c.l.bf16 %v6511_v6 }
 0x424   : > { %v5377_v57 = vmax.f32 %v5345_v34, 0.0  ;;  %v5346_v32 = vadd.f32 %v5314_v9, %v5226_v3  ;;  %v5328_v9 = vunpack.c.h.bf16 %v6510_v52 }
 0x425   : > { %5411 = vst [vmem:[%s9598_s18 + $0x70] sm:$0xff] %v5379_v22  ;;  %v5380_v27 = vmax.f32 %v5348_v43, 0.0 }
 0x426   : > { %5409 = vst [vmem:[%s9598_s18 + $0x60] sm:$0xff] %v5377_v57  ;;  %v5378_v10 = vmax.f32 %v5346_v32, 0.0  ;;  %v6286_v61 = vpop.f32.mrb[160].mxu0 }
 0x427   : > { %5412 = vst [vmem:[%s9598_s18 + $0x78] sm:$0xff] %v5380_v27  ;;  %v5247_v63 = vadd.f32 %v6286_v61, %v9587_v11  ;;  %v5238_v7 = vpop.f32.mrb[161].mxu0 }
 0x428   : > { %5410 = vst [vmem:[%s9598_s18 + $0x68] sm:$0xff] %v5378_v10  ;;  %v5239_v23 = vadd.f32 %v9587_v11, %v5238_v7  ;;  %v6287_v58 = vpop.f32.mrb[162].mxu0  ;;  %v6513_v7 = vld [vmem:[%s6604_s20 + $0x70] sm:$0xff]  }
 0x429   : > { %v5351_v25 = vadd.f32 %v5319_v20, %v5247_v63  ;;  %v5250_v39 = vadd.f32 %v6287_v58, %v9587_v11  ;;  %v5241_v29 = vpop.f32.mrb[163].mxu0 }
 0x42a   : > { %v5349_v55 = vadd.f32 %v5317_v17, %v5239_v23  ;;  %v5242_v51 = vadd.f32 %v9587_v11, %v5241_v29  ;;  %v6512_v17 = vld [vmem:[%s6604_s20 + $0x78] sm:$0xff]   ;;  %v5330_v29 = vunpack.c.h.bf16 %v6513_v7 }
 0x42b   : > { %v5383_v4 = vmax.f32 %v5351_v25, 0.0  ;;  %v5352_v1 = vadd.f32 %v5320_v47, %v5250_v39  ;;  %v5331_v10 = vunpack.c.l.bf16 %v6512_v17  ;;  %v5329_v47 = vunpack.c.l.bf16 %v6513_v7 }
 0x42c   : > { %v5381_v33 = vmax.f32 %v5349_v55, 0.0  ;;  %v5350_v24 = vadd.f32 %v5318_v12, %v5242_v51  ;;  %v5332_v58 = vunpack.c.h.bf16 %v6512_v17 }
 0x42d   : > { %5415 = vst [vmem:[%s9598_s18 + $0x90] sm:$0xff] %v5383_v4  ;;  %v5384_v30 = vmax.f32 %v5352_v1, 0.0 }
 0x42e   : > { %5413 = vst [vmem:[%s9598_s18 + $0x80] sm:$0xff] %v5381_v33  ;;  %v5382_v15 = vmax.f32 %v5350_v24, 0.0  ;;  %v6290_v16 = vpop.f32.mrb[164].mxu0 }
 0x42f   : > { %5416 = vst [vmem:[%s9598_s18 + $0x98] sm:$0xff] %v5384_v30  ;;  %v5263_v26 = vadd.f32 %v6290_v16, %v9587_v11  ;;  %v5254_v35 = vpop.f32.mrb[165].mxu0 }
 0x430   : > { %5414 = vst [vmem:[%s9598_s18 + $0x88] sm:$0xff] %v5382_v15  ;;  %v5255_v49 = vadd.f32 %v9587_v11, %v5254_v35  ;;  %v6291_v38 = vpop.f32.mrb[166].mxu0 }
 0x431   : > { %v5355_v60 = vadd.f32 %v5323_v0, %v5263_v26  ;;  %v5266_v18 = vadd.f32 %v6291_v38, %v9587_v11  ;;  %v5257_v14 = vpop.f32.mrb[167].mxu0 }
 0x432   : > { %v5353_v56 = vadd.f32 %v5321_v53, %v5255_v49  ;;  %v5258_v46 = vadd.f32 %v9587_v11, %v5257_v14 }
 0x433   : > { %v5387_v41 = vmax.f32 %v5355_v60, 0.0  ;;  %v5356_v19 = vadd.f32 %v5324_v42, %v5266_v18 }
 0x434   : > { %v5385_v54 = vmax.f32 %v5353_v56, 0.0  ;;  %v5354_v5 = vadd.f32 %v5322_v8, %v5258_v46 }
 0x435   : > { %5419 = vst [vmem:[%s9598_s18 + $0xb0] sm:$0xff] %v5387_v41  ;;  %v5388_v45 = vmax.f32 %v5356_v19, 0.0 }
 0x436   : > { %5417 = vst [vmem:[%s9598_s18 + $0xa0] sm:$0xff] %v5385_v54  ;;  %v5386_v31 = vmax.f32 %v5354_v5, 0.0  ;;  %v6294_v13 = vpop.f32.mrb[168].mxu0 }
 0x437   : > { %5420 = vst [vmem:[%s9598_s18 + $0xb8] sm:$0xff] %v5388_v45  ;;  %v5279_v21 = vadd.f32 %v6294_v13, %v9587_v11  ;;  %v5270_v59 = vpop.f32.mrb[169].mxu0 }
 0x438   : > { %5418 = vst [vmem:[%s9598_s18 + $0xa8] sm:$0xff] %v5386_v31  ;;  %v5271_v36 = vadd.f32 %v9587_v11, %v5270_v59  ;;  %v6295_v44 = vpop.f32.mrb[170].mxu0 }
 0x439   : > { %v5359_v34 = vadd.f32 %v5327_v2, %v5279_v21  ;;  %v5282_v3 = vadd.f32 %v6295_v44, %v9587_v11  ;;  %v5273_v22 = vpop.f32.mrb[171].mxu0 }
 0x43a   : > { %v5357_v43 = vadd.f32 %v5325_v62, %v5271_v36  ;;  %v5274_v57 = vadd.f32 %v9587_v11, %v5273_v22 }
 0x43b   : > { %v5391_v32 = vmax.f32 %v5359_v34, 0.0  ;;  %v5360_v27 = vadd.f32 %v5328_v9, %v5282_v3 }
 0x43c   : > { %v5389_v37 = vmax.f32 %v5357_v43, 0.0  ;;  %v5358_v20 = vadd.f32 %v5326_v50, %v5274_v57 }
 0x43d   : > { %5423 = vst [vmem:[%s9598_s18 + $0xd0] sm:$0xff] %v5391_v32  ;;  %v5392_v40 = vmax.f32 %v5360_v27, 0.0 }
 0x43e   : > { %5421 = vst [vmem:[%s9598_s18 + $0xc0] sm:$0xff] %v5389_v37  ;;  %v5390_v61 = vmax.f32 %v5358_v20, 0.0  ;;  %v6298_v63 = vpop.f32.mrb[172].mxu0 }
 0x43f   : > { %5424 = vst [vmem:[%s9598_s18 + $0xd8] sm:$0xff] %v5392_v40  ;;  %v5295_v12 = vadd.f32 %v6298_v63, %v9587_v11  ;;  %v5286_v23 = vpop.f32.mrb[173].mxu0 }
 0x440   : > { %5422 = vst [vmem:[%s9598_s18 + $0xc8] sm:$0xff] %v5390_v61  ;;  %v5287_v25 = vadd.f32 %v9587_v11, %v5286_v23  ;;  %v6299_v39 = vpop.f32.mrb[174].mxu0 }
 0x441   : > { %v5363_v55 = vadd.f32 %v5331_v10, %v5295_v12  ;;  %v5298_v51 = vadd.f32 %v6299_v39, %v9587_v11  ;;  %v5289_v4 = vpop.f32.mrb[175].mxu0 }
 0x442   : > { %v5361_v1 = vadd.f32 %v5329_v47, %v5287_v25  ;;  %v5290_v33 = vadd.f32 %v9587_v11, %v5289_v4 }
 0x443   : > { %v5395_v24 = vmax.f32 %v5363_v55, 0.0  ;;  %v5364_v30 = vadd.f32 %v5332_v58, %v5298_v51 }
 0x444   : > { %v5393_v48 = vmax.f32 %v5361_v1, 0.0  ;;  %v5362_v0 = vadd.f32 %v5330_v29, %v5290_v33 }
 0x445   : > { %5427 = vst [vmem:[%s9598_s18 + $0xf0] sm:$0xff] %v5395_v24  ;;  %v5396_v15 = vmax.f32 %v5364_v30, 0.0 }
 0x446   : > { %5425 = vst [vmem:[%s9598_s18 + $0xe0] sm:$0xff] %v5393_v48  ;;  %v5394_v16 = vmax.f32 %v5362_v0, 0.0 }
 0x447   : > { %5428 = vst [vmem:[%s9598_s18 + $0xf8] sm:$0xff] %v5396_v15 }
 0x448   : > { %5426 = vst [vmem:[%s9598_s18 + $0xe8] sm:$0xff] %v5394_v16 }
 0x449 PF: > { %s18_s27 = sadd.s32 1, %s6520_s27  }
 0x44a   : > { %p15_p4 = scmp.ge.s32.totalorder %s18_s27, 4  }
 0x44c   :  { %17 = sbr.rel (!%p15_p4) target bundleno = 1 (0x1), region = 82 }

</bundles_post_ra>
